<compile_context>
chip_gen: v7x
topology: tpu7x:2x2x1
jax: 0.10.0
libtpu: 0.0.40
codegen_flags: <defaults>
</compile_context>

<pallas_src>
import functools

import jax
import jax.numpy as jnp
from jax import lax
from jax.experimental import pallas as pl
from jax.experimental.pallas import tpu as pltpu  # noqa: F401  (TPU backend)


# ----------------------------- fused kernel --------------------------------

def _decoder_layer_kernel(
        # data (seq-first, as given by the module): (L, B, D)
        tgt_ref, mem_ref, pos_ref, qpos_ref, qsine_ref,
        # packed parameters
        w_in_ref,    # (D, 13D + Dff)
        b_in_ref,    # (1, 13D + Dff)
        w2_ref,      # (Dff, D)
        small_ref,   # (7, D): [n1_g, n1_b, n2_g, n2_b, n3_g, n3_b, ffn_b2]
        # outputs
        out_ref,     # (Lq, B, D)
        w_attn_ref,  # (B, Lq, Lq + Lk)  [self-attn | cross-attn] avg weights
        *, nhead, use_qpos, eps):
    Lq, B, D = tgt_ref.shape
    Lk = mem_ref.shape[0]
    hd = D // nhead
    Dff = w2_ref.shape[0]

    def lin(x, c0, c1):
        return (jnp.dot(x, w_in_ref[:, c0:c1],
                        preferred_element_type=jnp.float32)
                + b_in_ref[:, c0:c1])

    def layernorm(z, g_row, b_row):
        mu = jnp.mean(z, axis=-1, keepdims=True)
        var = jnp.mean(jnp.square(z - mu), axis=-1, keepdims=True)
        return ((z - mu) * lax.rsqrt(var + eps)
                * small_ref[g_row:g_row + 1, :] + small_ref[b_row:b_row + 1, :])

    def fold(ref):
        # (L, B, D) -> (B*L, D), batch-major rows (rows b*L .. b*L+L-1 = batch b)
        x = ref[...]
        return jnp.transpose(x, (1, 0, 2)).reshape(x.shape[0] * B, D)

    def attention(q2d, k2d, v2d, Lkk, out_col, q2d_b=None, k2d_b=None):
        # Head-batched attention.  DAB-DETR cross-attn queries/keys are the
        # concat of a content part and a positional part per head, so scores
        # are the sum of the two paired dot products.  q-side scaling is
        # pre-folded into the projection weights.
        ow = w_in_ref[:, out_col:out_col + D]     # (D, D) out-projection
        ob = b_in_ref[:, out_col:out_col + D]     # (1, D)
        ys, ws = [], []
        for b in range(B):                        # static, B is tiny
            sq = slice(b * Lq, (b + 1) * Lq)
            sk = slice(b * Lkk, (b + 1) * Lkk)
            qh = q2d[sq].reshape(Lq, nhead, hd)
            kh = k2d[sk].reshape(Lkk, nhead, hd)
            s = jnp.einsum('qhd,khd->hqk', qh, kh,
                           preferred_element_type=jnp.float32)
            if q2d_b is not None:
                qh2 = q2d_b[sq].reshape(Lq, nhead, hd)
                kh2 = k2d_b[sk].reshape(Lkk, nhead, hd)
                s = s + jnp.einsum('qhd,khd->hqk', qh2, kh2,
                                   preferred_element_type=jnp.float32)
            s = s - jnp.max(s, axis=-1, keepdims=True)
            e = jnp.exp(s)
            p = e / jnp.sum(e, axis=-1, keepdims=True)          # exact softmax
            ws.append(jnp.mean(p, axis=0))                      # (Lq, Lkk)
            vh = v2d[sk].reshape(Lkk, nhead, hd)
            o = jnp.einsum('hqk,khd->qhd', p, vh,
                           preferred_element_type=jnp.float32)  # (Lq, nhead, hd)
            ys.append(jnp.dot(o.reshape(Lq, D), ow,
                              preferred_element_type=jnp.float32))
        return jnp.concatenate(ys, axis=0) + ob, ws

    tgt2d = fold(tgt_ref)        # (B*Lq, D)
    qpos2d = fold(qpos_ref)      # (B*Lq, D)
    qsine2d = fold(qsine_ref)    # (B*Lq, D)
    mem2d = fold(mem_ref)        # (B*Lk, D)
    pos2d = fold(pos_ref)        # (B*Lk, D)

    # ------------------------------ self-attention -----------------------------
    proj_t = lin(tgt2d, 0, 3 * D)                # [q_content | k_content | v]
    proj_p = lin(qpos2d, 3 * D, (6 if use_qpos else 5) * D)
    q_sa = proj_t[:, 0:D] + proj_p[:, 0:D]       # scaling pre-folded into both
    k_sa = proj_t[:, D:2 * D] + proj_p[:, D:2 * D]
    v_sa = proj_t[:, 2 * D:3 * D]
    sa_y, sa_w = attention(q_sa, k_sa, v_sa, Lq, 6 * D)
    tgt2d = layernorm(tgt2d + sa_y, 0, 1)

    # ------------------------------ cross-attention ----------------------------
    q_content = lin(tgt2d, 7 * D, 8 * D)
    q_sine = lin(qsine2d, 8 * D, 9 * D)
    proj_m = lin(mem2d, 9 * D, 11 * D)           # [k_content | v]
    k_content = proj_m[:, 0:D]
    v_ca = proj_m[:, D:2 * D]
    k_pos = lin(pos2d, 11 * D, 12 * D)
    if use_qpos:                                  # static (is_first / keep_query_pos)
        q_ca = q_content + proj_p[:, 2 * D:3 * D]   # + ca_qpos(query_pos), pre-scaled
        k_ca = k_content + k_pos
    else:
        q_ca = q_content
        k_ca = k_content
    # cross-attn embed_dim = 2D -> per head query/key = [content_h | sine_h/pos_h]
    ca_y, ca_w = attention(q_ca, k_ca, v_ca, Lk, 12 * D,
                           q2d_b=q_sine, k2d_b=k_pos)
    tgt2d = layernorm(tgt2d + ca_y, 2, 3)

    # ----------------------------------- FFN -----------------------------------
    h1 = jnp.maximum(lin(tgt2d, 13 * D, 13 * D + Dff), 0.0)       # relu
    ffn = (jnp.dot(h1, w2_ref[...], preferred_element_type=jnp.float32)
           + small_ref[6:7, :])
    tgt2d = layernorm(tgt2d + ffn, 4, 5)

    # --------------------------------- writes ----------------------------------
    out_ref[...] = jnp.transpose(tgt2d.reshape(B, Lq, D), (1, 0, 2))
    w_attn_ref[...] = jnp.concatenate(
        [jnp.stack(sa_w, axis=0), jnp.stack(ca_w, axis=0)], axis=-1)


# ----------------------------- parameter packing -----------------------------

def prepare_params(params, nhead):
    """One-time packing of the layer weights into contiguous slabs.

    Column layout of w_in / b_in (multiples of D, in order):
      [0:3D)        sa_qcontent* | sa_kcontent | sa_v
      [3D:6D)       sa_qpos*     | sa_kpos     | ca_qpos*
      [6D:7D)       sa_out
      [7D:9D)       ca_qcontent* | ca_qpos_sine*
      [9D:12D)      ca_kcontent  | ca_v        | ca_kpos
      [12D:13D)     ca_out
      [13D:13D+Dff) ffn linear1
    (*) q-side projections are pre-scaled by the attention scaling so the
    kernel never multiplies the scores.  Call once; reuse the result.
    """
    D = params['sa_qcontent'][0].shape[0]
    w1, b1, w2, b2 = params['ffn']
    hd = D // nhead
    sa_s = float(hd) ** -0.5
    ca_s = float(2 * hd) ** -0.5

    def wb(name, scale=1.0):
        w, b = params[name]
        return w * scale, b * scale

    pieces = [wb('sa_qcontent', sa_s), wb('sa_kcontent'), wb('sa_v'),
              wb('sa_qpos', sa_s), wb('sa_kpos'), wb('ca_qpos', ca_s),
              wb('sa_out'),
              wb('ca_qcontent', ca_s), wb('ca_qpos_sine', ca_s),
              wb('ca_kcontent'), wb('ca_v'), wb('ca_kpos'),
              wb('ca_out'),
              (w1, b1)]
    w_in = jnp.concatenate([w for w, _ in pieces], axis=1)          # (D, 13D+Dff)
    b_in = jnp.concatenate([b for _, b in pieces]).reshape(1, -1)   # (1, 13D+Dff)
    small = jnp.stack([params['norm1'][0], params['norm1'][1],
                       params['norm2'][0], params['norm2'][1],
                       params['norm3'][0], params['norm3'][1],
                       b2], axis=0)                                  # (7, D)
    return {'w_in': w_in, 'b_in': b_in, 'w2': w2, 'small': small}


# ----------------------------- wrapper --------------------------------------

def decoder_layer_forward(packed, tgt, memory, pos, query_pos, query_sine_embed,
                          nhead, is_first=False, keep_query_pos=False):
    Lq, B, D = tgt.shape
    Lk = memory.shape[0]
    hd = D // nhead
    Dff = packed['w2'].shape[0]
    use_qpos = bool(is_first or keep_query_pos)

    kernel = functools.partial(_decoder_layer_kernel, nhead=nhead,
                               use_qpos=use_qpos, eps=1e-5)

    rows_q, rows_k = B * Lq, B * Lk
    flops = (2 * rows_q * D * ((3 + (3 if use_qpos else 2) + 2) * D + 2 * Dff)
             + 2 * rows_k * D * 3 * D
             + 2 * B * nhead * (2 * Lq * Lq * hd + 3 * Lq * Lk * hd
                                + 2 * Lq * hd * D))
    transcendentals = B * nhead * Lq * (Lq + Lk)
    bytes_accessed = 4 * (tgt.size + memory.size + pos.size + query_pos.size
                          + query_sine_embed.size + packed['w_in'].size
                          + packed['b_in'].size + packed['w2'].size
                          + packed['small'].size
                          + Lq * B * D + B * Lq * (Lq + Lk))

    out, w_attn = pl.pallas_call(
        kernel,
        out_shape=(jax.ShapeDtypeStruct((Lq, B, D), jnp.float32),
                   jax.ShapeDtypeStruct((B, Lq, Lq + Lk), jnp.float32)),
        cost_estimate=pl.CostEstimate(flops=int(flops),
                                      transcendentals=int(transcendentals),
                                      bytes_accessed=int(bytes_accessed)),
    )(tgt, memory, pos, query_pos, query_sine_embed,
      packed['w_in'], packed['b_in'], packed['w2'], packed['small'])

    # Split the lane-packed weight slab back into (Q_weights, C_weights).
    return out, w_attn[:, :, :Lq], w_attn[:, :, Lq:]


# ----------------------------- parameter init -------------------------------

def init_params(key, d_model, dim_feedforward):
    keys = iter(jax.random.split(key, 64))

    def lin_p(din, dout):
        w = jax.random.normal(next(keys), (din, dout), jnp.float32) * 0.02
        b = jax.random.normal(next(keys), (dout,), jnp.float32) * 0.02
        return (w, b)

    def ln_p(d):
        return (jnp.ones((d,), jnp.float32), jnp.zeros((d,), jnp.float32))

    D, Dff = d_model, dim_feedforward
    params = {
        'sa_qcontent': lin_p(D, D), 'sa_qpos': lin_p(D, D),
        'sa_kcontent': lin_p(D, D), 'sa_kpos': lin_p(D, D),
        'sa_v': lin_p(D, D), 'sa_out': lin_p(D, D),
        'norm1': ln_p(D),
        'ca_qcontent': lin_p(D, D), 'ca_qpos': lin_p(D, D),
        'ca_kcontent': lin_p(D, D), 'ca_kpos': lin_p(D, D),
        'ca_v': lin_p(D, D), 'ca_qpos_sine': lin_p(D, D),
        'ca_out': lin_p(D, D),
        'norm2': ln_p(D), 'norm3': ln_p(D),
    }
    w1, b1 = lin_p(D, Dff)
    w2, b2 = lin_p(Dff, D)
    params['ffn'] = (w1, b1, w2, b2)
    return params


# ----------------------------- main ------------------------------------------

if __name__ == "__main__":
    d_model, nhead, dim_feedforward = 32, 4, 64
    num_queries, hw, bs = 8, 16, 2

    key = jax.random.PRNGKey(0)
    k_p, k_t, k_m, k_pos, k_qp, k_qs = jax.random.split(key, 6)

    params = init_params(k_p, d_model, dim_feedforward)
    packed = prepare_params(params, nhead)   # one-time weight packing (hoisted)

    tgt = jax.random.normal(k_t, (num_queries, bs, d_model), jnp.float32)
    memory = jax.random.normal(k_m, (hw, bs, d_model), jnp.float32)
    pos = jax.random.normal(k_pos, (hw, bs, d_model), jnp.float32)
    query_pos = jax.random.normal(k_qp, (num_queries, bs, d_model), jnp.float32)
    query_sine_embed = jax.random.normal(k_qs, (num_queries, bs, d_model), jnp.float32)

    fwd = jax.jit(decoder_layer_forward,
                  static_argnames=('nhead', 'is_first', 'keep_query_pos'))
    out, Q_weights, C_weights = fwd(
        packed, tgt, memory, pos, query_pos, query_sine_embed,
        nhead=nhead, is_first=True, keep_query_pos=False)

    jax.block_until_ready((out, Q_weights, C_weights))
    assert out.shape == (num_queries, bs, d_model)
    assert Q_weights.shape == (bs, num_queries, num_queries)
    assert C_weights.shape == (bs, num_queries, hw)
    print("KERNEL_OK")
</pallas_src>

<mosaic_0001>
module attributes {stable_mosaic.version = 11 : i64} {
  func.func @_decoder_layer_kernel(%arg0: memref<8x2x32xf32, #tpu.memory_space<vmem>>, %arg1: memref<16x2x32xf32, #tpu.memory_space<vmem>>, %arg2: memref<16x2x32xf32, #tpu.memory_space<vmem>>, %arg3: memref<8x2x32xf32, #tpu.memory_space<vmem>>, %arg4: memref<8x2x32xf32, #tpu.memory_space<vmem>>, %arg5: memref<32x480xf32, #tpu.memory_space<vmem>>, %arg6: memref<1x480xf32, #tpu.memory_space<vmem>>, %arg7: memref<64x32xf32, #tpu.memory_space<vmem>>, %arg8: memref<7x32xf32, #tpu.memory_space<vmem>>, %arg9: memref<8x2x32xf32, #tpu.memory_space<vmem>>, %arg10: memref<2x8x24xf32, #tpu.memory_space<vmem>>) attributes {dimension_semantics = [], scalar_prefetch = 0 : i64, scratch_operands = 0 : i64, tpu.core_type = #tpu.core_type<tc>} {
    %c0 = arith.constant 0 : index
    %c0_0 = arith.constant 0 : index
    %c0_1 = arith.constant 0 : index
    %0 = vector.load %arg0[%c0, %c0_0, %c0_1] : memref<8x2x32xf32, #tpu.memory_space<vmem>>, vector<8x2x32xf32>
    %1 = tpu.transpose %0, [1, 0, 2] : vector<8x2x32xf32> -> vector<2x8x32xf32>
    %2 = vector.shape_cast %1 : vector<2x8x32xf32> to vector<16x32xf32>
    %c0_2 = arith.constant 0 : index
    %c0_3 = arith.constant 0 : index
    %c0_4 = arith.constant 0 : index
    %3 = vector.load %arg3[%c0_2, %c0_3, %c0_4] : memref<8x2x32xf32, #tpu.memory_space<vmem>>, vector<8x2x32xf32>
    %4 = tpu.transpose %3, [1, 0, 2] : vector<8x2x32xf32> -> vector<2x8x32xf32>
    %5 = vector.shape_cast %4 : vector<2x8x32xf32> to vector<16x32xf32>
    %c0_5 = arith.constant 0 : index
    %c0_6 = arith.constant 0 : index
    %c0_7 = arith.constant 0 : index
    %6 = vector.load %arg4[%c0_5, %c0_6, %c0_7] : memref<8x2x32xf32, #tpu.memory_space<vmem>>, vector<8x2x32xf32>
    %7 = tpu.transpose %6, [1, 0, 2] : vector<8x2x32xf32> -> vector<2x8x32xf32>
    %8 = vector.shape_cast %7 : vector<2x8x32xf32> to vector<16x32xf32>
    %c0_8 = arith.constant 0 : index
    %c0_9 = arith.constant 0 : index
    %c0_10 = arith.constant 0 : index
    %9 = vector.load %arg1[%c0_8, %c0_9, %c0_10] : memref<16x2x32xf32, #tpu.memory_space<vmem>>, vector<16x2x32xf32>
    %10 = tpu.transpose %9, [1, 0, 2] : vector<16x2x32xf32> -> vector<2x16x32xf32>
    %11 = vector.shape_cast %10 : vector<2x16x32xf32> to vector<32x32xf32>
    %c0_11 = arith.constant 0 : index
    %c0_12 = arith.constant 0 : index
    %c0_13 = arith.constant 0 : index
    %12 = vector.load %arg2[%c0_11, %c0_12, %c0_13] : memref<16x2x32xf32, #tpu.memory_space<vmem>>, vector<16x2x32xf32>
    %13 = tpu.transpose %12, [1, 0, 2] : vector<16x2x32xf32> -> vector<2x16x32xf32>
    %14 = vector.shape_cast %13 : vector<2x16x32xf32> to vector<32x32xf32>
    %c0_14 = arith.constant 0 : index
    %c0_15 = arith.constant 0 : index
    %15 = vector.load %arg5[%c0_14, %c0_15] : memref<32x480xf32, #tpu.memory_space<vmem>>, vector<32x96xf32>
    %cst = arith.constant dense<0.000000e+00> : vector<16x96xf32>
    %16 = tpu.matmul %2, %15, %cst {dimension_numbers = #tpu.dot_dimension_numbers<[1], [0], [0], [1], [0, 0, 1, 1], [], []>} : vector<16x32xf32>, vector<32x96xf32>, vector<16x96xf32> -> vector<16x96xf32>
    %c0_16 = arith.constant 0 : index
    %c0_17 = arith.constant 0 : index
    %17 = vector.load %arg6[%c0_16, %c0_17] : memref<1x480xf32, #tpu.memory_space<vmem>>, vector<1x96xf32>
    %18 = vector.broadcast %17 : vector<1x96xf32> to vector<16x96xf32>
    %19 = arith.addf %16, %18 : vector<16x96xf32>
    %c0_18 = arith.constant 0 : index
    %c96 = arith.constant 96 : index
    %20 = vector.load %arg5[%c0_18, %c96] : memref<32x480xf32, #tpu.memory_space<vmem>>, vector<32x96xf32>
    %cst_19 = arith.constant dense<0.000000e+00> : vector<16x96xf32>
    %21 = tpu.matmul %5, %20, %cst_19 {dimension_numbers = #tpu.dot_dimension_numbers<[1], [0], [0], [1], [0, 0, 1, 1], [], []>} : vector<16x32xf32>, vector<32x96xf32>, vector<16x96xf32> -> vector<16x96xf32>
    %c0_20 = arith.constant 0 : index
    %c96_21 = arith.constant 96 : index
    %22 = vector.load %arg6[%c0_20, %c96_21] : memref<1x480xf32, #tpu.memory_space<vmem>>, vector<1x96xf32>
    %23 = vector.broadcast %22 : vector<1x96xf32> to vector<16x96xf32>
    %24 = arith.addf %21, %23 : vector<16x96xf32>
    %25 = vector.extract_strided_slice %19 {offsets = [0, 0], sizes = [16, 32], strides = [1, 1]} : vector<16x96xf32> to vector<16x32xf32>
    %26 = vector.extract_strided_slice %24 {offsets = [0, 0], sizes = [16, 32], strides = [1, 1]} : vector<16x96xf32> to vector<16x32xf32>
    %27 = arith.addf %25, %26 : vector<16x32xf32>
    %28 = vector.extract_strided_slice %19 {offsets = [0, 32], sizes = [16, 32], strides = [1, 1]} : vector<16x96xf32> to vector<16x32xf32>
    %29 = vector.extract_strided_slice %24 {offsets = [0, 32], sizes = [16, 32], strides = [1, 1]} : vector<16x96xf32> to vector<16x32xf32>
    %30 = arith.addf %28, %29 : vector<16x32xf32>
    %31 = vector.extract_strided_slice %19 {offsets = [0, 64], sizes = [16, 32], strides = [1, 1]} : vector<16x96xf32> to vector<16x32xf32>
    %c0_22 = arith.constant 0 : index
    %c192 = arith.constant 192 : index
    %32 = vector.load %arg5[%c0_22, %c192] : memref<32x480xf32, #tpu.memory_space<vmem>>, vector<32x32xf32>
    %c0_23 = arith.constant 0 : index
    %c192_24 = arith.constant 192 : index
    %33 = vector.load %arg6[%c0_23, %c192_24] : memref<1x480xf32, #tpu.memory_space<vmem>>, vector<1x32xf32>
    %34 = vector.extract_strided_slice %27 {offsets = [0, 0], sizes = [8, 32], strides = [1, 1]} : vector<16x32xf32> to vector<8x32xf32>
    %35 = vector.shape_cast %34 : vector<8x32xf32> to vector<8x4x8xf32>
    %36 = vector.extract_strided_slice %30 {offsets = [0, 0], sizes = [8, 32], strides = [1, 1]} : vector<16x32xf32> to vector<8x32xf32>
    %37 = vector.shape_cast %36 : vector<8x32xf32> to vector<8x4x8xf32>
    "tpu.trace_start"() <{level = 10 : i32, message = "qhd,khd->hqk"}> : () -> ()
    %cst_25 = arith.constant dense<0.000000e+00> : vector<4x8x8xf32>
    %38 = tpu.matmul %35, %37, %cst_25 {dimension_numbers = #tpu.dot_dimension_numbers<[2], [2], [0], [0], [0, 1, 0, 0, 1, 0], [1], [1]>} : vector<8x4x8xf32>, vector<8x4x8xf32>, vector<4x8x8xf32> -> vector<4x8x8xf32>
    "tpu.trace_stop"() : () -> ()
    %cst_26 = arith.constant dense<0xFF800000> : vector<4x8xf32>
    %39 = vector.multi_reduction <maximumf>, %38, %cst_26 [2] : vector<4x8x8xf32> to vector<4x8xf32>
    %40 = vector.shape_cast %39 : vector<4x8xf32> to vector<4x8x1xf32>
    %41 = vector.broadcast %40 : vector<4x8x1xf32> to vector<4x8x8xf32>
    %42 = arith.subf %38, %41 : vector<4x8x8xf32>
    %43 = math.exp %42 : vector<4x8x8xf32>
    %cst_27 = arith.constant dense<0.000000e+00> : vector<4x8xf32>
    %44 = vector.multi_reduction <add>, %43, %cst_27 [2] : vector<4x8x8xf32> to vector<4x8xf32>
    %45 = vector.shape_cast %44 : vector<4x8xf32> to vector<4x8x1xf32>
    %46 = vector.broadcast %45 : vector<4x8x1xf32> to vector<4x8x8xf32>
    %47 = arith.divf %43, %46 : vector<4x8x8xf32>
    %cst_28 = arith.constant dense<0.000000e+00> : vector<8x8xf32>
    %48 = vector.multi_reduction <add>, %47, %cst_28 [0] : vector<4x8x8xf32> to vector<8x8xf32>
    %cst_29 = arith.constant 4.000000e+00 : f32
    %49 = vector.broadcast %cst_29 : f32 to vector<8x8xf32>
    %50 = arith.divf %48, %49 : vector<8x8xf32>
    %51 = vector.extract_strided_slice %31 {offsets = [0, 0], sizes = [8, 32], strides = [1, 1]} : vector<16x32xf32> to vector<8x32xf32>
    %52 = vector.shape_cast %51 : vector<8x32xf32> to vector<8x4x8xf32>
    "tpu.trace_start"() <{level = 10 : i32, message = "hqk,khd->qhd"}> : () -> ()
    %cst_30 = arith.constant dense<0.000000e+00> : vector<4x8x8xf32>
    %53 = tpu.matmul %52, %47, %cst_30 {dimension_numbers = #tpu.dot_dimension_numbers<[0], [2], [2], [1], [0, 1, 0, 2, 1, 1], [1], [0]>} : vector<8x4x8xf32>, vector<4x8x8xf32>, vector<4x8x8xf32> -> vector<4x8x8xf32>
    %54 = tpu.transpose %53, [2, 0, 1] : vector<4x8x8xf32> -> vector<8x4x8xf32>
    "tpu.trace_stop"() : () -> ()
    %55 = vector.shape_cast %54 : vector<8x4x8xf32> to vector<8x32xf32>
    %cst_31 = arith.constant dense<0.000000e+00> : vector<8x32xf32>
    %56 = tpu.matmul %55, %32, %cst_31 {dimension_numbers = #tpu.dot_dimension_numbers<[1], [0], [0], [1], [0, 0, 1, 1], [], []>} : vector<8x32xf32>, vector<32x32xf32>, vector<8x32xf32> -> vector<8x32xf32>
    %57 = vector.extract_strided_slice %27 {offsets = [8, 0], sizes = [8, 32], strides = [1, 1]} : vector<16x32xf32> to vector<8x32xf32>
    %58 = vector.shape_cast %57 : vector<8x32xf32> to vector<8x4x8xf32>
    %59 = vector.extract_strided_slice %30 {offsets = [8, 0], sizes = [8, 32], strides = [1, 1]} : vector<16x32xf32> to vector<8x32xf32>
    %60 = vector.shape_cast %59 : vector<8x32xf32> to vector<8x4x8xf32>
    "tpu.trace_start"() <{level = 10 : i32, message = "qhd,khd->hqk"}> : () -> ()
    %cst_32 = arith.constant dense<0.000000e+00> : vector<4x8x8xf32>
    %61 = tpu.matmul %58, %60, %cst_32 {dimension_numbers = #tpu.dot_dimension_numbers<[2], [2], [0], [0], [0, 1, 0, 0, 1, 0], [1], [1]>} : vector<8x4x8xf32>, vector<8x4x8xf32>, vector<4x8x8xf32> -> vector<4x8x8xf32>
    "tpu.trace_stop"() : () -> ()
    %cst_33 = arith.constant dense<0xFF800000> : vector<4x8xf32>
    %62 = vector.multi_reduction <maximumf>, %61, %cst_33 [2] : vector<4x8x8xf32> to vector<4x8xf32>
    %63 = vector.shape_cast %62 : vector<4x8xf32> to vector<4x8x1xf32>
    %64 = vector.broadcast %63 : vector<4x8x1xf32> to vector<4x8x8xf32>
    %65 = arith.subf %61, %64 : vector<4x8x8xf32>
    %66 = math.exp %65 : vector<4x8x8xf32>
    %cst_34 = arith.constant dense<0.000000e+00> : vector<4x8xf32>
    %67 = vector.multi_reduction <add>, %66, %cst_34 [2] : vector<4x8x8xf32> to vector<4x8xf32>
    %68 = vector.shape_cast %67 : vector<4x8xf32> to vector<4x8x1xf32>
    %69 = vector.broadcast %68 : vector<4x8x1xf32> to vector<4x8x8xf32>
    %70 = arith.divf %66, %69 : vector<4x8x8xf32>
    %cst_35 = arith.constant dense<0.000000e+00> : vector<8x8xf32>
    %71 = vector.multi_reduction <add>, %70, %cst_35 [0] : vector<4x8x8xf32> to vector<8x8xf32>
    %cst_36 = arith.constant 4.000000e+00 : f32
    %72 = vector.broadcast %cst_36 : f32 to vector<8x8xf32>
    %73 = arith.divf %71, %72 : vector<8x8xf32>
    %74 = vector.extract_strided_slice %31 {offsets = [8, 0], sizes = [8, 32], strides = [1, 1]} : vector<16x32xf32> to vector<8x32xf32>
    %75 = vector.shape_cast %74 : vector<8x32xf32> to vector<8x4x8xf32>
    "tpu.trace_start"() <{level = 10 : i32, message = "hqk,khd->qhd"}> : () -> ()
    %cst_37 = arith.constant dense<0.000000e+00> : vector<4x8x8xf32>
    %76 = tpu.matmul %75, %70, %cst_37 {dimension_numbers = #tpu.dot_dimension_numbers<[0], [2], [2], [1], [0, 1, 0, 2, 1, 1], [1], [0]>} : vector<8x4x8xf32>, vector<4x8x8xf32>, vector<4x8x8xf32> -> vector<4x8x8xf32>
    %77 = tpu.transpose %76, [2, 0, 1] : vector<4x8x8xf32> -> vector<8x4x8xf32>
    "tpu.trace_stop"() : () -> ()
    %78 = vector.shape_cast %77 : vector<8x4x8xf32> to vector<8x32xf32>
    %cst_38 = arith.constant dense<0.000000e+00> : vector<8x32xf32>
    %79 = tpu.matmul %78, %32, %cst_38 {dimension_numbers = #tpu.dot_dimension_numbers<[1], [0], [0], [1], [0, 0, 1, 1], [], []>} : vector<8x32xf32>, vector<32x32xf32>, vector<8x32xf32> -> vector<8x32xf32>
    %80 = tpu.concatenate %56, %79 in 0 : vector<8x32xf32>, vector<8x32xf32> -> vector<16x32xf32>
    %81 = vector.broadcast %33 : vector<1x32xf32> to vector<16x32xf32>
    %82 = arith.addf %80, %81 : vector<16x32xf32>
    %83 = arith.addf %2, %82 : vector<16x32xf32>
    %cst_39 = arith.constant dense<0.000000e+00> : vector<16xf32>
    %84 = vector.multi_reduction <add>, %83, %cst_39 [1] : vector<16x32xf32> to vector<16xf32>
    %85 = vector.shape_cast %84 : vector<16xf32> to vector<16x1xf32>
    %cst_40 = arith.constant 3.200000e+01 : f32
    %86 = vector.broadcast %cst_40 : f32 to vector<16x1xf32>
    %87 = arith.divf %85, %86 : vector<16x1xf32>
    %88 = vector.broadcast %87 : vector<16x1xf32> to vector<16x32xf32>
    %89 = arith.subf %83, %88 : vector<16x32xf32>
    %90 = arith.mulf %89, %89 : vector<16x32xf32>
    %cst_41 = arith.constant dense<0.000000e+00> : vector<16xf32>
    %91 = vector.multi_reduction <add>, %90, %cst_41 [1] : vector<16x32xf32> to vector<16xf32>
    %92 = vector.shape_cast %91 : vector<16xf32> to vector<16x1xf32>
    %cst_42 = arith.constant 3.200000e+01 : f32
    %93 = vector.broadcast %cst_42 : f32 to vector<16x1xf32>
    %94 = arith.divf %92, %93 : vector<16x1xf32>
    %95 = vector.broadcast %87 : vector<16x1xf32> to vector<16x32xf32>
    %96 = arith.subf %83, %95 : vector<16x32xf32>
    %cst_43 = arith.constant 9.99999974E-6 : f32
    %97 = vector.broadcast %cst_43 : f32 to vector<16x1xf32>
    %98 = arith.addf %94, %97 : vector<16x1xf32>
    %99 = math.rsqrt %98 : vector<16x1xf32>
    %100 = vector.broadcast %99 : vector<16x1xf32> to vector<16x32xf32>
    %101 = arith.mulf %96, %100 : vector<16x32xf32>
    %c0_44 = arith.constant 0 : index
    %c0_45 = arith.constant 0 : index
    %102 = vector.load %arg8[%c0_44, %c0_45] : memref<7x32xf32, #tpu.memory_space<vmem>>, vector<1x32xf32>
    %103 = vector.broadcast %102 : vector<1x32xf32> to vector<16x32xf32>
    %104 = arith.mulf %101, %103 : vector<16x32xf32>
    %c1 = arith.constant 1 : index
    %c0_46 = arith.constant 0 : index
    %105 = vector.load %arg8[%c1, %c0_46] : memref<7x32xf32, #tpu.memory_space<vmem>>, vector<1x32xf32>
    %106 = vector.broadcast %105 : vector<1x32xf32> to vector<16x32xf32>
    %107 = arith.addf %104, %106 : vector<16x32xf32>
    %c0_47 = arith.constant 0 : index
    %c224 = arith.constant 224 : index
    %108 = vector.load %arg5[%c0_47, %c224] : memref<32x480xf32, #tpu.memory_space<vmem>>, vector<32x32xf32>
    %cst_48 = arith.constant dense<0.000000e+00> : vector<16x32xf32>
    %109 = tpu.matmul %107, %108, %cst_48 {dimension_numbers = #tpu.dot_dimension_numbers<[1], [0], [0], [1], [0, 0, 1, 1], [], []>} : vector<16x32xf32>, vector<32x32xf32>, vector<16x32xf32> -> vector<16x32xf32>
    %c0_49 = arith.constant 0 : index
    %c224_50 = arith.constant 224 : index
    %110 = vector.load %arg6[%c0_49, %c224_50] : memref<1x480xf32, #tpu.memory_space<vmem>>, vector<1x32xf32>
    %111 = vector.broadcast %110 : vector<1x32xf32> to vector<16x32xf32>
    %112 = arith.addf %109, %111 : vector<16x32xf32>
    %c0_51 = arith.constant 0 : index
    %c256 = arith.constant 256 : index
    %113 = vector.load %arg5[%c0_51, %c256] : memref<32x480xf32, #tpu.memory_space<vmem>>, vector<32x32xf32>
    %cst_52 = arith.constant dense<0.000000e+00> : vector<16x32xf32>
    %114 = tpu.matmul %8, %113, %cst_52 {dimension_numbers = #tpu.dot_dimension_numbers<[1], [0], [0], [1], [0, 0, 1, 1], [], []>} : vector<16x32xf32>, vector<32x32xf32>, vector<16x32xf32> -> vector<16x32xf32>
    %c0_53 = arith.constant 0 : index
    %c256_54 = arith.constant 256 : index
    %115 = vector.load %arg6[%c0_53, %c256_54] : memref<1x480xf32, #tpu.memory_space<vmem>>, vector<1x32xf32>
    %116 = vector.broadcast %115 : vector<1x32xf32> to vector<16x32xf32>
    %117 = arith.addf %114, %116 : vector<16x32xf32>
    %c0_55 = arith.constant 0 : index
    %c288 = arith.constant 288 : index
    %118 = vector.load %arg5[%c0_55, %c288] : memref<32x480xf32, #tpu.memory_space<vmem>>, vector<32x64xf32>
    %cst_56 = arith.constant dense<0.000000e+00> : vector<32x64xf32>
    %119 = tpu.matmul %11, %118, %cst_56 {dimension_numbers = #tpu.dot_dimension_numbers<[1], [0], [0], [1], [0, 0, 1, 1], [], []>} : vector<32x32xf32>, vector<32x64xf32>, vector<32x64xf32> -> vector<32x64xf32>
    %c0_57 = arith.constant 0 : index
    %c288_58 = arith.constant 288 : index
    %120 = vector.load %arg6[%c0_57, %c288_58] : memref<1x480xf32, #tpu.memory_space<vmem>>, vector<1x64xf32>
    %121 = vector.broadcast %120 : vector<1x64xf32> to vector<32x64xf32>
    %122 = arith.addf %119, %121 : vector<32x64xf32>
    %123 = vector.extract_strided_slice %122 {offsets = [0, 0], sizes = [32, 32], strides = [1, 1]} : vector<32x64xf32> to vector<32x32xf32>
    %124 = vector.extract_strided_slice %122 {offsets = [0, 32], sizes = [32, 32], strides = [1, 1]} : vector<32x64xf32> to vector<32x32xf32>
    %c0_59 = arith.constant 0 : index
    %c352 = arith.constant 352 : index
    %125 = vector.load %arg5[%c0_59, %c352] : memref<32x480xf32, #tpu.memory_space<vmem>>, vector<32x32xf32>
    %cst_60 = arith.constant dense<0.000000e+00> : vector<32x32xf32>
    %126 = tpu.matmul %14, %125, %cst_60 {dimension_numbers = #tpu.dot_dimension_numbers<[1], [0], [0], [1], [0, 0, 1, 1], [], []>} : vector<32x32xf32>, vector<32x32xf32>, vector<32x32xf32> -> vector<32x32xf32>
    %c0_61 = arith.constant 0 : index
    %c352_62 = arith.constant 352 : index
    %127 = vector.load %arg6[%c0_61, %c352_62] : memref<1x480xf32, #tpu.memory_space<vmem>>, vector<1x32xf32>
    %128 = vector.broadcast %127 : vector<1x32xf32> to vector<32x32xf32>
    %129 = arith.addf %126, %128 : vector<32x32xf32>
    %130 = vector.extract_strided_slice %24 {offsets = [0, 64], sizes = [16, 32], strides = [1, 1]} : vector<16x96xf32> to vector<16x32xf32>
    %131 = arith.addf %112, %130 : vector<16x32xf32>
    %132 = arith.addf %123, %129 : vector<32x32xf32>
    %c0_63 = arith.constant 0 : index
    %c384 = arith.constant 384 : index
    %133 = vector.load %arg5[%c0_63, %c384] : memref<32x480xf32, #tpu.memory_space<vmem>>, vector<32x32xf32>
    %c0_64 = arith.constant 0 : index
    %c384_65 = arith.constant 384 : index
    %134 = vector.load %arg6[%c0_64, %c384_65] : memref<1x480xf32, #tpu.memory_space<vmem>>, vector<1x32xf32>
    %135 = vector.extract_strided_slice %131 {offsets = [0, 0], sizes = [8, 32], strides = [1, 1]} : vector<16x32xf32> to vector<8x32xf32>
    %136 = vector.shape_cast %135 : vector<8x32xf32> to vector<8x4x8xf32>
    %137 = vector.extract_strided_slice %132 {offsets = [0, 0], sizes = [16, 32], strides = [1, 1]} : vector<32x32xf32> to vector<16x32xf32>
    %138 = vector.shape_cast %137 : vector<16x32xf32> to vector<16x4x8xf32>
    "tpu.trace_start"() <{level = 10 : i32, message = "qhd,khd->hqk"}> : () -> ()
    %cst_66 = arith.constant dense<0.000000e+00> : vector<4x8x16xf32>
    %139 = tpu.matmul %136, %138, %cst_66 {dimension_numbers = #tpu.dot_dimension_numbers<[2], [2], [0], [0], [0, 1, 0, 0, 1, 0], [1], [1]>} : vector<8x4x8xf32>, vector<16x4x8xf32>, vector<4x8x16xf32> -> vector<4x8x16xf32>
    "tpu.trace_stop"() : () -> ()
    %140 = vector.extract_strided_slice %117 {offsets = [0, 0], sizes = [8, 32], strides = [1, 1]} : vector<16x32xf32> to vector<8x32xf32>
    %141 = vector.shape_cast %140 : vector<8x32xf32> to vector<8x4x8xf32>
    %142 = vector.extract_strided_slice %129 {offsets = [0, 0], sizes = [16, 32], strides = [1, 1]} : vector<32x32xf32> to vector<16x32xf32>
    %143 = vector.shape_cast %142 : vector<16x32xf32> to vector<16x4x8xf32>
    "tpu.trace_start"() <{level = 10 : i32, message = "qhd,khd->hqk"}> : () -> ()
    %cst_67 = arith.constant dense<0.000000e+00> : vector<4x8x16xf32>
    %144 = tpu.matmul %141, %143, %cst_67 {dimension_numbers = #tpu.dot_dimension_numbers<[2], [2], [0], [0], [0, 1, 0, 0, 1, 0], [1], [1]>} : vector<8x4x8xf32>, vector<16x4x8xf32>, vector<4x8x16xf32> -> vector<4x8x16xf32>
    "tpu.trace_stop"() : () -> ()
    %145 = arith.addf %139, %144 : vector<4x8x16xf32>
    %cst_68 = arith.constant dense<0xFF800000> : vector<4x8xf32>
    %146 = vector.multi_reduction <maximumf>, %145, %cst_68 [2] : vector<4x8x16xf32> to vector<4x8xf32>
    %147 = vector.shape_cast %146 : vector<4x8xf32> to vector<4x8x1xf32>
    %148 = vector.broadcast %147 : vector<4x8x1xf32> to vector<4x8x16xf32>
    %149 = arith.subf %145, %148 : vector<4x8x16xf32>
    %150 = math.exp %149 : vector<4x8x16xf32>
    %cst_69 = arith.constant dense<0.000000e+00> : vector<4x8xf32>
    %151 = vector.multi_reduction <add>, %150, %cst_69 [2] : vector<4x8x16xf32> to vector<4x8xf32>
    %152 = vector.shape_cast %151 : vector<4x8xf32> to vector<4x8x1xf32>
    %153 = vector.broadcast %152 : vector<4x8x1xf32> to vector<4x8x16xf32>
    %154 = arith.divf %150, %153 : vector<4x8x16xf32>
    %cst_70 = arith.constant dense<0.000000e+00> : vector<8x16xf32>
    %155 = vector.multi_reduction <add>, %154, %cst_70 [0] : vector<4x8x16xf32> to vector<8x16xf32>
    %cst_71 = arith.constant 4.000000e+00 : f32
    %156 = vector.broadcast %cst_71 : f32 to vector<8x16xf32>
    %157 = arith.divf %155, %156 : vector<8x16xf32>
    %158 = vector.extract_strided_slice %124 {offsets = [0, 0], sizes = [16, 32], strides = [1, 1]} : vector<32x32xf32> to vector<16x32xf32>
    %159 = vector.shape_cast %158 : vector<16x32xf32> to vector<16x4x8xf32>
    "tpu.trace_start"() <{level = 10 : i32, message = "hqk,khd->qhd"}> : () -> ()
    %cst_72 = arith.constant dense<0.000000e+00> : vector<4x8x8xf32>
    %160 = tpu.matmul %159, %154, %cst_72 {dimension_numbers = #tpu.dot_dimension_numbers<[0], [2], [2], [1], [0, 1, 0, 2, 1, 1], [1], [0]>} : vector<16x4x8xf32>, vector<4x8x16xf32>, vector<4x8x8xf32> -> vector<4x8x8xf32>
    %161 = tpu.transpose %160, [2, 0, 1] : vector<4x8x8xf32> -> vector<8x4x8xf32>
    "tpu.trace_stop"() : () -> ()
    %162 = vector.shape_cast %161 : vector<8x4x8xf32> to vector<8x32xf32>
    %cst_73 = arith.constant dense<0.000000e+00> : vector<8x32xf32>
    %163 = tpu.matmul %162, %133, %cst_73 {dimension_numbers = #tpu.dot_dimension_numbers<[1], [0], [0], [1], [0, 0, 1, 1], [], []>} : vector<8x32xf32>, vector<32x32xf32>, vector<8x32xf32> -> vector<8x32xf32>
    %164 = vector.extract_strided_slice %131 {offsets = [8, 0], sizes = [8, 32], strides = [1, 1]} : vector<16x32xf32> to vector<8x32xf32>
    %165 = vector.shape_cast %164 : vector<8x32xf32> to vector<8x4x8xf32>
    %166 = vector.extract_strided_slice %132 {offsets = [16, 0], sizes = [16, 32], strides = [1, 1]} : vector<32x32xf32> to vector<16x32xf32>
    %167 = vector.shape_cast %166 : vector<16x32xf32> to vector<16x4x8xf32>
    "tpu.trace_start"() <{level = 10 : i32, message = "qhd,khd->hqk"}> : () -> ()
    %cst_74 = arith.constant dense<0.000000e+00> : vector<4x8x16xf32>
    %168 = tpu.matmul %165, %167, %cst_74 {dimension_numbers = #tpu.dot_dimension_numbers<[2], [2], [0], [0], [0, 1, 0, 0, 1, 0], [1], [1]>} : vector<8x4x8xf32>, vector<16x4x8xf32>, vector<4x8x16xf32> -> vector<4x8x16xf32>
    "tpu.trace_stop"() : () -> ()
    %169 = vector.extract_strided_slice %117 {offsets = [8, 0], sizes = [8, 32], strides = [1, 1]} : vector<16x32xf32> to vector<8x32xf32>
    %170 = vector.shape_cast %169 : vector<8x32xf32> to vector<8x4x8xf32>
    %171 = vector.extract_strided_slice %129 {offsets = [16, 0], sizes = [16, 32], strides = [1, 1]} : vector<32x32xf32> to vector<16x32xf32>
    %172 = vector.shape_cast %171 : vector<16x32xf32> to vector<16x4x8xf32>
    "tpu.trace_start"() <{level = 10 : i32, message = "qhd,khd->hqk"}> : () -> ()
    %cst_75 = arith.constant dense<0.000000e+00> : vector<4x8x16xf32>
    %173 = tpu.matmul %170, %172, %cst_75 {dimension_numbers = #tpu.dot_dimension_numbers<[2], [2], [0], [0], [0, 1, 0, 0, 1, 0], [1], [1]>} : vector<8x4x8xf32>, vector<16x4x8xf32>, vector<4x8x16xf32> -> vector<4x8x16xf32>
    "tpu.trace_stop"() : () -> ()
    %174 = arith.addf %168, %173 : vector<4x8x16xf32>
    %cst_76 = arith.constant dense<0xFF800000> : vector<4x8xf32>
    %175 = vector.multi_reduction <maximumf>, %174, %cst_76 [2] : vector<4x8x16xf32> to vector<4x8xf32>
    %176 = vector.shape_cast %175 : vector<4x8xf32> to vector<4x8x1xf32>
    %177 = vector.broadcast %176 : vector<4x8x1xf32> to vector<4x8x16xf32>
    %178 = arith.subf %174, %177 : vector<4x8x16xf32>
    %179 = math.exp %178 : vector<4x8x16xf32>
    %cst_77 = arith.constant dense<0.000000e+00> : vector<4x8xf32>
    %180 = vector.multi_reduction <add>, %179, %cst_77 [2] : vector<4x8x16xf32> to vector<4x8xf32>
    %181 = vector.shape_cast %180 : vector<4x8xf32> to vector<4x8x1xf32>
    %182 = vector.broadcast %181 : vector<4x8x1xf32> to vector<4x8x16xf32>
    %183 = arith.divf %179, %182 : vector<4x8x16xf32>
    %cst_78 = arith.constant dense<0.000000e+00> : vector<8x16xf32>
    %184 = vector.multi_reduction <add>, %183, %cst_78 [0] : vector<4x8x16xf32> to vector<8x16xf32>
    %cst_79 = arith.constant 4.000000e+00 : f32
    %185 = vector.broadcast %cst_79 : f32 to vector<8x16xf32>
    %186 = arith.divf %184, %185 : vector<8x16xf32>
    %187 = vector.extract_strided_slice %124 {offsets = [16, 0], sizes = [16, 32], strides = [1, 1]} : vector<32x32xf32> to vector<16x32xf32>
    %188 = vector.shape_cast %187 : vector<16x32xf32> to vector<16x4x8xf32>
    "tpu.trace_start"() <{level = 10 : i32, message = "hqk,khd->qhd"}> : () -> ()
    %cst_80 = arith.constant dense<0.000000e+00> : vector<4x8x8xf32>
    %189 = tpu.matmul %188, %183, %cst_80 {dimension_numbers = #tpu.dot_dimension_numbers<[0], [2], [2], [1], [0, 1, 0, 2, 1, 1], [1], [0]>} : vector<16x4x8xf32>, vector<4x8x16xf32>, vector<4x8x8xf32> -> vector<4x8x8xf32>
    %190 = tpu.transpose %189, [2, 0, 1] : vector<4x8x8xf32> -> vector<8x4x8xf32>
    "tpu.trace_stop"() : () -> ()
    %191 = vector.shape_cast %190 : vector<8x4x8xf32> to vector<8x32xf32>
    %cst_81 = arith.constant dense<0.000000e+00> : vector<8x32xf32>
    %192 = tpu.matmul %191, %133, %cst_81 {dimension_numbers = #tpu.dot_dimension_numbers<[1], [0], [0], [1], [0, 0, 1, 1], [], []>} : vector<8x32xf32>, vector<32x32xf32>, vector<8x32xf32> -> vector<8x32xf32>
    %193 = tpu.concatenate %163, %192 in 0 : vector<8x32xf32>, vector<8x32xf32> -> vector<16x32xf32>
    %194 = vector.broadcast %134 : vector<1x32xf32> to vector<16x32xf32>
    %195 = arith.addf %193, %194 : vector<16x32xf32>
    %196 = arith.addf %107, %195 : vector<16x32xf32>
    %cst_82 = arith.constant dense<0.000000e+00> : vector<16xf32>
    %197 = vector.multi_reduction <add>, %196, %cst_82 [1] : vector<16x32xf32> to vector<16xf32>
    %198 = vector.shape_cast %197 : vector<16xf32> to vector<16x1xf32>
    %cst_83 = arith.constant 3.200000e+01 : f32
    %199 = vector.broadcast %cst_83 : f32 to vector<16x1xf32>
    %200 = arith.divf %198, %199 : vector<16x1xf32>
    %201 = vector.broadcast %200 : vector<16x1xf32> to vector<16x32xf32>
    %202 = arith.subf %196, %201 : vector<16x32xf32>
    %203 = arith.mulf %202, %202 : vector<16x32xf32>
    %cst_84 = arith.constant dense<0.000000e+00> : vector<16xf32>
    %204 = vector.multi_reduction <add>, %203, %cst_84 [1] : vector<16x32xf32> to vector<16xf32>
    %205 = vector.shape_cast %204 : vector<16xf32> to vector<16x1xf32>
    %cst_85 = arith.constant 3.200000e+01 : f32
    %206 = vector.broadcast %cst_85 : f32 to vector<16x1xf32>
    %207 = arith.divf %205, %206 : vector<16x1xf32>
    %208 = vector.broadcast %200 : vector<16x1xf32> to vector<16x32xf32>
    %209 = arith.subf %196, %208 : vector<16x32xf32>
    %cst_86 = arith.constant 9.99999974E-6 : f32
    %210 = vector.broadcast %cst_86 : f32 to vector<16x1xf32>
    %211 = arith.addf %207, %210 : vector<16x1xf32>
    %212 = math.rsqrt %211 : vector<16x1xf32>
    %213 = vector.broadcast %212 : vector<16x1xf32> to vector<16x32xf32>
    %214 = arith.mulf %209, %213 : vector<16x32xf32>
    %c2 = arith.constant 2 : index
    %c0_87 = arith.constant 0 : index
    %215 = vector.load %arg8[%c2, %c0_87] : memref<7x32xf32, #tpu.memory_space<vmem>>, vector<1x32xf32>
    %216 = vector.broadcast %215 : vector<1x32xf32> to vector<16x32xf32>
    %217 = arith.mulf %214, %216 : vector<16x32xf32>
    %c3 = arith.constant 3 : index
    %c0_88 = arith.constant 0 : index
    %218 = vector.load %arg8[%c3, %c0_88] : memref<7x32xf32, #tpu.memory_space<vmem>>, vector<1x32xf32>
    %219 = vector.broadcast %218 : vector<1x32xf32> to vector<16x32xf32>
    %220 = arith.addf %217, %219 : vector<16x32xf32>
    %c0_89 = arith.constant 0 : index
    %c416 = arith.constant 416 : index
    %221 = vector.load %arg5[%c0_89, %c416] : memref<32x480xf32, #tpu.memory_space<vmem>>, vector<32x64xf32>
    %cst_90 = arith.constant dense<0.000000e+00> : vector<16x64xf32>
    %222 = tpu.matmul %220, %221, %cst_90 {dimension_numbers = #tpu.dot_dimension_numbers<[1], [0], [0], [1], [0, 0, 1, 1], [], []>} : vector<16x32xf32>, vector<32x64xf32>, vector<16x64xf32> -> vector<16x64xf32>
    %c0_91 = arith.constant 0 : index
    %c416_92 = arith.constant 416 : index
    %223 = vector.load %arg6[%c0_91, %c416_92] : memref<1x480xf32, #tpu.memory_space<vmem>>, vector<1x64xf32>
    %224 = vector.broadcast %223 : vector<1x64xf32> to vector<16x64xf32>
    %225 = arith.addf %222, %224 : vector<16x64xf32>
    %cst_93 = arith.constant 0.000000e+00 : f32
    %226 = vector.broadcast %cst_93 : f32 to vector<16x64xf32>
    %227 = arith.maximumf %225, %226 : vector<16x64xf32>
    %c0_94 = arith.constant 0 : index
    %c0_95 = arith.constant 0 : index
    %228 = vector.load %arg7[%c0_94, %c0_95] : memref<64x32xf32, #tpu.memory_space<vmem>>, vector<64x32xf32>
    %cst_96 = arith.constant dense<0.000000e+00> : vector<16x32xf32>
    %229 = tpu.matmul %227, %228, %cst_96 {dimension_numbers = #tpu.dot_dimension_numbers<[1], [0], [0], [1], [0, 0, 1, 1], [], []>} : vector<16x64xf32>, vector<64x32xf32>, vector<16x32xf32> -> vector<16x32xf32>
    %c6 = arith.constant 6 : index
    %c0_97 = arith.constant 0 : index
    %230 = vector.load %arg8[%c6, %c0_97] : memref<7x32xf32, #tpu.memory_space<vmem>>, vector<1x32xf32>
    %231 = vector.broadcast %230 : vector<1x32xf32> to vector<16x32xf32>
    %232 = arith.addf %229, %231 : vector<16x32xf32>
    %233 = arith.addf %220, %232 : vector<16x32xf32>
    %cst_98 = arith.constant dense<0.000000e+00> : vector<16xf32>
    %234 = vector.multi_reduction <add>, %233, %cst_98 [1] : vector<16x32xf32> to vector<16xf32>
    %235 = vector.shape_cast %234 : vector<16xf32> to vector<16x1xf32>
    %cst_99 = arith.constant 3.200000e+01 : f32
    %236 = vector.broadcast %cst_99 : f32 to vector<16x1xf32>
    %237 = arith.divf %235, %236 : vector<16x1xf32>
    %238 = vector.broadcast %237 : vector<16x1xf32> to vector<16x32xf32>
    %239 = arith.subf %233, %238 : vector<16x32xf32>
    %240 = arith.mulf %239, %239 : vector<16x32xf32>
    %cst_100 = arith.constant dense<0.000000e+00> : vector<16xf32>
    %241 = vector.multi_reduction <add>, %240, %cst_100 [1] : vector<16x32xf32> to vector<16xf32>
    %242 = vector.shape_cast %241 : vector<16xf32> to vector<16x1xf32>
    %cst_101 = arith.constant 3.200000e+01 : f32
    %243 = vector.broadcast %cst_101 : f32 to vector<16x1xf32>
    %244 = arith.divf %242, %243 : vector<16x1xf32>
    %245 = vector.broadcast %237 : vector<16x1xf32> to vector<16x32xf32>
    %246 = arith.subf %233, %245 : vector<16x32xf32>
    %cst_102 = arith.constant 9.99999974E-6 : f32
    %247 = vector.broadcast %cst_102 : f32 to vector<16x1xf32>
    %248 = arith.addf %244, %247 : vector<16x1xf32>
    %249 = math.rsqrt %248 : vector<16x1xf32>
    %250 = vector.broadcast %249 : vector<16x1xf32> to vector<16x32xf32>
    %251 = arith.mulf %246, %250 : vector<16x32xf32>
    %c4 = arith.constant 4 : index
    %c0_103 = arith.constant 0 : index
    %252 = vector.load %arg8[%c4, %c0_103] : memref<7x32xf32, #tpu.memory_space<vmem>>, vector<1x32xf32>
    %253 = vector.broadcast %252 : vector<1x32xf32> to vector<16x32xf32>
    %254 = arith.mulf %251, %253 : vector<16x32xf32>
    %c5 = arith.constant 5 : index
    %c0_104 = arith.constant 0 : index
    %255 = vector.load %arg8[%c5, %c0_104] : memref<7x32xf32, #tpu.memory_space<vmem>>, vector<1x32xf32>
    %256 = vector.broadcast %255 : vector<1x32xf32> to vector<16x32xf32>
    %257 = arith.addf %254, %256 : vector<16x32xf32>
    %258 = vector.shape_cast %257 : vector<16x32xf32> to vector<2x8x32xf32>
    %259 = tpu.transpose %258, [1, 0, 2] : vector<2x8x32xf32> -> vector<8x2x32xf32>
    %c0_105 = arith.constant 0 : index
    %c0_106 = arith.constant 0 : index
    %c0_107 = arith.constant 0 : index
    %260 = vector.load %arg9[%c0_105, %c0_106, %c0_107] : memref<8x2x32xf32, #tpu.memory_space<vmem>>, vector<8x2x32xf32>
    tpu.vector_store %arg9[%c0_105, %c0_106, %c0_107], %259 {strides = array<i32>} : memref<8x2x32xf32, #tpu.memory_space<vmem>>, vector<8x2x32xf32>,
    %261 = vector.shape_cast %50 : vector<8x8xf32> to vector<1x8x8xf32>
    %262 = vector.shape_cast %73 : vector<8x8xf32> to vector<1x8x8xf32>
    %263 = tpu.concatenate %261, %262 in 0 : vector<1x8x8xf32>, vector<1x8x8xf32> -> vector<2x8x8xf32>
    %264 = vector.shape_cast %157 : vector<8x16xf32> to vector<1x8x16xf32>
    %265 = vector.shape_cast %186 : vector<8x16xf32> to vector<1x8x16xf32>
    %266 = tpu.concatenate %264, %265 in 0 : vector<1x8x16xf32>, vector<1x8x16xf32> -> vector<2x8x16xf32>
    %267 = tpu.concatenate %263, %266 in 2 : vector<2x8x8xf32>, vector<2x8x16xf32> -> vector<2x8x24xf32>
    %c0_108 = arith.constant 0 : index
    %c0_109 = arith.constant 0 : index
    %c0_110 = arith.constant 0 : index
    %268 = vector.load %arg10[%c0_108, %c0_109, %c0_110] : memref<2x8x24xf32, #tpu.memory_space<vmem>>, vector<2x8x24xf32>
    tpu.vector_store %arg10[%c0_108, %c0_109, %c0_110], %267 {strides = array<i32>} : memref<2x8x24xf32, #tpu.memory_space<vmem>>, vector<2x8x24xf32>,
    return
  }
}

</mosaic_0001>

<bundles_post_ra>
// kernel: decoder_layer_forward.1
= control target key start
LH: loop header
LB: loop body
LE: loop exit
PB: predicated region body
PF: predicated region fallthrough
CT: control target
= control target key end

     0   :  { %16 = vsyncpa [#allocation3], 0  ;;  %s9825_s0 = inlined_call_operand.vmem [shape: f32[8,2,32], index: 0, kind: input, shape index: {}]   ;;  %s9826_s1 = inlined_call_operand.vmem [shape: f32[16,2,32], index: 1, kind: input, shape index: {}]   ;;  %s9827_s2 = inlined_call_operand.vmem [shape: f32[16,2,32], index: 2, kind: input, shape index: {}]   ;;  %s9828_s3 = inlined_call_operand.vmem [shape: f32[8,2,32], index: 3, kind: input, shape index: {}]   ;;  %s9829_s4 = inlined_call_operand.vmem [shape: f32[8,2,32], index: 4, kind: input, shape index: {}]   ;;  %s9830_s5 = inlined_call_operand.hbm [shape: f32[32,480], index: 5, kind: input, shape index: {}]   ;;  %s9831_s6 = inlined_call_operand.hbm [shape: f32[1,480], index: 6, kind: input, shape index: {}]   ;;  %s9832_s7 = inlined_call_operand.vmem [shape: f32[64,32], index: 7, kind: input, shape index: {}]   ;;  %s9833_s8 = inlined_call_operand.hbm [shape: f32[7,32], index: 8, kind: input, shape index: {}]   ;;  %s9834_s9 = inlined_call_operand.hbm [shape: f32[8,2,32], index: 9, kind: output, shape index: {0}]   ;;  %s9835_s10 = inlined_call_operand.vmem [shape: f32[2,8,24], index: 10, kind: output, shape index: {1}]  }
   0x1   :  { %17 = vsyncpa [#allocation6], 0 }
   0x2   :  { %18 = vsyncpa [#allocation4], 0  ;;  %s8768_s13 = smov [#allocation5]   ;;  %s8769_s15 = smov [#allocation2]  }
   0x3   :  { %s47_s14 = sshll.u32 %s8768_s13, 4  ;;  %s34_s16 = sshll.u32 %s8769_s15, 4  ;;  %s48_s14 = int_to_ptr.vmem [resolvable:$true] %s47_s14  ;;  %s8843_s16 = int_to_ptr.vmem [resolvable:$true] %s34_s16 }
   0x4   :  { %s8674_s19 = scalar_lea.hbm %s9831_s6, 64 }
   0x5   :  { %p8675_p0 = scmp.ne.s32.totalorder %s9831_s6, %s8674_s19  ;;  %p8678_p1 = scmp.lt.u32.totalorder %s8674_s19, %s9831_s6 }
   0x7   :  { %p8680_p2 = pnand %p8678_p1, %p8675_p0 }
   0x9   :  { %8683 = shalt.err (!%p8680_p2)
}
   0xa   :  { %s8684_s24 = scalar_lea.vmem %s48_s14, 64  ;;  %p8689_p4 = scmp.lt.s32.totalorder %s48_s14, %s48_s14 }
   0xb   :  { %p8685_p3 = scmp.ne.s32.totalorder %s48_s14, %s8684_s24  ;;  %p8690_p5 = scmp.lt.s32.totalorder %s8684_s24, %s8684_s24 }
   0xd   :  { %p8691_p6 = por %p8690_p5, %p8689_p4 }
   0xf   :  { %p8692_p7 = pnand %p8691_p6, %p8685_p3 }
  0x11   :  { %8695 = shalt.err (!%p8692_p7)
}
  0x12   :  { %50 = dma.hbm_to_vmem [thread:$0]  %s9831_s6, 64, %s48_s14, [#allocation6]  }
  0x13   :  { %s8696_s29 = scalar_lea.hbm %s9830_s5, 2048 }
  0x14   :  { %p8697_p8 = scmp.ne.s32.totalorder %s9830_s5, %s8696_s29  ;;  %p8700_p9 = scmp.lt.u32.totalorder %s8696_s29, %s9830_s5 }
  0x16   :  { %p8702_p10 = pnand %p8700_p9, %p8697_p8 }
  0x18   :  { %8705 = shalt.err (!%p8702_p10)
}
  0x19   :  { %s8706_s15 = scalar_lea.vmem %s8843_s16, 2048  ;;  %p8711_p12 = scmp.lt.s32.totalorder %s8843_s16, %s8843_s16 }
  0x1a   :  { %p8707_p11 = scmp.ne.s32.totalorder %s8843_s16, %s8706_s15  ;;  %p8712_p13 = scmp.lt.s32.totalorder %s8706_s15, %s8706_s15 }
  0x1c   :  { %p8713_p0 = por %p8712_p13, %p8711_p12 }
  0x1e   :  { %p8714_p1 = pnand %p8713_p0, %p8707_p11 }
  0x20   :  { %8717 = shalt.err (!%p8714_p1)
}
  0x21   :  { %s8770_s6 = smov 512   ;;  %s8771_s14 = smov 32  }
  0x22   :  { %40 = dma.hbm_to_vmem [thread:$0]  %s9830_s5, 2048, %s8843_s16, [#allocation3], %s8770_s6, %s8770_s6, %s8771_s14  }
  0x23   :  { %s8772_s19 = smov [#allocation7]   ;;  %s8718_s23 = scalar_lea.hbm %s9833_s8, 128 }
  0x24   :  { %s59_s20 = sshll.u32 %s8772_s19, 4  ;;  %p8719_p2 = scmp.ne.s32.totalorder %s9833_s8, %s8718_s23  ;;  %s60_s20 = int_to_ptr.vmem [resolvable:$true] %s59_s20 }
  0x25   :  { %p8722_p3 = scmp.lt.u32.totalorder %s8718_s23, %s9833_s8 }
  0x27   :  { %p8724_p4 = pnand %p8722_p3, %p8719_p2 }
  0x29   :  { %8727 = shalt.err (!%p8724_p4)
}
  0x2a   :  { %s8728_s28 = scalar_lea.vmem %s60_s20, 128  ;;  %p8733_p6 = scmp.lt.s32.totalorder %s60_s20, %s60_s20 }
  0x2b   :  { %p8729_p5 = scmp.ne.s32.totalorder %s60_s20, %s8728_s28  ;;  %p8734_p7 = scmp.lt.s32.totalorder %s8728_s28, %s8728_s28 }
  0x2d   :  { %p8735_p8 = por %p8734_p7, %p8733_p6 }
  0x2f   :  { %p8736_p9 = pnand %p8735_p8, %p8729_p5 }
  0x31   :  { %8739 = shalt.err (!%p8736_p9)
}
  0x32   :  { %62 = dma.hbm_to_vmem [thread:$0]  %s9833_s8, 128, %s60_s20, [#allocation6]  }
  0x33   :  { %8762 = dma.done.wait [#allocation3], 2048  }
  0x34   :  { %8763 = vsyncadd [#allocation3], 4294965248 }
  0x35   :  { %8764 = dma.done.wait [#allocation6], 192  }
  0x36   :  { %8765 = vsyncadd [#allocation6], 4294967104  ;;  %v8773_v0 = vmov 1983009808   ;;  %v84_v2 = vlaneseq  ;;  %v8774_v3 = vmov 1934713408  }
  0x37   :  { %v82_v1 = vunpack.c.l.s4 %v8773_v0  ;;  %v114_v4 = vunpack.c.l.s4 %v8774_v3  ;;  %v8887_v7 = vld [vmem:[#allocation2 + $0x48] sm:$0xff]  ;;  %v575_v9 = vld [vmem:[#allocation2 + $0x40] sm:$0xff]  ;;  %vm489_vm0 = vcmask 261120   ;;  %s8776_s24 = smov 120   ;;  %s8777_s25 = smov 96   ;;  %vm8780_vm1 = vmmov 0  }
  0x38   :  { %v85_v6 = vshrl.u32 %v84_v2, 7  ;;  %v8889_v8 = vld [vmem:[#allocation2 + $0x68] sm:$0xff]  ;;  %v8482_v11 = vpack.i.bf16 %v8887_v7, %v575_v9  ;;  %v571_v14 = vld [vmem:[#allocation2] sm:$0xff]  ;;  %s8778_s26 = smov 104   ;;  %vm858_vm2 = vcmask 64512   ;;  %s8781_s27 = smov 64  }
  0x39   :  { %v83_v5 = vunpack.c.0.s8 %v82_v1  ;;  %v8497_v10 = vpack.i.bf16 %v8889_v8, %v8887_v7  ;;  %v8894_v12 = vld [vmem:[#allocation2 + $0x8] sm:$0xff]  ;;  %v577_v17 = vld [vmem:[#allocation2 + $0x60] sm:$0xff]  ;;  %v115_v19 = vunpack.c.0.s8 %v114_v4  ;;  %s8783_s28 = smov 16   ;;  %s8784_s5 = smov 8   ;;  %vm1928_vm3 = vcmask 130048  }
  0x3a   :  { %v8896_v13 = vld [vmem:[#allocation2 + $0x28] sm:$0xff]  ;;  %v8472_v16 = vpack.i.bf16 %v8894_v12, %v571_v14  ;;  %v573_v18 = vld [vmem:[#allocation2 + $0x20] sm:$0xff]  ;;  %8483 = vrot.lane.b32.xlu1 %v8482_v11, %s8771_s14  ;;  %v8487_v20 = vpack.i.bf16 %v8889_v8, %v577_v17  ;;  %v8344_v22 = vpack.c.bf16 %v577_v17, %v575_v9  ;;  %v587_v38 = vsub.s32 1, %v85_v6  ;;  %s8785_s16 = smov 24  }
  0x3b   :  { %v8492_v15 = vpack.i.bf16 %v8896_v13, %v8894_v12  ;;  %v8340_v21 = vpack.c.bf16 %v573_v18, %v571_v14  ;;  %v8903_v23 = vsub.s32 %v83_v5, %v85_v6  ;;  %v8477_v24 = vpack.i.bf16 %v8896_v13, %v573_v18  ;;  %v8646_v25 = vld.sshfl [vmem:[%s9825_s0] sm:$0xf pattern:$0x76325410] }
  0x3c   :  { %8473 = vrot.lane.b32.xlu0 %v8472_v16, %s8771_s14  ;;  %v8647_v26 = vld.sshfl [vmem:[%s9825_s0 + $0x2] sm:$0xf pattern:$0x76325410]  ;;  %v8920_v29 = vsub.s32 %v115_v19, %v85_v6  ;;  %v579_v36 = vld [vmem:[#allocation5] sm:$0x3] }
  0x3d   :  { %8341 = vmatprep.subr.bf16.mxu1 %v8340_v21  ;;  %v8648_v27 = vld.sshfl [vmem:[%s9825_s0 + $0x8] sm:$0xf pattern:$0x76325410]  ;;  %v112_v30 = vcombine.low %v8646_v25, %v8647_v26  ;;  %v583_v40 = vsub.s32 0, %v85_v6  ;;  %v588_v42 = vrot.slane %v579_v36, %v587_v38  ;;  %v8779_v25 = vmov 0.0  }
  0x3e   :  { %8343 = vmatpush3.bf16.msra.mxu1 %v8340_v21  ;;  %v8649_v28 = vld.sshfl [vmem:[%s9825_s0 + $0xa] sm:$0xf pattern:$0x76325410]  ;;  %8488 = vrot.lane.b32.xlu1 %v8487_v20, %s8771_s14  ;;  %v7737_v5 = vld [vmem:[#allocation5] ss:$0 sm:$0xff] }
  0x3f   :  { %8345 = vmatprep.subr.bf16.mxu1 %v8344_v22  ;;  %v8650_v31 = vld.sshfl [vmem:[%s9828_s3] sm:$0xf pattern:$0x76325410]  ;;  %v120_v33 = vcombine.low %v8648_v27, %v8649_v28  ;;  %v119_v37 = vrot.slane %v112_v30, %v8920_v29  ;;  %v584_v46 = vrot.slane %v579_v36, %v583_v40  ;;  %8016 = vmatprep.subr.mxu0 %v8779_v25  ;;  %vm1930_vm4 = vcmask 195584  }
  0x40   :  { %8478 = vrot.lane.b32.xlu0 %v8477_v24, %s8771_s14  ;;  %v8651_v32 = vld.sshfl [vmem:[%s9828_s3 + $0x2] sm:$0xf pattern:$0x76325410]  ;;  %8018 = vmatprep.mubr.msk.f32.mxu0 %vm8780_vm1, %v8779_v25  ;;  %vm7504_vm5 = vcmask 523264   ;;  %vm7694_vm6 = vcmask 254976  }
  0x41   :  { %v8652_v34 = vld.sshfl [vmem:[%s9828_s3 + $0x8] sm:$0xf pattern:$0x76325410]  ;;  %v127_v39 = vrot.slane %v120_v33, %v8920_v29  ;;  %v170_v41 = vcombine.low %v8650_v31, %v8651_v32 }
  0x42   :  { %8347 = vmatpush3.bf16.msra.mxu1 %v8344_v22  ;;  %v8653_v35 = vld.sshfl [vmem:[%s9828_s3 + $0xa] sm:$0xf pattern:$0x76325410]  ;;  %623 = vrot.lane.b32.xlu1 %v588_v42, %s8771_s14  ;;  %s8775_s3 = smov 112  }
  0x43   :  { %v8937_v43 = vcombine.low %v119_v37, %v127_v39  ;;  %v8939_v44 = vcombine.high %v119_v37, %v127_v39  ;;  %v178_v45 = vcombine.low %v8652_v34, %v8653_v35  ;;  %v177_v47 = vrot.slane %v170_v41, %v8920_v29 }
  0x44   :  { %621 = vrot.lane.b32.xlu0 %v584_v46, %s8771_s14 }
  0x45   :  { %8002 = vmatprep.mubr.msk.f32.mxu1 %vm489_vm0, %v8937_v43  ;;  %v185_v48 = vrot.slane %v178_v45, %v8920_v29 }
  0x46   :  { %8003 = vmatmul.mubr.msk.f32.vlgmr.msra.gmra.mrb[0].mxu1 %vm489_vm0, %v8939_v44 }
  0x47   :  { %v186_v49 = vcombine.low %v177_v47, %v185_v48  ;;  %v187_v50 = vcombine.high %v177_v47, %v185_v48 }
  0x49   :  { %8013 = vmatprep.mubr.msk.f32.mxu1 %vm489_vm0, %v186_v49 }
  0xac   :  { %v8484_v51 = vpop.permute.xlu1 %8483 }
  0xad   :  { %v8486_v53 = vunpack.i.h.bf16 %v8484_v51  ;;  %v8485_v54 = vunpack.i.l.bf16 %v8484_v51 }
  0xae   :  { %v8474_v52 = vpop.permute.xlu0 %8473 }
  0xaf   :  { %v8476_v55 = vunpack.i.h.bf16 %v8474_v52  ;;  %v8475_v56 = vunpack.i.l.bf16 %v8474_v52  ;;  %v615_v1 = vsel %vm489_vm0, %v8485_v54, %v8486_v53 }
  0xb0   :  { %v8489_v57 = vpop.permute.xlu1 %8488 }
  0xb1   :  { %v8491_v58 = vunpack.i.h.bf16 %v8489_v57  ;;  %v8490_v59 = vunpack.i.l.bf16 %v8489_v57  ;;  %v613_v63 = vsel %vm489_vm0, %v8475_v56, %v8476_v55 }
  0xb2   :  { %v8479_v60 = vpop.permute.xlu0 %8478 }
  0xb3   :  { %v8481_v61 = vunpack.i.h.bf16 %v8479_v60  ;;  %v8480_v62 = vunpack.i.l.bf16 %v8479_v60  ;;  %v616_v2 = vsel %vm489_vm0, %v8490_v59, %v8491_v58 }
  0xb4   :  { %v8352_v4 = vpack.c.bf16 %v616_v2, %v615_v1  ;;  %v624_v14 = vpop.permute.xlu1 %623 }
  0xb5   :  { %v614_v0 = vsel %vm489_vm0, %v8480_v62, %v8481_v61 }
  0xb6   :  { %v8348_v3 = vpack.c.bf16 %v614_v0, %v613_v63  ;;  %v622_v16 = vpop.permute.xlu0 %621 }
  0xb7   :  { %v625_v17 = vsel %vm489_vm0, %v622_v16, %v624_v14 }
  0xb8   :  { %8349 = vmatprep.subr.bf16.mxu1 %v8348_v3 }
  0xb9   :  { %8351 = vmatpush3.bf16.msra.mxu1 %v8348_v3 }
  0xba   :  { %8353 = vmatprep.subr.bf16.mxu1 %v8352_v4 }
  0xbd   :  { %8355 = vmatpush3.bf16.msra.mxu1 %v8352_v4 }
  0xbe   :  { %8021 = vmatprep.subr.mxu1 %v8779_v25 }
  0xc0   :  { %8014 = vmatmul.mubr.msk.f32.vlgmr.msra.gmra.mrb[2].mxu1 %vm489_vm0, %v187_v50 }
  0xc1   :  { %8023 = vmatprep.mubr.msk.f32.mxu1 %vm8780_vm1, %v8779_v25 }
 0x119   :  { %v8004_v6 = vpop.f32.mrb[0].mxu1 }
 0x11a   :  { %v8955_v9 = vadd.f32 %v8004_v6, %v7737_v5  ;;  %v562_v11 = vpop.f32.mrb[1].mxu1 }
 0x11b   :  { %v8960_v21 = vadd.f32 %v7737_v5, %v562_v11 }
 0x193   :  { %v8015_v18 = vpop.f32.mrb[2].mxu1 }
 0x194   :  { %v8958_v19 = vadd.f32 %v8015_v18, %v625_v17  ;;  %v699_v20 = vpop.f32.mrb[3].mxu1 }
 0x195   :  { %v8962_v22 = vadd.f32 %v699_v20, %v625_v17 }
 0x197   :  { %v708_v24 = vadd.f32 %v8962_v22, %v8960_v21 }
 0x199   :  { %714 = vrot.lane.b32.xlu1 %v708_v24, %s8775_s3  ;;  %712 = vrot.lane.b32.xlu0 %v708_v24, %s8776_s24 }
 0x19d   :  { %718 = vrot.lane.b32.xlu1 %v708_v24, %s8777_s25  ;;  %716 = vrot.lane.b32.xlu0 %v708_v24, %s8778_s26 }
 0x20b   :  { %v715_v26 = vpop.permute.xlu1 %714  ;;  %v713_v27 = vpop.permute.xlu0 %712 }
 0x20c   :  { %722 = vrot.lane.b32.xlu1 %v715_v26, %s8777_s25  ;;  %720 = vrot.lane.b32.xlu0 %v713_v27, %s8777_s25 }
 0x20f   :  { %v717_v28 = vpop.permute.xlu0 %716  ;;  %v719_v30 = vpop.permute.xlu1 %718 }
 0x210   :  { %724 = vrot.lane.b32.xlu0 %v717_v28, %s8777_s25 }
 0x235   :  { %730 = vxpose.xlu1.b32.start.end [1/1] (short) (narrow) %v719_v30, 8  ;;  %v9018_v30 = vadd.f32 %v8958_v19, %v8955_v9 }
 0x27e   :  { %v721_v31 = vpop.permute.xlu0 %720  ;;  %v723_v32 = vpop.permute.xlu1 %722 }
 0x27f   :  { %762 = vxpose.xlu0.b32.start.end [1/1] (short) (narrow) %v721_v31, 8 }
 0x282   :  { %v725_v33 = vpop.permute.xlu0 %724 }
 0x283   :  { %794 = vxpose.xlu0.b32.start.end [1/1] (short) (narrow) %v723_v32, 8 }
 0x287   :  { %826 = vxpose.xlu0.b32.start.end [1/1] (short) (narrow) %v725_v33, 8 }
 0x2b5   :  { %v746_v34 = vpop.trf.xlu1 }
 0x2b6   :  { %8017 = vmatpush3.msra.mxu0 %v746_v34 }
 0x2b7   :  { %8019 = vmatmul.mubr.msk.f32.vlgmr.msra.gmra.mrb[0].mxu0 %vm858_vm2, %v708_v24  ;;  %8026 = vmatprep.subr.mxu0 %v8779_v25 }
 0x2b8   :  { %8028 = vmatprep.mubr.msk.f32.mxu0 %vm8780_vm1, %v8779_v25 }
 0x2ff   :  { %v778_v35 = vpop.trf.xlu0 }
 0x300   :  { %8022 = vmatpush3.msra.mxu1 %v778_v35 }
 0x301   :  { %8024 = vmatmul.mubr.msk.f32.vlgmr.msra.gmra.mrb[4].mxu1 %vm858_vm2, %v713_v27  ;;  %8031 = vmatprep.subr.mxu1 %v8779_v25 }
 0x302   :  { %8033 = vmatprep.mubr.msk.f32.mxu1 %vm8780_vm1, %v8779_v25 }
 0x303   :  { %v810_v36 = vpop.trf.xlu0 }
 0x304   :  { %8027 = vmatpush3.msra.mxu0 %v810_v36 }
 0x305   :  { %8029 = vmatmul.mubr.msk.f32.vlgmr.msra.gmra.mrb[2].mxu0 %vm858_vm2, %v715_v26  ;;  %8036 = vmatprep.subr.mxu0 %v8779_v25 }
 0x306   :  { %8038 = vmatprep.mubr.msk.f32.mxu0 %vm8780_vm1, %v8779_v25 }
 0x307   :  { %v842_v37 = vpop.trf.xlu0 }
 0x308   :  { %8032 = vmatpush3.msra.mxu1 %v842_v37 }
 0x309   :  { %8034 = vmatmul.mubr.msk.f32.vlgmr.msra.gmra.mrb[6].mxu1 %vm858_vm2, %v717_v28  ;;  %8041 = vmatprep.subr.mxu1 %v8779_v25 }
 0x30a   :  { %8043 = vmatprep.mubr.msk.f32.mxu1 %vm8780_vm1, %v8779_v25 }
 0x38a   :  { %v927_v38 = vpop.f32.mrb[0].mxu0 }
 0x38b   :  { %v8020_v39 = vpop.f32.mrb[1].mxu0  ;;  %v1147_v40 = vsel %vm858_vm2, %v927_v38, -inf }
 0x38c   :  { %1148 = vmax.xlane.f32.xlu1 %v1147_v40 }
 0x39d   :  { %1203 = vrot.lane.b32.xlu1 %v8960_v21, %s8775_s3 }
 0x3d4   :  { %v999_v41 = vpop.f32.mrb[4].mxu1 }
 0x3d5   :  { %v8025_v42 = vpop.f32.mrb[5].mxu1  ;;  %v1150_v45 = vsel %vm858_vm2, %v999_v41, -inf }
 0x3d6   :  { %1151 = vmax.xlane.f32.xlu0 %v1150_v45 }
 0x3d8   :  { %v1071_v46 = vpop.f32.mrb[2].mxu0 }
 0x3d9   :  { %v8030_v47 = vpop.f32.mrb[3].mxu0  ;;  %v1153_v48 = vsel %vm858_vm2, %v1071_v46, -inf }
 0x3da   :  { %1154 = vmax.xlane.f32.xlu1 %v1153_v48 }
 0x3dc   :  { %v1143_v49 = vpop.f32.mrb[6].mxu1 }
 0x3dd   :  { %v8035_v50 = vpop.f32.mrb[7].mxu1  ;;  %v1156_v51 = vsel %vm858_vm2, %v1143_v49, -inf }
 0x3de   :  { %1157 = vmax.xlane.f32.xlu1 %v1156_v51 }
 0x3ec   :  { %1201 = vrot.lane.b32.xlu0 %v8960_v21, %s8776_s24 }
 0x3ef   :  { %1205 = vrot.lane.b32.xlu1 %v8960_v21, %s8778_s26 }
 0x3f0   :  { %1207 = vrot.lane.b32.xlu0 %v8960_v21, %s8781_s27 }
 0x419   :  { %v1149_v52 = vpop.xlane.xlu1 %1148 }
 0x41a   :  { %v1159_v54 = vsub.f32 %v927_v38, %v1149_v52 }
 0x41c   :  { %v1163_v55 = vmul.f32 1.442695, %v1159_v54 }
 0x41d   :  { %v1204_v53 = vpop.permute.xlu1 %1203 }
 0x41e   :  { %1211 = vrot.lane.b32.xlu0 %v1204_v53, %s8781_s27  ;;  %8570 = vpow2.f32 %v1163_v55 }
 0x428   :  { %v8571_v56 = vpop.eup %8570 }
 0x429   :  { %v1171_v57 = vsel %vm858_vm2, %v8571_v56, 0.0 }
 0x43d   :  { %1172 = vadd.xlane.f32.xlu0 %v1171_v57 }
 0x463   :  { %v1152_v58 = vpop.xlane.xlu0 %1151 }
 0x464   :  { %v1160_v11 = vsub.f32 %v999_v41, %v1152_v58 }
 0x466   :  { %v1165_v14 = vmul.f32 1.442695, %v1160_v11 }
 0x467   :  { %v1155_v59 = vpop.xlane.xlu1 %1154  ;;  %v1202_v60 = vpop.permute.xlu0 %1201 }
 0x468   :  { %v1161_v61 = vsub.f32 %v1071_v46, %v1155_v59  ;;  %1209 = vrot.lane.b32.xlu1 %v1202_v60, %s8781_s27 }
 0x46a   :  { %v1167_v62 = vmul.f32 1.442695, %v1161_v61 }
 0x46b   :  { %v1158_v63 = vpop.xlane.xlu1 %1157  ;;  %v1208_v18 = vpop.permute.xlu0 %1207 }
 0x46c   :  { %8572 = vpow2.f32 %v1167_v62  ;;  %v1162_v0 = vsub.f32 %v1143_v49, %v1158_v63  ;;  %v8782_v63 = vmov 0.0|0.0  }
 0x46e   :  { %v1169_v1 = vmul.f32 1.442695, %v1162_v0 }
 0x46f   :  { %v1206_v2 = vpop.permute.xlu1 %1205 }
 0x470   :  { %8574 = vpow2.f32 %v1169_v1  ;;  %1213 = vrot.lane.b32.xlu1 %v1206_v2, %s8781_s27 }
 0x471   :  { %8576 = vpow2.f32 %v1165_v14 }
 0x476   :  { %v8573_v3 = vpop.eup %8572 }
 0x477   :  { %v1177_v4 = vsel %vm858_vm2, %v8573_v3, 0.0 }
 0x478   :  { %1178 = vadd.xlane.f32.xlu0 %v1177_v4 }
 0x47a   :  { %v8575_v5 = vpop.eup %8574 }
 0x47b   :  { %v1180_v6 = vsel %vm858_vm2, %v8575_v5, 0.0  ;;  %v8577_v16 = vpop.eup %8576 }
 0x47c   :  { %1181 = vadd.xlane.f32.xlu0 %v1180_v6  ;;  %v1174_v17 = vsel %vm858_vm2, %v8577_v16, 0.0 }
 0x490   :  { %v1212_v20 = vpop.permute.xlu0 %1211 }
 0x494   :  { %1175 = vadd.xlane.f32.xlu1 %v1174_v17 }
 0x4c7   :  { %1219 = vxpose.xlu1.b32.start.end [1/1] (short) (narrow) %v1208_v18, 8 }
 0x4ca   :  { %v1173_v21 = vpop.xlane.xlu0 %1172 }
 0x4cb   :  { %8578 = vrcp.f32 %v1173_v21 }
 0x4d5   :  { %v8579_v24 = vpop.eup %8578 }
 0x4d6   :  { %v1184_v26 = vmul.f32 %v8579_v24, %v8571_v56 }
 0x4d8   :  { %8037 = vmatpush3.xpose.msk.msra.mxu0 %vm858_vm2, %v1184_v26  ;;  %v1191_v37 = vsel %vm858_vm2, %v1184_v26, 0.0 }
 0x4d9   :  { %8046 = vmatprep.subr.mxu0 %v8779_v25 }
 0x4da   :  { %v1210_v27 = vpop.permute.xlu1 %1209 }
 0x4db   :  { %1251 = vxpose.xlu0.b32.start.end [1/1] (short) (narrow) %v1210_v27, 8 }
 0x4df   :  { %1283 = vxpose.xlu0.b32.start.end [1/1] (short) (narrow) %v1212_v20, 8 }
 0x4e2   :  { %v1214_v28 = vpop.permute.xlu1 %1213 }
 0x4e3   :  { %1315 = vxpose.xlu1.b32.start.end [1/1] (short) (narrow) %v1214_v28, 8 }
 0x501   :  { %2020 = vrot.lane.b32.xlu1 %v9018_v30, %s8775_s3 }
 0x505   :  { %2022 = vrot.lane.b32.xlu1 %v9018_v30, %s8778_s26  ;;  %v1179_v31 = vpop.xlane.xlu0 %1178 }
 0x506   :  { %8580 = vrcp.f32 %v1179_v31 }
 0x508   :  { %2018 = vrot.lane.b32.xlu0 %v9018_v30, %s8776_s24 }
 0x509   :  { %2024 = vrot.lane.b32.xlu1 %v9018_v30, %s8777_s25  ;;  %v1182_v45 = vpop.xlane.xlu0 %1181 }
 0x510   :  { %v8581_v33 = vpop.eup %8580 }
 0x511   :  { %v1188_v36 = vmul.f32 %v8581_v33, %v8573_v3 }
 0x513   :  { %v1194_v40 = vsel %vm858_vm2, %v1188_v36, 0.0 }
 0x521   :  { %v1176_v32 = vpop.xlane.xlu1 %1175 }
 0x522   :  { %8582 = vrcp.f32 %v1176_v32 }
 0x523   :  { %8584 = vrcp.f32 %v1182_v45 }
 0x52c   :  { %v8583_v34 = vpop.eup %8582 }
 0x52d   :  { %v1186_v35 = vmul.f32 %v8583_v34, %v8577_v16  ;;  %v8585_v46 = vpop.eup %8584 }
 0x52e   :  { %v9039_v48 = vmul.f32 %v8585_v46, %v8575_v5 }
 0x52f   :  { %8042 = vmatpush3.xpose.msk.msra.mxu1 %vm858_vm2, %v1186_v35  ;;  %v1192_v38 = vsel %vm858_vm2, %v1186_v35, 0.0 }
 0x530   :  { %8051 = vmatprep.subr.mxu1 %v8779_v25  ;;  %v1193_v39 = vadd.f32 %v1192_v38, %v1191_v37 }
 0x532   :  { %v9033_v41 = vadd.f32 %v1194_v40, %v1193_v39 }
 0x547   :  { %v1235_v42 = vpop.trf.xlu1 }
 0x548   :  { %8039 = vmatmul.mubr.msk.f32.vlgmr.msra.gmra.mrb[4].mxu0 %vm858_vm2, %v1235_v42 }
 0x549   :  { %8047 = vmatpush3.xpose.msk.msra.mxu0 %vm858_vm2, %v1188_v36  ;;  %8048 = vmatprep.mubr.msk.f32.mxu0 %vm8780_vm1, %v8779_v25 }
 0x54a   :  { %8356 = vmatprep.subr.bf16.mxu0 %v8782_v63 }
 0x55b   :  { %v1267_v47 = vpop.trf.xlu0 }
 0x55c   :  { %8044 = vmatmul.mubr.msk.f32.vlgmr.msra.gmra.mrb[8].mxu1 %vm858_vm2, %v1267_v47 }
 0x55d   :  { %8052 = vmatpush3.xpose.msk.msra.mxu1 %vm858_vm2, %v9039_v48  ;;  %8053 = vmatprep.mubr.msk.f32.mxu1 %vm8780_vm1, %v8779_v25 }
 0x55e   :  { %8067 = vmatprep.subr.mxu1 %v8779_v25 }
 0x55f   :  { %v1299_v49 = vpop.trf.xlu0 }
 0x560   :  { %8049 = vmatmul.mubr.msk.f32.vlgmr.msra.gmra.mrb[6].mxu0 %vm858_vm2, %v1299_v49 }
 0x561   :  { %8064 = vmatprep.mubr.msk.f32.mxu0 %vm8780_vm1, %v8779_v25 }
 0x563   :  { %v1331_v50 = vpop.trf.xlu1 }
 0x564   :  { %8054 = vmatmul.mubr.msk.f32.vlgmr.msra.gmra.mrb[10].mxu1 %vm858_vm2, %v1331_v50 }
 0x565   :  { %8069 = vmatprep.mubr.msk.f32.mxu1 %vm8780_vm1, %v8779_v25 }
 0x573   :  { %v9053_v51 = vpop.permute.xlu1 %2020 }
 0x574   :  { %2028 = vrot.lane.b32.xlu1 %v9053_v51, %s8777_s25 }
 0x577   :  { %v9057_v52 = vpop.permute.xlu1 %2022 }
 0x578   :  { %2030 = vrot.lane.b32.xlu1 %v9057_v52, %s8777_s25 }
 0x57a   :  { %v9061_v53 = vpop.permute.xlu0 %2018 }
 0x57b   :  { %2026 = vrot.lane.b32.xlu0 %v9061_v53, %s8777_s25  ;;  %v2025_v62 = vpop.permute.xlu1 %2024 }
 0x5e6   :  { %v9074_v0 = vpop.permute.xlu1 %2028 }
 0x5ea   :  { %v9076_v1 = vpop.permute.xlu1 %2030 }
 0x5ed   :  { %v9078_v3 = vpop.permute.xlu0 %2026 }
 0x61b   :  { %v1419_v54 = vpop.f32.mrb[4].mxu0 }
 0x61c   :  { %v8040_v55 = vpop.f32.mrb[5].mxu0  ;;  %1651 = vxpose.xlu1.b32.start.end [1/1] (short) (narrow) %v1419_v54, 8 }
 0x62f   :  { %v1495_v56 = vpop.f32.mrb[8].mxu1 }
 0x630   :  { %v8045_v57 = vpop.f32.mrb[9].mxu1  ;;  %1683 = vxpose.xlu0.b32.start.end [1/1] (short) (narrow) %v1495_v56, 8 }
 0x633   :  { %v1571_v58 = vpop.f32.mrb[6].mxu0 }
 0x634   :  { %v8050_v59 = vpop.f32.mrb[7].mxu0  ;;  %1715 = vxpose.xlu0.b32.start.end [1/1] (short) (narrow) %v1571_v58, 8 }
 0x637   :  { %v1647_v60 = vpop.f32.mrb[10].mxu1 }
 0x638   :  { %v8055_v61 = vpop.f32.mrb[11].mxu1  ;;  %1747 = vxpose.xlu0.b32.start.end [1/1] (short) (narrow) %v1647_v60, 8 }
 0x63a   :  { %8493 = vrot.lane.b32.xlu1 %v8492_v15, %s8781_s27 }
 0x63c   :  { %2036 = vxpose.xlu0.b32.start.end [1/1] (short) (narrow) %v2025_v62, 8 }
 0x665   :  { %8498 = vrot.lane.b32.xlu0 %v8497_v10, %s8781_s27 }
 0x69c   :  { %v1667_v2 = vpop.trf.xlu1 }
 0x6ac   :  { %v8494_v4 = vpop.permute.xlu1 %8493 }
 0x6ad   :  { %v8496_v12 = vunpack.i.h.bf16 %v8494_v4  ;;  %v8495_v13 = vunpack.i.l.bf16 %v8494_v4 }
 0x6af   :  { %v9080_v15 = vpack.c.bf16 %v8496_v12, %v8495_v13 }
 0x6b0   :  { %v1699_v5 = vpop.trf.xlu0 }
 0x6b1   :  { %8358 = vmatpush3.bf16.msra.mxu0 %v9080_v15 }
 0x6b2   :  { %8359 = vmatprep.subr.bf16.mxu0 %v8782_v63 }
 0x6b4   :  { %v1731_v7 = vpop.trf.xlu0 }
 0x6b5   :  { %v1779_v8 = vcombine.low %v1667_v2, %v1731_v7  ;;  %v1780_v10 = vcombine.high %v1667_v2, %v1731_v7 }
 0x6b7   :  { %v1787_v16 = vrot.slane %v1779_v8, %v8903_v23  ;;  %v1794_v17 = vrot.slane %v1780_v10, %v8903_v23 }
 0x6b8   :  { %v1763_v6 = vpop.trf.xlu0 }
 0x6b9   :  { %v1795_v11 = vcombine.low %v1699_v5, %v1763_v6  ;;  %v1796_v14 = vcombine.high %v1699_v5, %v1763_v6 }
 0x6bb   :  { %v1803_v18 = vrot.slane %v1795_v11, %v8903_v23  ;;  %v1810_v20 = vrot.slane %v1796_v14, %v8903_v23 }
 0x6bc   :  { %v2052_v21 = vpop.trf.xlu0 }
 0x6bd   :  { %v1811_v24 = vcombine.low %v1787_v16, %v1803_v18  ;;  %v1812_v26 = vcombine.high %v1787_v16, %v1803_v18  ;;  %v1827_v27 = vcombine.low %v1794_v17, %v1810_v20  ;;  %v1828_v28 = vcombine.high %v1794_v17, %v1810_v20  ;;  %8068 = vmatpush3.msra.mxu1 %v2052_v21 }
 0x6be   :  { %8070 = vmatmul.mubr.msk.f32.vlgmr.msra.gmra.mrb[12].mxu1 %vm858_vm2, %v9018_v30  ;;  %8072 = vmatprep.subr.mxu1 %v8779_v25 }
 0x6bf   :  { %v1819_v31 = vrot.slane %v1811_v24, %v8920_v29  ;;  %v1826_v32 = vrot.slane %v1812_v26, %v8920_v29  ;;  %v1835_v33 = vrot.slane %v1827_v27, %v8920_v29  ;;  %v1842_v34 = vrot.slane %v1828_v28, %v8920_v29  ;;  %8074 = vmatprep.mubr.msk.f32.mxu1 %vm8780_vm1, %v8779_v25 }
 0x6c1   :  { %v1847_v35 = vcombine.low %v1819_v31, %v1826_v32  ;;  %v7754_v36 = vcombine.high %v1819_v31, %v1826_v32  ;;  %v1863_v37 = vcombine.low %v1835_v33, %v1842_v34  ;;  %v7755_v38 = vcombine.high %v1835_v33, %v1842_v34 }
 0x6c3   :  { %v1854_v39 = vrot.slane %v1847_v35, %v8903_v23  ;;  %v1862_v30 = vrot.slane %v7754_v36, %v8903_v23  ;;  %v1870_v40 = vrot.slane %v1863_v37, %v8903_v23  ;;  %v1878_v42 = vrot.slane %v7755_v38, %v8903_v23 }
 0x6c5   :  { %v1880_v45 = vcombine.high %v1854_v39, %v1862_v30  ;;  %v1896_v46 = vcombine.high %v1870_v40, %v1878_v42  ;;  %v1879_v47 = vcombine.low %v1854_v39, %v1862_v30  ;;  %v1895_v49 = vcombine.low %v1870_v40, %v1878_v42 }
 0x6c7   :  { %v1894_v50 = vrot.slane %v1880_v45, %v8920_v29  ;;  %v1910_v54 = vrot.slane %v1896_v46, %v8920_v29  ;;  %v1887_v55 = vrot.slane %v1879_v47, %v8920_v29  ;;  %v1903_v56 = vrot.slane %v1895_v49, %v8920_v29 }
 0x6c9   :  { %v1913_v57 = vcombine.low %v1894_v50, %v1910_v54  ;;  %v1912_v58 = vcombine.high %v1887_v55, %v1903_v56  ;;  %v1911_v59 = vcombine.low %v1887_v55, %v1903_v56  ;;  %v1914_v60 = vcombine.high %v1894_v50, %v1910_v54 }
 0x6cb   :  { %1920 = vrot.lane.b32.xlu0 %v1913_v57, %s8783_s28  ;;  %1916 = vrot.lane.b32.xlu1 %v1912_v58, %s8784_s5 }
 0x6cf   :  { %1924 = vrot.lane.b32.xlu1 %v1914_v60, %s8785_s16 }
 0x6d7   :  { %v8499_v61 = vpop.permute.xlu0 %8498 }
 0x6d8   :  { %v8501_v62 = vunpack.i.h.bf16 %v8499_v61  ;;  %v8500_v2 = vunpack.i.l.bf16 %v8499_v61 }
 0x6da   :  { %v9108_v4 = vpack.c.bf16 %v8501_v62, %v8500_v2 }
 0x6dc   :  { %8361 = vmatpush3.bf16.msra.mxu0 %v9108_v4 }
 0x6dd   :  { %8077 = vmatprep.subr.mxu0 %v8779_v25 }
 0x6e9   :  { %2100 = vxpose.xlu0.b32.start.end [1/1] (short) (narrow) %v9074_v0, 8 }
 0x6ed   :  { %2132 = vxpose.xlu0.b32.start.end [1/1] (short) (narrow) %v9076_v1, 8 }
 0x6f8   :  { %2068 = vxpose.xlu1.b32.start.end [1/1] (short) (narrow) %v9078_v3, 8 }
 0x73d   :  { %v1917_v12 = vpop.permute.xlu1 %1916  ;;  %v1921_v5 = vpop.permute.xlu0 %1920 }
 0x73e   :  { %v1927_v13 = vsel %vm858_vm2, %v1911_v59, %v1917_v12 }
 0x73f   :  { %v1929_v7 = vsel %vm1928_vm3, %v1927_v13, %v1921_v5 }
 0x741   :  { %v1925_v8 = vpop.permute.xlu1 %1924 }
 0x742   :  { %v1931_v10 = vsel %vm1930_vm4, %v1929_v7, %v1925_v8 }
 0x743   :  { %8065 = vmatmul.mubr.msk.f32.vlgmr.msra.gmra.mrb[8].mxu0 %vm489_vm0, %v1931_v10 }
 0x744   :  { %8079 = vmatprep.mubr.msk.f32.mxu0 %vm8780_vm1, %v8779_v25 }
 0x769   :  { %v2116_v0 = vpop.trf.xlu0 }
 0x76a   :  { %8078 = vmatpush3.msra.mxu0 %v2116_v0 }
 0x76b   :  { %8080 = vmatmul.mubr.msk.f32.vlgmr.msra.gmra.mrb[10].mxu0 %vm858_vm2, %v9053_v51  ;;  %8087 = vmatprep.subr.mxu0 %v8779_v25 }
 0x76c   :  { %8089 = vmatprep.mubr.msk.f32.mxu0 %vm8780_vm1, %v8779_v25 }
 0x76d   :  { %v2148_v3 = vpop.trf.xlu0 }
 0x778   :  { %v2084_v1 = vpop.trf.xlu1 }
 0x779   :  { %8073 = vmatpush3.msra.mxu1 %v2084_v1 }
 0x77a   :  { %8075 = vmatmul.mubr.msk.f32.vlgmr.msra.gmra.mrb[14].mxu1 %vm858_vm2, %v9061_v53  ;;  %8082 = vmatprep.subr.mxu1 %v8779_v25 }
 0x77b   :  { %8083 = vmatpush3.msra.mxu1 %v2148_v3  ;;  %8084 = vmatprep.mubr.msk.f32.mxu1 %vm8780_vm1, %v8779_v25 }
 0x77c   :  { %8092 = vmatprep.subr.mxu1 %v8779_v25 }
 0x77e   :  { %8085 = vmatmul.mubr.msk.f32.vlgmr.msra.gmra.mrb[16].mxu1 %vm858_vm2, %v9057_v52 }
 0x77f   :  { %8094 = vmatprep.mubr.msk.f32.mxu1 %vm8780_vm1, %v8779_v25 }
 0x791   :  { %v2232_v51 = vpop.f32.mrb[12].mxu1 }
 0x792   :  { %v8071_v6 = vpop.f32.mrb[13].mxu1  ;;  %v2452_v11 = vsel %vm858_vm2, %v2232_v51, -inf }
 0x793   :  { %2453 = vmax.xlane.f32.xlu0 %v2452_v11 }
 0x816   :  { %v9137_v53 = vpop.f32.mrb[8].mxu0 }
 0x817   :  { %v8066_v14 = vpop.f32.mrb[9].mxu0 }
 0x820   :  { %v2454_v28 = vpop.xlane.xlu0 %2453 }
 0x821   :  { %v2464_v35 = vsub.f32 %v2232_v51, %v2454_v28 }
 0x823   :  { %v2468_v36 = vmul.f32 1.442695, %v2464_v35 }
 0x825   :  { %8586 = vpow2.f32 %v2468_v36 }
 0x82f   :  { %v8587_v39 = vpop.eup %8586 }
 0x830   :  { %v2476_v30 = vsel %vm858_vm2, %v8587_v39, 0.0 }
 0x83e   :  { %v2376_v16 = vpop.f32.mrb[10].mxu0 }
 0x83f   :  { %v8081_v17 = vpop.f32.mrb[11].mxu0  ;;  %v2458_v27 = vsel %vm858_vm2, %v2376_v16, -inf }
 0x84d   :  { %v2304_v18 = vpop.f32.mrb[14].mxu1 }
 0x84e   :  { %v8076_v20 = vpop.f32.mrb[15].mxu1  ;;  %v2455_v21 = vsel %vm858_vm2, %v2304_v18, -inf }
 0x84f   :  { %2456 = vmax.xlane.f32.xlu1 %v2455_v21 }
 0x851   :  { %v2448_v24 = vpop.f32.mrb[16].mxu1 }
 0x852   :  { %v8086_v52 = vpop.f32.mrb[17].mxu1  ;;  %v2461_v26 = vsel %vm858_vm2, %v2448_v24, -inf }
 0x853   :  { %2462 = vmax.xlane.f32.xlu0 %v2461_v26 }
 0x860   :  { %2505 = vrot.lane.b32.xlu1 %v8955_v9, %s8776_s24 }
 0x869   :  { %2507 = vrot.lane.b32.xlu0 %v8955_v9, %s8775_s3 }
 0x884   :  { %2459 = vmax.xlane.f32.xlu1 %v2458_v27 }
 0x895   :  { %2509 = vrot.lane.b32.xlu1 %v8955_v9, %s8778_s26 }
 0x899   :  { %2511 = vrot.lane.b32.xlu1 %v8955_v9, %s8781_s27 }
 0x8dc   :  { %v2457_v31 = vpop.xlane.xlu1 %2456 }
 0x8dd   :  { %v2465_v46 = vsub.f32 %v2304_v18, %v2457_v31 }
 0x8df   :  { %v2470_v47 = vmul.f32 1.442695, %v2465_v46 }
 0x8e0   :  { %v2506_v32 = vpop.permute.xlu1 %2505  ;;  %v2463_v33 = vpop.xlane.xlu0 %2462 }
 0x8e1   :  { %2513 = vrot.lane.b32.xlu0 %v2506_v32, %s8781_s27  ;;  %v2467_v37 = vsub.f32 %v2448_v24, %v2463_v33 }
 0x8e3   :  { %v2474_v38 = vmul.f32 1.442695, %v2467_v37 }
 0x8e4   :  { %v2508_v34 = vpop.permute.xlu0 %2507 }
 0x8e5   :  { %2515 = vrot.lane.b32.xlu1 %v2508_v34, %s8781_s27  ;;  %8588 = vpow2.f32 %v2474_v38 }
 0x8e6   :  { %8590 = vpow2.f32 %v2470_v47 }
 0x8ef   :  { %v8589_v40 = vpop.eup %8588 }
 0x8f0   :  { %v2485_v9 = vsel %vm858_vm2, %v8589_v40, 0.0  ;;  %v8591_v54 = vpop.eup %8590 }
 0x8f1   :  { %v2479_v55 = vsel %vm858_vm2, %v8591_v54, 0.0 }
 0x909   :  { %2477 = vadd.xlane.f32.xlu1 %v2476_v30 }
 0x90d   :  { %2486 = vadd.xlane.f32.xlu1 %v2485_v9 }
 0x911   :  { %v2460_v42 = vpop.xlane.xlu1 %2459 }
 0x912   :  { %v2466_v49 = vsub.f32 %v2376_v16, %v2460_v42 }
 0x914   :  { %v2472_v50 = vmul.f32 1.442695, %v2466_v49 }
 0x915   :  { %v2510_v45 = vpop.permute.xlu1 %2509 }
 0x916   :  { %2517 = vrot.lane.b32.xlu0 %v2510_v45, %s8781_s27  ;;  %8592 = vpow2.f32 %v2472_v50 }
 0x919   :  { %v2512_v59 = vpop.permute.xlu1 %2511 }
 0x920   :  { %v8593_v56 = vpop.eup %8592 }
 0x921   :  { %v2482_v57 = vsel %vm858_vm2, %v8593_v56, 0.0 }
 0x935   :  { %2480 = vadd.xlane.f32.xlu0 %v2479_v55 }
 0x939   :  { %2483 = vadd.xlane.f32.xlu0 %v2482_v57 }
 0x953   :  { %v2514_v58 = vpop.permute.xlu0 %2513 }
 0x954   :  { %2555 = vxpose.xlu1.b32.start.end [1/1] (short) (narrow) %v2514_v58, 8 }
 0x957   :  { %v2516_v60 = vpop.permute.xlu1 %2515 }
 0x966   :  { %2523 = vxpose.xlu0.b32.start.end [1/1] (short) (narrow) %v2512_v59, 8 }
 0x96a   :  { %2587 = vxpose.xlu0.b32.start.end [1/1] (short) (narrow) %v2516_v60, 8 }
 0x988   :  { %v2518_v61 = vpop.permute.xlu0 %2517 }
 0x989   :  { %2619 = vxpose.xlu0.b32.start.end [1/1] (short) (narrow) %v2518_v61, 8 }
 0x996   :  { %v2478_v62 = vpop.xlane.xlu1 %2477 }
 0x997   :  { %8594 = vrcp.f32 %v2478_v62 }
 0x99a   :  { %v2487_v13 = vpop.xlane.xlu1 %2486 }
 0x9a1   :  { %v8595_v2 = vpop.eup %8594 }
 0x9a2   :  { %v2489_v12 = vmul.f32 %v8595_v2, %v8587_v39 }
 0x9a4   :  { %8088 = vmatpush3.xpose.msk.msra.mxu0 %vm858_vm2, %v2489_v12  ;;  %v2496_v1 = vsel %vm858_vm2, %v2489_v12, 0.0 }
 0x9a5   :  { %8097 = vmatprep.subr.mxu0 %v8779_v25 }
 0x9c2   :  { %v2481_v5 = vpop.xlane.xlu0 %2480 }
 0x9c3   :  { %8596 = vrcp.f32 %v2481_v5 }
 0x9c4   :  { %8598 = vrcp.f32 %v2487_v13 }
 0x9c6   :  { %v2484_v7 = vpop.xlane.xlu0 %2483 }
 0x9c7   :  { %8600 = vrcp.f32 %v2484_v7 }
 0x9cd   :  { %v8597_v8 = vpop.eup %8596 }
 0x9ce   :  { %v2491_v10 = vmul.f32 %v8597_v8, %v8591_v54  ;;  %v8599_v0 = vpop.eup %8598 }
 0x9cf   :  { %v2495_v11 = vmul.f32 %v8599_v0, %v8589_v40 }
 0x9d0   :  { %8093 = vmatpush3.xpose.msk.msra.mxu1 %vm858_vm2, %v2491_v10  ;;  %v2497_v3 = vsel %vm858_vm2, %v2491_v10, 0.0 }
 0x9d1   :  { %v8601_v51 = vpop.eup %8600  ;;  %8102 = vmatprep.subr.mxu1 %v8779_v25  ;;  %v2498_v6 = vadd.f32 %v2497_v3, %v2496_v1  ;;  %v2501_v20 = vsel %vm858_vm2, %v2495_v11, 0.0 }
 0x9d2   :  { %v2493_v14 = vmul.f32 %v8601_v51, %v8593_v56 }
 0x9d4   :  { %v2571_v16 = vpop.trf.xlu1  ;;  %v2499_v17 = vsel %vm858_vm2, %v2493_v14, 0.0 }
 0x9d5   :  { %8095 = vmatmul.mubr.msk.f32.vlgmr.msra.gmra.mrb[18].mxu1 %vm858_vm2, %v2571_v16  ;;  %v2500_v18 = vadd.f32 %v2499_v17, %v2498_v6 }
 0x9d6   :  { %8103 = vmatpush3.xpose.msk.msra.mxu1 %vm858_vm2, %v2495_v11  ;;  %8104 = vmatprep.mubr.msk.f32.mxu1 %vm8780_vm1, %v8779_v25 }
 0x9d7   :  { %v9169_v21 = vadd.f32 %v2501_v20, %v2500_v18  ;;  %v9202_v20 = vld [vmem:[#allocation5 + $0x1] ss:$0 sm:$0xff] }
 0x9e6   :  { %v2539_v24 = vpop.trf.xlu0 }
 0x9e7   :  { %8090 = vmatmul.mubr.msk.f32.vlgmr.msra.gmra.mrb[12].mxu0 %vm858_vm2, %v2539_v24 }
 0x9e8   :  { %8098 = vmatpush3.xpose.msk.msra.mxu0 %vm858_vm2, %v2493_v14  ;;  %8099 = vmatprep.mubr.msk.f32.mxu0 %vm8780_vm1, %v8779_v25 }
 0x9e9   :  { %8362 = vmatprep.subr.bf16.mxu0 %v8782_v63 }
 0x9ea   :  { %v2603_v52 = vpop.trf.xlu0 }
 0x9eb   :  { %8100 = vmatmul.mubr.msk.f32.vlgmr.msra.gmra.mrb[14].mxu0 %vm858_vm2, %v2603_v52 }
 0x9ec   :  { %8364 = vmatpush3.bf16.msra.mxu0 %v9080_v15  ;;  %8115 = vmatprep.mubr.msk.f32.mxu0 %vm8780_vm1, %v8779_v25 }
 0x9ed   :  { %8365 = vmatprep.subr.bf16.mxu0 %v8782_v63 }
 0x9f0   :  { %8367 = vmatpush3.bf16.msra.mxu0 %v9108_v4 }
 0xa09   :  { %v2635_v26 = vpop.trf.xlu0 }
 0xa0a   :  { %8105 = vmatmul.mubr.msk.f32.vlgmr.msra.gmra.mrb[20].mxu1 %vm858_vm2, %v2635_v26 }
 0xaa8   :  { %v2799_v27 = vpop.f32.mrb[18].mxu1 }
 0xaa9   :  { %v8096_v28 = vpop.f32.mrb[19].mxu1  ;;  %2987 = vxpose.xlu0.b32.start.end [1/1] (short) (narrow) %v2799_v27, 8 }
 0xaba   :  { %v2723_v31 = vpop.f32.mrb[12].mxu0 }
 0xabb   :  { %v8091_v32 = vpop.f32.mrb[13].mxu0  ;;  %2955 = vxpose.xlu1.b32.start.end [1/1] (short) (narrow) %v2723_v31, 8 }
 0xabe   :  { %v2875_v33 = vpop.f32.mrb[14].mxu0 }
 0xabf   :  { %v8101_v34 = vpop.f32.mrb[15].mxu0  ;;  %3019 = vxpose.xlu1.b32.start.end [1/1] (short) (narrow) %v2875_v33, 8 }
 0xadd   :  { %v2951_v15 = vpop.f32.mrb[20].mxu1 }
 0xade   :  { %3051 = vxpose.xlu0.b32.start.end [1/1] (short) (narrow) %v2951_v15, 8  ;;  %v8106_v35 = vpop.f32.mrb[21].mxu1 }
 0xadf   :  { %v3360_v35 = vld [vmem:[#allocation2 + $0x8] sm:$0xff] }
 0xb29   :  { %v3003_v37 = vpop.trf.xlu0 }
 0xb3b   :  { %v2971_v36 = vpop.trf.xlu1 }
 0xb3f   :  { %v3035_v38 = vpop.trf.xlu1 }
 0xb40   :  { %v3083_v39 = vcombine.low %v2971_v36, %v3035_v38  ;;  %v3084_v4 = vcombine.high %v2971_v36, %v3035_v38  ;;  %v3361_v36 = vld [vmem:[#allocation2 + $0x28] sm:$0xff]  ;;  %v3472_v38 = vld [vmem:[#allocation2 + $0x50] sm:$0xff] }
 0xb42   :  { %v3091_v42 = vrot.slane %v3083_v39, %v8903_v23  ;;  %v3098_v45 = vrot.slane %v3084_v4, %v8903_v23  ;;  %v3473_v39 = vld [vmem:[#allocation2 + $0x70] sm:$0xff] }
 0xb43   :  { %v8512_v4 = vpack.i.bf16 %v3473_v39, %v3472_v38 }
 0xb5e   :  { %v3067_v30 = vpop.trf.xlu0 }
 0xb5f   :  { %v3099_v40 = vcombine.low %v3003_v37, %v3067_v30  ;;  %v3100_v9 = vcombine.high %v3003_v37, %v3067_v30  ;;  %v8507_v37 = vpack.i.bf16 %v3361_v36, %v3360_v35 }
 0xb61   :  { %v3107_v46 = vrot.slane %v3099_v40, %v8903_v23  ;;  %v3114_v47 = vrot.slane %v3100_v9, %v8903_v23 }
 0xb63   :  { %v3115_v49 = vcombine.low %v3091_v42, %v3107_v46  ;;  %v3116_v50 = vcombine.high %v3091_v42, %v3107_v46  ;;  %v3131_v54 = vcombine.low %v3098_v45, %v3114_v47  ;;  %v3132_v55 = vcombine.high %v3098_v45, %v3114_v47 }
 0xb65   :  { %v3123_v56 = vrot.slane %v3115_v49, %v8920_v29  ;;  %v3130_v57 = vrot.slane %v3116_v50, %v8920_v29  ;;  %v3139_v58 = vrot.slane %v3131_v54, %v8920_v29  ;;  %v3146_v59 = vrot.slane %v3132_v55, %v8920_v29  ;;  %v3470_v50 = vld [vmem:[#allocation2 + $0x10] sm:$0xff] }
 0xb66   :  { %v3471_v54 = vld [vmem:[#allocation2 + $0x30] sm:$0xff] }
 0xb67   :  { %v3151_v60 = vcombine.low %v3123_v56, %v3130_v57  ;;  %v7769_v61 = vcombine.high %v3123_v56, %v3130_v57  ;;  %v3167_v62 = vcombine.low %v3139_v58, %v3146_v59  ;;  %v7770_v2 = vcombine.high %v3139_v58, %v3146_v59  ;;  %v3362_v56 = vld [vmem:[#allocation2 + $0x48] sm:$0xff] }
 0xb68   :  { %v9222_v55 = vpack.i.bf16 %v3471_v54, %v3470_v50  ;;  %v3363_v57 = vld [vmem:[#allocation2 + $0x68] sm:$0xff]  ;;  %v8376_v59 = vpack.c.bf16 %v3471_v54, %v3470_v50 }
 0xb69   :  { %v3158_v12 = vrot.slane %v3151_v60, %v8903_v23  ;;  %v3166_v13 = vrot.slane %v7769_v61, %v8903_v23  ;;  %v3174_v5 = vrot.slane %v3167_v62, %v8903_v23  ;;  %v3182_v7 = vrot.slane %v7770_v2, %v8903_v23  ;;  %v8654_v62 = vld.sshfl [vmem:[%s9829_s4] sm:$0xf pattern:$0x76325410] }
 0xb6a   :  { %v8517_v58 = vpack.i.bf16 %v3363_v57, %v3362_v56  ;;  %v8380_v61 = vpack.c.bf16 %v3473_v39, %v3472_v38  ;;  %v8655_v2 = vld.sshfl [vmem:[%s9829_s4 + $0x2] sm:$0xf pattern:$0x76325410]  ;;  %8377 = vmatprep.subr.bf16.mxu0 %v8376_v59 }
 0xb6b   :  { %v3184_v8 = vcombine.high %v3158_v12, %v3166_v13  ;;  %v3200_v10 = vcombine.high %v3174_v5, %v3182_v7  ;;  %v3183_v0 = vcombine.low %v3158_v12, %v3166_v13  ;;  %v3199_v1 = vcombine.low %v3174_v5, %v3182_v7  ;;  %v8656_v12 = vld.sshfl [vmem:[%s9829_s4 + $0x8] sm:$0xf pattern:$0x76325410] }
 0xb6c   :  { %v8657_v7 = vld.sshfl [vmem:[%s9829_s4 + $0xa] sm:$0xf pattern:$0x76325410] }
 0xb6d   :  { %v3198_v3 = vrot.slane %v3184_v8, %v8920_v29  ;;  %v3214_v51 = vrot.slane %v3200_v10, %v8920_v29  ;;  %v3191_v6 = vrot.slane %v3183_v0, %v8920_v29  ;;  %v3207_v11 = vrot.slane %v3199_v1, %v8920_v29  ;;  %v8658_v8 = vld.sshfl [vmem:[%s9827_s2] sm:$0xf pattern:$0x76325410] }
 0xb6e   :  { %v8659_v10 = vld.sshfl [vmem:[%s9827_s2 + $0x2] sm:$0xf pattern:$0x76325410] }
 0xb6f   :  { %v3217_v14 = vcombine.low %v3198_v3, %v3214_v51  ;;  %v3216_v16 = vcombine.high %v3191_v6, %v3207_v11  ;;  %v3215_v17 = vcombine.low %v3191_v6, %v3207_v11  ;;  %v3218_v18 = vcombine.high %v3198_v3, %v3214_v51  ;;  %v8660_v0 = vld.sshfl [vmem:[%s9827_s2 + $0x8] sm:$0xf pattern:$0x76325410] }
 0xb70   :  { %v8661_v1 = vld.sshfl [vmem:[%s9827_s2 + $0xa] sm:$0xf pattern:$0x76325410]  ;;  %v228_v51 = vcombine.low %v8654_v62, %v8655_v2  ;;  %v236_v6 = vcombine.low %v8656_v12, %v8657_v7 }
 0xb71   :  { %3224 = vrot.lane.b32.xlu0 %v3217_v14, %s8783_s28  ;;  %3220 = vrot.lane.b32.xlu1 %v3216_v16, %s8784_s5  ;;  %v410_v14 = vcombine.low %v8658_v8, %v8659_v10  ;;  %v418_v16 = vcombine.low %v8660_v0, %v8661_v1  ;;  %v8666_v1 = vld.sshfl [vmem:[%s9826_s1] sm:$0xf pattern:$0x76325410] }
 0xb72   :  { %v235_v11 = vrot.slane %v228_v51, %v8920_v29 }
 0xb75   :  { %3228 = vrot.lane.b32.xlu1 %v3218_v18, %s8785_s16  ;;  %v417_v18 = vrot.slane %v410_v14, %v8920_v29 }
 0xb79   :  { %3312 = vrot.lane.b32.xlu1 %v9202_v20, %s8781_s27 }
 0xbe3   :  { %v3221_v24 = vpop.permute.xlu1 %3220  ;;  %v3225_v52 = vpop.permute.xlu0 %3224 }
 0xbe4   :  { %v3231_v26 = vsel %vm858_vm2, %v3215_v17, %v3221_v24  ;;  %v243_v17 = vrot.slane %v236_v6, %v8920_v29  ;;  %v425_v24 = vrot.slane %v418_v16, %v8920_v29  ;;  %v8669_v6 = vld.sshfl [vmem:[%s9826_s1 + $0xa] sm:$0xf pattern:$0x76325410] }
 0xbe5   :  { %v3232_v28 = vsel %vm1928_vm3, %v3231_v26, %v3225_v52 }
 0xbe6   :  { %v244_v52 = vcombine.low %v235_v11, %v243_v17  ;;  %v426_v26 = vcombine.low %v417_v18, %v425_v24  ;;  %v427_v2 = vcombine.high %v417_v18, %v425_v24  ;;  %v8670_v18 = vld.sshfl [vmem:[%s9826_s1 + $0x10] sm:$0xf pattern:$0x76325410] }
 0xbe7   :  { %v3229_v27 = vpop.permute.xlu1 %3228  ;;  %v8671_v24 = vld.sshfl [vmem:[%s9826_s1 + $0x12] sm:$0xf pattern:$0x76325410] }
 0xbe8   :  { %v3233_v31 = vsel %vm1930_vm4, %v3232_v28, %v3229_v27  ;;  %v8662_v28 = vld.sshfl [vmem:[%s9827_s2 + $0x10] sm:$0xf pattern:$0x76325410] }
 0xbe9   :  { %8116 = vmatmul.mubr.msk.f32.vlgmr.msra.gmra.mrb[16].mxu0 %vm489_vm0, %v3233_v31  ;;  %v8663_v31 = vld.sshfl [vmem:[%s9827_s2 + $0x12] sm:$0xf pattern:$0x76325410] }
 0xbea   :  { %8379 = vmatpush3.bf16.msra.mxu0 %v8376_v59  ;;  %8137 = vmatprep.mubr.msk.f32.mxu0 %vm489_vm0, %v244_v52  ;;  %v8672_v52 = vld.sshfl [vmem:[%s9826_s1 + $0x18] sm:$0xf pattern:$0x76325410] }
 0xbeb   :  { %v3313_v32 = vpop.permute.xlu1 %3312  ;;  %8381 = vmatprep.subr.bf16.mxu0 %v8380_v61 }
 0xbec   :  { %v3315_v33 = vadd.f32 %v3313_v32, %v9137_v53 }
 0xbee   :  { %v3317_v34 = vadd.f32 %v3315_v33, %v8937_v43  ;;  %8383 = vmatpush3.bf16.msra.mxu0 %v8380_v61  ;;  %v8664_v33 = vld.sshfl [vmem:[%s9827_s2 + $0x18] sm:$0xf pattern:$0x76325410] }
 0xbf0   :  { %v3319_v15 = vsel %vm489_vm0, %v3317_v34, 0.0 }
 0xbf1   :  { %3320 = vadd.xlane.f32.xlu1 %v3319_v15 }
 0xc02   :  { %8508 = vrot.lane.b32.xlu1 %v8507_v37, %s8771_s14 }
 0xc06   :  { %8513 = vrot.lane.b32.xlu1 %v8512_v4, %s8771_s14 }
 0xc7e   :  { %v3321_v30 = vpop.xlane.xlu1 %3320 }
 0xc7f   :  { %v3326_v40 = vmul.f32 0.03125, %v3321_v30 }
 0xc81   :  { %v9215_v42 = vsub.f32 %v3317_v34, %v3326_v40  ;;  %v8665_v34 = vld.sshfl [vmem:[%s9827_s2 + $0x1a] sm:$0xf pattern:$0x76325410] }
 0xc82   :  { %v8509_v60 = vpop.permute.xlu1 %8508 }
 0xc83   :  { %v3330_v47 = vmul.f32 %v9215_v42, %v9215_v42  ;;  %v8511_v13 = vunpack.i.h.bf16 %v8509_v60  ;;  %v8510_v5 = vunpack.i.l.bf16 %v8509_v60  ;;  %v7774_v60 = vld [vmem:[#allocation7 + $0x1] ss:$0 sm:$0xff] }
 0xc85   :  { %v3332_v49 = vsel %vm489_vm0, %v3330_v47, 0.0  ;;  %v8368_v3 = vpack.c.bf16 %v8511_v13, %v8510_v5  ;;  %v468_v47 = vcombine.low %v8664_v33, %v8665_v34 }
 0xc86   :  { %v8514_v36 = vpop.permute.xlu1 %8513 }
 0xc87   :  { %8369 = vmatprep.subr.bf16.mxu1 %v8368_v3  ;;  %v8516_v30 = vunpack.i.h.bf16 %v8514_v36  ;;  %v8515_v40 = vunpack.i.l.bf16 %v8514_v36  ;;  %v475_v54 = vrot.slane %v468_v47, %v8920_v29 }
 0xc88   :  { %8371 = vmatpush3.bf16.msra.mxu1 %v8368_v3  ;;  %v8667_v3 = vld.sshfl [vmem:[%s9826_s1 + $0x2] sm:$0xf pattern:$0x76325410] }
 0xcbc   :  { %v3303_v9 = vpop.f32.mrb[16].mxu0 }
 0xcbd   :  { %v3316_v53 = vadd.f32 %v3313_v32, %v3303_v9  ;;  %v8117_v43 = vpop.f32.mrb[17].mxu0 }
 0xcbf   :  { %v3318_v45 = vadd.f32 %v3316_v53, %v8939_v44  ;;  %v9228_v44 = vld [vmem:[#allocation5 + $0x2] ss:$0 sm:$0xff]  ;;  %v460_v53 = vcombine.low %v8662_v28, %v8663_v31 }
 0xcc1   :  { %v3322_v46 = vsel %vm489_vm0, %v3318_v45, 0.0  ;;  %v467_v50 = vrot.slane %v460_v53, %v8920_v29 }
 0xcc2   :  { %3323 = vadd.xlane.f32.xlu0 %v3322_v46 }
 0xcc3   :  { %v476_v56 = vcombine.low %v467_v50, %v475_v54  ;;  %v477_v12 = vcombine.high %v467_v50, %v475_v54 }
 0xcc6   :  { %3333 = vadd.xlane.f32.xlu0 %v3332_v49  ;;  %v8396_v49 = vpack.c.bf16 %v8516_v30, %v8515_v40 }
 0xcdc   :  { %8503 = vrot.lane.b32.xlu0 %v9222_v55, %s8771_s14 }
 0xce0   :  { %8518 = vrot.lane.b32.xlu0 %v8517_v58, %s8771_s14  ;;  %v7773_v58 = vld [vmem:[#allocation7] ss:$0 sm:$0xff] }
 0xce4   :  { %8528 = vrot.lane.b32.xlu0 %v8512_v4, %s8777_s25 }
 0xce8   :  { %3578 = vrot.lane.b32.xlu0 %v9228_v44, %s8777_s25 }
 0xcec   :  { %3792 = vrot.lane.b32.xlu0 %v8962_v22, %s8781_s27  ;;  %v245_v22 = vcombine.high %v235_v11, %v243_v17 }
 0xcee   :  { %8138 = vmatmul.mubr.msk.f32.vlgmr.msra.gmra.mrb[18].mxu0 %vm489_vm0, %v245_v22  ;;  %v8673_v22 = vld.sshfl [vmem:[%s9826_s1 + $0x1a] sm:$0xf pattern:$0x76325410] }
 0xcef   :  { %8162 = vmatprep.mubr.msk.f32.mxu0 %vm489_vm0, %v426_v26  ;;  %v294_v26 = vcombine.low %v8666_v1, %v8667_v3 }
 0xd4f   :  { %v3324_v27 = vpop.xlane.xlu0 %3323 }
 0xd50   :  { %v3327_v32 = vmul.f32 0.03125, %v3324_v27 }
 0xd52   :  { %v9277_v15 = vsub.f32 %v3318_v45, %v3327_v32  ;;  %v301_v32 = vrot.slane %v294_v26, %v8920_v29 }
 0xd53   :  { %v3334_v35 = vpop.xlane.xlu0 %3333 }
 0xd54   :  { %v3338_v37 = vmul.f32 0.03125, %v3334_v35  ;;  %v3331_v38 = vmul.f32 %v9277_v15, %v9277_v15 }
 0xd56   :  { %v3340_v39 = vadd.f32 1e-05, %v3338_v37  ;;  %v3335_v4 = vsel %vm489_vm0, %v3331_v38, 0.0  ;;  %v344_v38 = vcombine.low %v8670_v18, %v8671_v24 }
 0xd57   :  { %3336 = vadd.xlane.f32.xlu1 %v3335_v4  ;;  %v8504_v9 = vpop.permute.xlu0 %8503 }
 0xd58   :  { %8602 = vrsqrt.f32 %v3340_v39  ;;  %v8506_v43 = vunpack.i.h.bf16 %v8504_v9  ;;  %v8505_v46 = vunpack.i.l.bf16 %v8504_v9  ;;  %v352_v39 = vcombine.low %v8672_v52, %v8673_v22 }
 0xd59   :  { %v351_v9 = vrot.slane %v344_v38, %v8920_v29 }
 0xd5a   :  { %v8392_v45 = vpack.c.bf16 %v8506_v43, %v8505_v46  ;;  %v359_v53 = vrot.slane %v352_v39, %v8920_v29 }
 0xd5c   :  { %8393 = vmatprep.subr.bf16.mxu0 %v8392_v45  ;;  %v360_v43 = vcombine.low %v351_v9, %v359_v53  ;;  %v361_v46 = vcombine.high %v351_v9, %v359_v53 }
 0xd5d   :  { %8395 = vmatpush3.bf16.msra.mxu0 %v8392_v45 }
 0xd5e   :  { %8397 = vmatprep.subr.bf16.mxu0 %v8396_v49 }
 0xd61   :  { %8399 = vmatpush3.bf16.msra.mxu0 %v8396_v49 }
 0xd62   :  { %v8603_v57 = vpop.eup %8602  ;;  %8178 = vmatprep.subr.mxu0 %v8779_v25 }
 0xd63   :  { %v3344_v59 = vmul.f32 %v8603_v57, %v9215_v42  ;;  %v8519_v42 = vpop.permute.xlu0 %8518 }
 0xd64   :  { %8163 = vmatmul.mubr.msk.f32.vlgmr.msra.gmra.mrb[20].mxu0 %vm489_vm0, %v476_v56  ;;  %v8521_v13 = vunpack.i.h.bf16 %v8519_v42  ;;  %v8520_v5 = vunpack.i.l.bf16 %v8519_v42 }
 0xd65   :  { %v3351_v61 = vmul.f32 %v7773_v58, %v3344_v59  ;;  %8165 = vmatprep.mubr.msk.f32.mxu0 %vm489_vm0, %v427_v2 }
 0xd67   :  { %v9287_v62 = vadd.f32 %v7774_v60, %v3351_v61  ;;  %v8529_v31 = vpop.permute.xlu0 %8528 }
 0xd68   :  { %8523 = vrot.lane.b32.xlu1 %v9222_v55, %s8777_s25  ;;  %8166 = vmatmul.mubr.msk.f32.gmra.mrb[22].mxu0 %vm489_vm0, %v477_v12  ;;  %v8372_v55 = vpack.c.bf16 %v8521_v13, %v8520_v5  ;;  %v8531_v34 = vunpack.i.h.bf16 %v8529_v31  ;;  %v8530_v35 = vunpack.i.l.bf16 %v8529_v31 }
 0xd69   :  { %8126 = vmatprep.mubr.msk.f32.mxu1 %vm489_vm0, %v9287_v62  ;;  %8180 = vmatprep.mubr.msk.f32.mxu0 %vm8780_vm1, %v8779_v25 }
 0xd6a   :  { %8373 = vmatprep.subr.bf16.mxu1 %v8372_v55  ;;  %v8388_v40 = vpack.c.bf16 %v8531_v34, %v8530_v35 }
 0xd6b   :  { %8375 = vmatpush3.bf16.msra.mxu1 %v8372_v55  ;;  %v9366_v59 = vpop.permute.xlu0 %3578 }
 0xd6c   :  { %3690 = vrot.lane.b32.xlu1 %v9228_v44, %s8771_s14 }
 0xd6f   :  { %v3793_v42 = vpop.permute.xlu0 %3792 }
 0xd70   :  { %3386 = vrot.lane.b32.xlu1 %v9202_v20, %s8771_s14  ;;  %v8668_v20 = vld.sshfl [vmem:[%s9826_s1 + $0x8] sm:$0xf pattern:$0x76325410] }
 0xd71   :  { %v302_v27 = vcombine.low %v8668_v20, %v8669_v6 }
 0xd73   :  { %v309_v33 = vrot.slane %v302_v27, %v8920_v29 }
 0xd75   :  { %v310_v4 = vcombine.low %v301_v32, %v309_v33 }
 0xdc1   :  { %v9301_v7 = vpop.f32.mrb[18].mxu0 }
 0xdc2   :  { %v3553_v8 = vpop.f32.mrb[19].mxu0 }
 0xde4   :  { %v3337_v10 = vpop.xlane.xlu1 %3336 }
 0xde5   :  { %v3339_v0 = vmul.f32 0.03125, %v3337_v10 }
 0xde7   :  { %v3341_v51 = vadd.f32 1e-05, %v3339_v0 }
 0xde8   :  { %v8524_v11 = vpop.permute.xlu1 %8523 }
 0xde9   :  { %8604 = vrsqrt.f32 %v3341_v51  ;;  %v8526_v14 = vunpack.i.h.bf16 %v8524_v11  ;;  %v8525_v16 = vunpack.i.l.bf16 %v8524_v11 }
 0xdeb   :  { %v8384_v17 = vpack.c.bf16 %v8526_v14, %v8525_v16 }
 0xdec   :  { %v9343_v47 = vpop.permute.xlu1 %3690 }
 0xded   :  { %8385 = vmatprep.subr.bf16.mxu1 %v8384_v17 }
 0xdf3   :  { %v8605_v28 = vpop.eup %8604 }
 0xdf4   :  { %v3345_v36 = vmul.f32 %v8605_v28, %v9277_v15  ;;  %v311_v15 = vcombine.high %v301_v32, %v309_v33 }
 0xdf6   :  { %v3352_v37 = vmul.f32 %v7773_v58, %v3345_v36  ;;  %v9357_v58 = vadd.f32 %v9228_v44, %v3553_v8 }
 0xdf8   :  { %v9330_v30 = vadd.f32 %v7774_v60, %v3352_v37  ;;  %v9368_v60 = vpop.permute.xlu1 %3386 }
 0xdfa   :  { %8127 = vmatmul.mubr.msk.f32.vlgmr.msra.gmra.mrb[22].mxu1 %vm489_vm0, %v9330_v30 }
 0xdfb   :  { %8387 = vmatpush3.bf16.msra.mxu1 %v8384_v17  ;;  %8148 = vmatprep.mubr.msk.f32.mxu1 %vm489_vm0, %v310_v4 }
 0xdfc   :  { %8389 = vmatprep.subr.bf16.mxu1 %v8388_v40 }
 0xdff   :  { %8391 = vmatpush3.bf16.msra.mxu1 %v8388_v40 }
 0xe00   :  { %8168 = vmatprep.subr.mxu1 %v8779_v25 }
 0xe02   :  { %8149 = vmatmul.mubr.msk.f32.vlgmr.msra.gmra.mrb[24].mxu1 %vm489_vm0, %v360_v43 }
 0xe03   :  { %8151 = vmatprep.mubr.msk.f32.mxu1 %vm489_vm0, %v311_v15 }
 0xe06   :  { %8152 = vmatmul.mubr.msk.f32.gmra.mrb[26].mxu1 %vm489_vm0, %v361_v46 }
 0xe07   :  { %8170 = vmatprep.mubr.msk.f32.mxu1 %vm8780_vm1, %v8779_v25 }
 0xe37   :  { %v8164_v45 = vpop.f32.mrb[20].mxu0 }
 0xe38   :  { %v3777_v49 = vadd.f32 %v8164_v45, %v9343_v47  ;;  %v3771_v50 = vpop.f32.mrb[21].mxu0 }
 0xe39   :  { %v3772_v54 = vadd.f32 %v3771_v50, %v9343_v47 }
 0xe3a   :  { %3847 = vrot.lane.b32.xlu0 %v3777_v49, %s8776_s24 }
 0xe3b   :  { %3845 = vrot.lane.b32.xlu1 %v3772_v54, %s8776_s24  ;;  %v9350_v56 = vpop.f32.mrb[22].mxu0 }
 0xe3c   :  { %v9353_v57 = vpop.f32.mrb[23].mxu0 }
 0xe3e   :  { %3859 = vrot.lane.b32.xlu0 %v3777_v49, %s8778_s26 }
 0xe3f   :  { %3857 = vrot.lane.b32.xlu1 %v3772_v54, %s8778_s26 }
 0xe42   :  { %3853 = vrot.lane.b32.xlu0 %v3777_v49, %s8775_s3 }
 0xe43   :  { %3851 = vrot.lane.b32.xlu1 %v3772_v54, %s8775_s3 }
 0xe46   :  { %3841 = vrot.lane.b32.xlu0 %v9357_v58, %s8778_s26 }
 0xe47   :  { %3837 = vrot.lane.b32.xlu1 %v9357_v58, %s8776_s24 }
 0xe4b   :  { %3839 = vrot.lane.b32.xlu1 %v9357_v58, %s8775_s3 }
 0xeac   :  { %v3848_v6 = vpop.permute.xlu0 %3847 }
 0xead   :  { %v3846_v20 = vpop.permute.xlu1 %3845 }
 0xeb0   :  { %v3860_v14 = vpop.permute.xlu0 %3859 }
 0xeb1   :  { %v3858_v11 = vpop.permute.xlu1 %3857 }
 0xeb4   :  { %v3854_v17 = vpop.permute.xlu0 %3853 }
 0xeb5   :  { %v3852_v16 = vpop.permute.xlu1 %3851 }
 0xeb8   :  { %v3842_v24 = vpop.permute.xlu0 %3841 }
 0xeb9   :  { %v3838_v18 = vpop.permute.xlu1 %3837 }
 0xebd   :  { %v3840_v52 = vpop.permute.xlu1 %3839 }
 0xecd   :  { %v9370_v61 = vpop.f32.mrb[22].mxu1 }
 0xece   :  { %v3461_v2 = vpop.f32.mrb[23].mxu1 }
 0xecf   :  { %v3462_v12 = vadd.f32 %v3461_v2, %v9368_v60 }
 0xed1   :  { %v9373_v13 = vadd.f32 %v3793_v42, %v3462_v12 }
 0xed3   :  { %3810 = vrot.lane.b32.xlu0 %v9373_v13, %s8776_s24  ;;  %3812 = vrot.lane.b32.xlu1 %v9373_v13, %s8775_s3 }
 0xed5   :  { %v8150_v5 = vpop.f32.mrb[24].mxu1 }
 0xed6   :  { %v9380_v55 = vadd.f32 %v8150_v5, %v9366_v59  ;;  %v3659_v8 = vpop.f32.mrb[25].mxu1 }
 0xed7   :  { %v9383_v10 = vadd.f32 %v3659_v8, %v9366_v59 }
 0xed8   :  { %v3801_v0 = vadd.f32 %v3777_v49, %v9380_v55 }
 0xed9   :  { %v9386_v1 = vpop.f32.mrb[26].mxu1  ;;  %v3800_v51 = vadd.f32 %v3772_v54, %v9383_v10 }
 0xeda   :  { %v9388_v3 = vpop.f32.mrb[27].mxu1  ;;  %3820 = vrot.lane.b32.xlu0 %v3801_v0, %s8776_s24  ;;  %3826 = vrot.lane.b32.xlu1 %v3801_v0, %s8775_s3 }
 0xede   :  { %3832 = vrot.lane.b32.xlu0 %v3801_v0, %s8778_s26  ;;  %3818 = vrot.lane.b32.xlu1 %v3800_v51, %s8776_s24 }
 0xee2   :  { %3830 = vrot.lane.b32.xlu0 %v3800_v51, %s8778_s26  ;;  %3824 = vrot.lane.b32.xlu1 %v3800_v51, %s8775_s3 }
 0xee6   :  { %3814 = vrot.lane.b32.xlu0 %v9373_v13, %s8778_s26 }
 0xf04   :  { %3895 = vxpose.xlu0.b32.start [1/2] (short) (narrow) %v3846_v20, 8 }
 0xf08   :  { %3896 = vxpose.xlu0.b32.end [2/2] (short) (narrow) %v3848_v6, 8 }
 0xf0b   :  { %3863 = vxpose.xlu1.b32.start [1/2] (short) (narrow) %v3772_v54, 8 }
 0xf0c   :  { %3959 = vxpose.xlu0.b32.start [1/2] (short) (narrow) %v3858_v11, 8 }
 0xf0f   :  { %3864 = vxpose.xlu1.b32.end [2/2] (short) (narrow) %v3777_v49, 8 }
 0xf10   :  { %3960 = vxpose.xlu0.b32.end [2/2] (short) (narrow) %v3860_v14, 8 }
 0xf13   :  { %3927 = vxpose.xlu1.b32.start [1/2] (short) (narrow) %v3852_v16, 8 }
 0xf14   :  { %4279 = vxpose.xlu0.b32.start [1/2] (short) (narrow) %v3800_v51, 8 }
 0xf17   :  { %3928 = vxpose.xlu1.b32.end [2/2] (short) (narrow) %v3854_v17, 8 }
 0xf18   :  { %4280 = vxpose.xlu0.b32.end [2/2] (short) (narrow) %v3801_v0, 8 }
 0xf45   :  { %v3811_v22 = vpop.permute.xlu0 %3810  ;;  %v3813_v26 = vpop.permute.xlu1 %3812 }
 0xf4c   :  { %v3821_v27 = vpop.permute.xlu0 %3820  ;;  %v3827_v28 = vpop.permute.xlu1 %3826 }
 0xf50   :  { %v3819_v31 = vpop.permute.xlu1 %3818  ;;  %v3833_v32 = vpop.permute.xlu0 %3832 }
 0xf51   :  { %4311 = vxpose.xlu1.b32.start [1/2] (short) (narrow) %v3819_v31, 8 }
 0xf54   :  { %v3825_v33 = vpop.permute.xlu1 %3824  ;;  %v3831_v34 = vpop.permute.xlu0 %3830 }
 0xf55   :  { %4312 = vxpose.xlu1.b32.end [2/2] (short) (narrow) %v3821_v27, 8  ;;  %4343 = vxpose.xlu0.b32.start [1/2] (short) (narrow) %v3825_v33, 8 }
 0xf58   :  { %v3815_v35 = vpop.permute.xlu0 %3814 }
 0xf59   :  { %4375 = vxpose.xlu1.b32.start [1/2] (short) (narrow) %v3831_v34, 8  ;;  %4344 = vxpose.xlu0.b32.end [2/2] (short) (narrow) %v3827_v28, 8 }
 0xf5d   :  { %4376 = vxpose.xlu1.b32.end [2/2] (short) (narrow) %v3833_v32, 8 }
 0xf7b   :  { %4751 = vrot.lane.b32.xlu1 %v9380_v55, %s8776_s24 }
 0xf7f   :  { %4753 = vrot.lane.b32.xlu1 %v9383_v10, %s8775_s3 }
 0xf82   :  { %4749 = vrot.lane.b32.xlu0 %v9383_v10, %s8776_s24 }
 0xf83   :  { %4755 = vrot.lane.b32.xlu1 %v9380_v55, %s8775_s3 }
 0xf84   :  { %v3911_v36 = vpop.trf.xlu0 }
 0xf86   :  { %4757 = vrot.lane.b32.xlu0 %v9383_v10, %s8778_s26 }
 0xf8b   :  { %v3879_v37 = vpop.trf.xlu1 }
 0xf8c   :  { %8169 = vmatpush3.msra.mxu1 %v3879_v37  ;;  %v3975_v38 = vpop.trf.xlu0 }
 0xf8d   :  { %8171 = vmatmul.mubr.msk.f32.vlgmr.msra.gmra.mrb[28].mxu1 %vm858_vm2, %v9357_v58  ;;  %8173 = vmatprep.subr.mxu1 %v8779_v25 }
 0xf8e   :  { %8174 = vmatpush3.msra.mxu1 %v3911_v36  ;;  %8175 = vmatprep.mubr.msk.f32.mxu1 %vm8780_vm1, %v8779_v25 }
 0xf8f   :  { %8183 = vmatprep.subr.mxu1 %v8779_v25 }
 0xf91   :  { %8176 = vmatmul.mubr.msk.f32.vlgmr.msra.gmra.mrb[30].mxu1 %vm858_vm2, %v3838_v18 }
 0xf92   :  { %8184 = vmatpush3.msra.mxu1 %v3975_v38  ;;  %8185 = vmatprep.mubr.msk.f32.mxu1 %vm8780_vm1, %v8779_v25 }
 0xf93   :  { %v3943_v39 = vpop.trf.xlu1  ;;  %8188 = vmatprep.subr.mxu1 %v8779_v25 }
 0xf94   :  { %8179 = vmatpush3.msra.mxu0 %v3943_v39  ;;  %v4295_v4 = vpop.trf.xlu0 }
 0xf95   :  { %8181 = vmatmul.mubr.msk.f32.vlgmr.msra.gmra.mrb[24].mxu0 %vm858_vm2, %v3840_v52  ;;  %8186 = vmatmul.mubr.msk.f32.vlgmr.msra.gmra.mrb[32].mxu1 %vm858_vm2, %v3842_v24 }
 0xf96   :  { %8189 = vmatpush3.msra.mxu1 %v4295_v4  ;;  %8190 = vmatprep.mubr.msk.f32.mxu1 %vm8780_vm1, %v8779_v25 }
 0xf97   :  { %8193 = vmatprep.subr.mxu1 %v8779_v25  ;;  %8198 = vmatprep.subr.mxu0 %v8779_v25 }
 0xf98   :  { %8200 = vmatprep.mubr.msk.f32.mxu0 %vm8780_vm1, %v8779_v25 }
 0xf99   :  { %8191 = vmatmul.mubr.msk.f32.vlgmr.msra.gmra.mrb[28].mxu1 %vm858_vm2, %v9373_v13 }
 0xf9a   :  { %8195 = vmatprep.mubr.msk.f32.mxu1 %vm8780_vm1, %v8779_v25 }
 0xfd1   :  { %v4327_v40 = vpop.trf.xlu1 }
 0xfd2   :  { %8194 = vmatpush3.msra.mxu1 %v4327_v40 }
 0xfd3   :  { %8196 = vmatmul.mubr.msk.f32.vlgmr.msra.gmra.mrb[30].mxu1 %vm858_vm2, %v3811_v22  ;;  %8203 = vmatprep.subr.mxu1 %v8779_v25 }
 0xfd4   :  { %8205 = vmatprep.mubr.msk.f32.mxu1 %vm8780_vm1, %v8779_v25 }
 0xfd5   :  { %v4359_v9 = vpop.trf.xlu0 }
 0xfd6   :  { %8199 = vmatpush3.msra.mxu0 %v4359_v9 }
 0xfd7   :  { %8201 = vmatmul.mubr.msk.f32.vlgmr.msra.gmra.mrb[24].mxu0 %vm858_vm2, %v3813_v26  ;;  %8208 = vmatprep.subr.mxu0 %v8779_v25 }
 0xfd8   :  { %8210 = vmatprep.mubr.msk.f32.mxu0 %vm8780_vm1, %v8779_v25 }
 0xfd9   :  { %v4391_v53 = vpop.trf.xlu1 }
 0xfda   :  { %8204 = vmatpush3.msra.mxu1 %v4391_v53 }
 0xfdb   :  { %8206 = vmatmul.mubr.msk.f32.vlgmr.msra.gmra.mrb[32].mxu1 %vm858_vm2, %v3815_v35  ;;  %8223 = vmatprep.subr.mxu1 %v8779_v25 }
 0xfdc   :  { %8225 = vmatprep.mubr.msk.f32.mxu1 %vm8780_vm1, %v8779_v25 }
 0xfed   :  { %v4752_v13 = vpop.permute.xlu1 %4751 }
 0xff1   :  { %v4754_v8 = vpop.permute.xlu1 %4753 }
 0xff4   :  { %v4750_v5 = vpop.permute.xlu0 %4749 }
 0xff5   :  { %v4756_v51 = vpop.permute.xlu1 %4755 }
 0xff8   :  { %v4758_v0 = vpop.permute.xlu0 %4757 }
0x106c   :  { %v4475_v43 = vpop.f32.mrb[28].mxu1 }
0x106d   :  { %v8192_v15 = vpop.f32.mrb[29].mxu1  ;;  %v4695_v46 = vsel %vm1928_vm3, %v4475_v43, -inf }
0x106e   :  { %4696 = vmax.xlane.f32.xlu0 %v4695_v46 }
0x10a6   :  { %v4547_v45 = vpop.f32.mrb[30].mxu1 }
0x10a7   :  { %v8197_v49 = vpop.f32.mrb[31].mxu1  ;;  %v4698_v50 = vsel %vm1928_vm3, %v4547_v45, -inf }
0x10a8   :  { %4699 = vmax.xlane.f32.xlu1 %v4698_v50  ;;  %v3782_v49 = vadd.f32 %v9353_v57, %v9343_v47  ;;  %v9480_v50 = vadd.f32 %v9386_v1, %v9366_v59 }
0x10aa   :  { %v4619_v54 = vpop.f32.mrb[24].mxu0 }
0x10ab   :  { %v8202_v58 = vpop.f32.mrb[25].mxu0  ;;  %v4701_v2 = vsel %vm1928_vm3, %v4619_v54, -inf }
0x10ac   :  { %4702 = vmax.xlane.f32.xlu0 %v4701_v2 }
0x10ae   :  { %v4691_v12 = vpop.f32.mrb[32].mxu1 }
0x10af   :  { %v8207_v42 = vpop.f32.mrb[33].mxu1 }
0x10b9   :  { %4761 = vrot.lane.b32.xlu1 %v9383_v10, %s8777_s25  ;;  %v4704_v10 = vsel %vm1928_vm3, %v4691_v12, -inf }
0x10c2   :  { %4759 = vrot.lane.b32.xlu0 %v9380_v55, %s8778_s26 }
0x10c6   :  { %4763 = vrot.lane.b32.xlu0 %v9380_v55, %s8777_s25 }
0x10ca   :  { %4767 = vrot.lane.b32.xlu0 %v4752_v13, %s8777_s25 }
0x10ce   :  { %4769 = vrot.lane.b32.xlu0 %v4754_v8, %s8777_s25 }
0x10d2   :  { %4773 = vrot.lane.b32.xlu0 %v4758_v0, %s8777_s25 }
0x10d6   :  { %4771 = vrot.lane.b32.xlu0 %v4756_v51, %s8777_s25 }
0x10dd   :  { %4705 = vmax.xlane.f32.xlu1 %v4704_v10 }
0x10fb   :  { %v4697_v20 = vpop.xlane.xlu0 %4696 }
0x10fc   :  { %v4707_v22 = vsub.f32 %v4475_v43, %v4697_v20 }
0x10fe   :  { %v4711_v26 = vmul.f32 1.442695, %v4707_v22 }
0x1135   :  { %v4700_v6 = vpop.xlane.xlu1 %4699 }
0x1136   :  { %v4708_v17 = vsub.f32 %v4547_v45, %v4700_v6  ;;  %v3787_v45 = vadd.f32 %v9350_v56, %v9343_v47  ;;  %v9491_v47 = vadd.f32 %v9388_v3, %v9366_v59  ;;  %v9505_v3 = vadd.f32 %v9301_v7, %v9228_v44 }
0x1138   :  { %v4713_v18 = vmul.f32 1.442695, %v4708_v17  ;;  %v9495_v57 = vadd.f32 %v3782_v49, %v9491_v47 }
0x1139   :  { %v4703_v11 = vpop.xlane.xlu0 %4702  ;;  %v4762_v55 = vpop.permute.xlu1 %4761 }
0x113a   :  { %4785 = vxpose.xlu1.b32.start [1/2] (short) (narrow) %v4762_v55, 8  ;;  %8606 = vpow2.f32 %v4713_v18  ;;  %v4709_v27 = vsub.f32 %v4619_v54, %v4703_v11 }
0x113b   :  { %8608 = vpow2.f32 %v4711_v26 }
0x113c   :  { %v4715_v31 = vmul.f32 1.442695, %v4709_v27 }
0x113d   :  { %v4760_v14 = vpop.permute.xlu0 %4759 }
0x113e   :  { %4775 = vrot.lane.b32.xlu0 %v4760_v14, %s8777_s25  ;;  %8610 = vpow2.f32 %v4715_v31  ;;  %v3467_v14 = vadd.f32 %v9370_v61, %v9368_v60 }
0x1141   :  { %v4764_v16 = vpop.permute.xlu0 %4763 }
0x1142   :  { %4786 = vxpose.xlu1.b32.end [2/2] (short) (narrow) %v4764_v16, 8 }
0x1144   :  { %v9458_v24 = vpop.eup %8606 }
0x1145   :  { %v4722_v52 = vsel %vm1928_vm3, %v9458_v24, 0.0  ;;  %v8609_v34 = vpop.eup %8608  ;;  %v4768_v4 = vpop.permute.xlu0 %4767 }
0x1146   :  { %v4719_v35 = vsel %vm1928_vm3, %v8609_v34, 0.0 }
0x1148   :  { %v8611_v36 = vpop.eup %8610 }
0x1149   :  { %v4725_v37 = vsel %vm1928_vm3, %v8611_v36, 0.0  ;;  %v4770_v40 = vpop.permute.xlu0 %4769 }
0x114d   :  { %v4774_v9 = vpop.permute.xlu0 %4773 }
0x1151   :  { %v4772_v53 = vpop.permute.xlu0 %4771 }
0x115d   :  { %4723 = vadd.xlane.f32.xlu0 %v4722_v52 }
0x1160   :  { %4765 = vrot.lane.b32.xlu1 %v4750_v5, %s8777_s25 }
0x116a   :  { %v4706_v28 = vpop.xlane.xlu1 %4705 }
0x116b   :  { %v4710_v32 = vsub.f32 %v4691_v12, %v4706_v28 }
0x116d   :  { %v4717_v33 = vmul.f32 1.442695, %v4710_v32 }
0x116f   :  { %8612 = vpow2.f32 %v4717_v33 }
0x1179   :  { %v9465_v38 = vpop.eup %8612 }
0x117a   :  { %v4728_v39 = vsel %vm1928_vm3, %v9465_v38, 0.0 }
0x1184   :  { %4720 = vadd.xlane.f32.xlu1 %v4719_v35 }
0x1188   :  { %4726 = vadd.xlane.f32.xlu1 %v4725_v37 }
0x118c   :  { %4729 = vadd.xlane.f32.xlu1 %v4728_v39 }
0x11b0   :  { %v4776_v46 = vpop.permute.xlu0 %4775 }
0x11be   :  { %v4801_v43 = vpop.trf.xlu1 }
0x11bf   :  { %4849 = vxpose.xlu1.b32.start [1/2] (short) (narrow) %v4770_v40, 8 }
0x11c3   :  { %4850 = vxpose.xlu1.b32.end [2/2] (short) (narrow) %v4772_v53, 8 }
0x11d2   :  { %v4766_v15 = vpop.permute.xlu1 %4765 }
0x11d3   :  { %4817 = vxpose.xlu0.b32.start [1/2] (short) (narrow) %v4766_v15, 8 }
0x11d7   :  { %4818 = vxpose.xlu0.b32.end [2/2] (short) (narrow) %v4768_v4, 8 }
0x11db   :  { %4881 = vxpose.xlu0.b32.start [1/2] (short) (narrow) %v4774_v9, 8 }
0x11df   :  { %4882 = vxpose.xlu0.b32.end [2/2] (short) (narrow) %v4776_v46, 8 }
0x11e1   :  { %3794 = vrot.lane.b32.xlu1 %v8958_v19, %s8781_s27  ;;  %v9484_v19 = vadd.f32 %v3787_v45, %v9480_v50 }
0x11e5   :  { %5607 = vrot.lane.b32.xlu1 %v3787_v45, %s8776_s24 }
0x11e9   :  { %5617 = vrot.lane.b32.xlu1 %v3782_v49, %s8778_s26 }
0x11ea   :  { %v4724_v56 = vpop.xlane.xlu0 %4723 }
0x11eb   :  { %8614 = vrcp.f32 %v4724_v56 }
0x11ed   :  { %5619 = vrot.lane.b32.xlu1 %v3787_v45, %s8778_s26 }
0x11f1   :  { %5613 = vrot.lane.b32.xlu1 %v3787_v45, %s8775_s3 }
0x11f5   :  { %5580 = vrot.lane.b32.xlu1 %v9484_v19, %s8776_s24  ;;  %v8615_v58 = vpop.eup %8614 }
0x11f6   :  { %v4734_v2 = vmul.f32 %v8615_v58, %v9458_v24 }
0x11f8   :  { %v4740_v5 = vsel %vm1928_vm3, %v4734_v2, 0.0 }
0x1208   :  { %5605 = vrot.lane.b32.xlu0 %v3782_v49, %s8776_s24 }
0x120c   :  { %5611 = vrot.lane.b32.xlu0 %v3782_v49, %s8775_s3 }
0x1210   :  { %5578 = vrot.lane.b32.xlu0 %v9495_v57, %s8776_s24 }
0x1211   :  { %v4721_v1 = vpop.xlane.xlu1 %4720 }
0x1212   :  { %8616 = vrcp.f32 %v4721_v1 }
0x1214   :  { %5584 = vrot.lane.b32.xlu0 %v9495_v57, %s8775_s3 }
0x1215   :  { %v4727_v54 = vpop.xlane.xlu1 %4726 }
0x1216   :  { %8618 = vrcp.f32 %v4727_v54 }
0x1218   :  { %5586 = vrot.lane.b32.xlu0 %v9484_v19, %s8775_s3 }
0x1219   :  { %v4730_v59 = vpop.xlane.xlu1 %4729 }
0x121a   :  { %8620 = vrcp.f32 %v4730_v59 }
0x121c   :  { %v8617_v12 = vpop.eup %8616  ;;  %5597 = vrot.lane.b32.xlu0 %v9505_v3, %s8776_s24 }
0x121d   :  { %v4732_v42 = vmul.f32 %v8617_v12, %v8609_v34 }
0x121e   :  { %5623 = vxpose.xlu1.b32.start [1/2] (short) (narrow) %v3782_v49, 8 }
0x121f   :  { %8209 = vmatpush3.xpose.msk.msra.mxu0 %vm1928_vm3, %v4732_v42  ;;  %v4739_v13 = vsel %vm1928_vm3, %v4732_v42, 0.0 }
0x1220   :  { %v8619_v8 = vpop.eup %8618  ;;  %5601 = vrot.lane.b32.xlu0 %v9505_v3, %s8778_s26  ;;  %8213 = vmatprep.subr.mxu0 %v8779_v25  ;;  %v4741_v44 = vadd.f32 %v4740_v5, %v4739_v13 }
0x1221   :  { %v4736_v7 = vmul.f32 %v8619_v8, %v8611_v36 }
0x1222   :  { %5624 = vxpose.xlu1.b32.end [2/2] (short) (narrow) %v3787_v45, 8  ;;  %8211 = vmatmul.mubr.msk.f32.vlgmr.msra.gmra.mrb[26].mxu0 %vm1928_vm3, %v4801_v43 }
0x1223   :  { %8214 = vmatpush3.xpose.msk.msra.mxu0 %vm1928_vm3, %v4734_v2  ;;  %8215 = vmatprep.mubr.msk.f32.mxu0 %vm8780_vm1, %v8779_v25  ;;  %v4742_v0 = vsel %vm1928_vm3, %v4736_v7, 0.0 }
0x1224   :  { %v8621_v51 = vpop.eup %8620  ;;  %8218 = vmatprep.subr.mxu0 %v8779_v25  ;;  %v4743_v10 = vadd.f32 %v4742_v0, %v4741_v44 }
0x1225   :  { %v4738_v20 = vmul.f32 %v8621_v51, %v9465_v38 }
0x1227   :  { %8224 = vmatpush3.xpose.msk.msra.mxu1 %vm1928_vm3, %v4738_v20  ;;  %v4744_v6 = vsel %vm1928_vm3, %v4738_v20, 0.0 }
0x1228   :  { %8239 = vmatprep.subr.mxu1 %v8779_v25  ;;  %v9526_v11 = vadd.f32 %v4744_v6, %v4743_v10 }
0x123f   :  { %v4865_v55 = vpop.trf.xlu1 }
0x1253   :  { %v4833_v16 = vpop.trf.xlu0  ;;  %v3795_v17 = vpop.permute.xlu1 %3794 }
0x1254   :  { %v9530_v18 = vadd.f32 %v3795_v17, %v3467_v14  ;;  %8216 = vmatmul.mubr.msk.f32.vlgmr.msra.gmra.mrb[28].mxu0 %vm1928_vm3, %v4833_v16 }
0x1255   :  { %8219 = vmatpush3.xpose.msk.msra.mxu0 %vm1928_vm3, %v4736_v7  ;;  %8220 = vmatprep.mubr.msk.f32.mxu0 %vm8780_vm1, %v8779_v25 }
0x1256   :  { %8400 = vmatprep.subr.bf16.mxu0 %v8782_v63 }
0x1257   :  { %v5608_v60 = vpop.permute.xlu1 %5607 }
0x1258   :  { %8221 = vmatmul.mubr.msk.f32.vlgmr.msra.gmra.mrb[30].mxu0 %vm1928_vm3, %v4865_v55 }
0x1259   :  { %8236 = vmatprep.mubr.msk.f32.mxu0 %vm8780_vm1, %v8779_v25 }
0x125b   :  { %v4897_v24 = vpop.trf.xlu0  ;;  %v5618_v52 = vpop.permute.xlu1 %5617 }
0x125c   :  { %8226 = vmatmul.mubr.msk.f32.vlgmr.msra.gmra.mrb[34].mxu1 %vm1928_vm3, %v4897_v24  ;;  %v9576_v24 = vld [vmem:[#allocation2 + $0x18] sm:$0xff] }
0x125d   :  { %8241 = vmatprep.mubr.msk.f32.mxu1 %vm8780_vm1, %v8779_v25 }
0x125f   :  { %v5620_v22 = vpop.permute.xlu1 %5619 }
0x1263   :  { %v5614_v26 = vpop.permute.xlu1 %5613 }
0x1267   :  { %v5581_v27 = vpop.permute.xlu1 %5580 }
0x127a   :  { %v5606_v61 = vpop.permute.xlu0 %5605 }
0x127b   :  { %5655 = vxpose.xlu0.b32.start [1/2] (short) (narrow) %v5606_v61, 8 }
0x127e   :  { %v5612_v31 = vpop.permute.xlu0 %5611 }
0x127f   :  { %5656 = vxpose.xlu0.b32.end [2/2] (short) (narrow) %v5608_v60, 8  ;;  %v9578_v60 = vld [vmem:[#allocation2 + $0x38] sm:$0xff] }
0x1280   :  { %v9582_v61 = vpack.c.bf16 %v9578_v60, %v9576_v24 }
0x1282   :  { %v5579_v32 = vpop.permute.xlu0 %5578  ;;  %8402 = vmatpush3.bf16.msra.mxu0 %v9582_v61 }
0x1283   :  { %5719 = vxpose.xlu0.b32.start [1/2] (short) (narrow) %v5618_v52, 8  ;;  %8403 = vmatprep.subr.bf16.mxu0 %v8782_v63 }
0x1286   :  { %v9548_v33 = vpop.permute.xlu0 %5584 }
0x1287   :  { %5720 = vxpose.xlu0.b32.end [2/2] (short) (narrow) %v5620_v22, 8 }
0x128a   :  { %v9550_v34 = vpop.permute.xlu0 %5586 }
0x128e   :  { %v5598_v35 = vpop.permute.xlu0 %5597 }
0x1292   :  { %v5602_v38 = vpop.permute.xlu0 %5601 }
0x129e   :  { %v5639_v28 = vpop.trf.xlu1 }
0x129f   :  { %8240 = vmatpush3.msra.mxu1 %v5639_v28 }
0x12a0   :  { %8242 = vmatmul.mubr.msk.f32.vlgmr.msra.gmra.mrb[36].mxu1 %vm858_vm2, %v9505_v3  ;;  %8244 = vmatprep.subr.mxu1 %v8779_v25 }
0x12a1   :  { %8246 = vmatprep.mubr.msk.f32.mxu1 %vm8780_vm1, %v8779_v25 }
0x12f5   :  { %v4985_v36 = vpop.f32.mrb[26].mxu0 }
0x12f6   :  { %5217 = vxpose.xlu1.b32.start.end [1/1] (short) (narrow) %v4985_v36, 8  ;;  %v8212_v37 = vpop.f32.mrb[27].mxu0  ;;  %v9590_v36 = vld [vmem:[#allocation2 + $0x58] sm:$0xff] }
0x12f7   :  { %v9592_v37 = vld [vmem:[#allocation2 + $0x78] sm:$0xff] }
0x12fb   :  { %v5671_v39 = vpop.trf.xlu0 }
0x12fc   :  { %8245 = vmatpush3.msra.mxu1 %v5671_v39 }
0x12fd   :  { %8247 = vmatmul.mubr.msk.f32.vlgmr.msra.gmra.mrb[38].mxu1 %vm858_vm2, %v5598_v35  ;;  %8254 = vmatprep.subr.mxu1 %v8779_v25 }
0x12fe   :  { %8256 = vmatprep.mubr.msk.f32.mxu1 %vm8780_vm1, %v8779_v25 }
0x1303   :  { %v5735_v4 = vpop.trf.xlu0 }
0x1304   :  { %8255 = vmatpush3.msra.mxu1 %v5735_v4 }
0x1305   :  { %8257 = vmatmul.mubr.msk.f32.vlgmr.msra.gmra.mrb[40].mxu1 %vm858_vm2, %v5602_v38  ;;  %8259 = vmatprep.subr.mxu1 %v8779_v25  ;;  %v9596_v38 = vpack.c.bf16 %v9592_v37, %v9590_v36 }
0x1306   :  { %8261 = vmatprep.mubr.msk.f32.mxu1 %vm8780_vm1, %v8779_v25 }
0x1307   :  { %8405 = vmatpush3.bf16.msra.mxu0 %v9596_v38 }
0x1308   :  { %8249 = vmatprep.subr.mxu0 %v8779_v25 }
0x1327   :  { %v5061_v40 = vpop.f32.mrb[28].mxu0 }
0x1328   :  { %v8217_v9 = vpop.f32.mrb[29].mxu0  ;;  %5249 = vxpose.xlu0.b32.start.end [1/1] (short) (narrow) %v5061_v40, 8 }
0x132b   :  { %v5137_v53 = vpop.f32.mrb[30].mxu0 }
0x132c   :  { %5281 = vxpose.xlu1.b32.start.end [1/1] (short) (narrow) %v5137_v53, 8  ;;  %v8222_v43 = vpop.f32.mrb[31].mxu0 }
0x132f   :  { %v5213_v15 = vpop.f32.mrb[34].mxu1 }
0x1330   :  { %5687 = vxpose.xlu1.b32.start [1/2] (short) (narrow) %v5612_v31, 8  ;;  %5313 = vxpose.xlu0.b32.start.end [1/1] (short) (narrow) %v5213_v15, 8  ;;  %v8227_v46 = vpop.f32.mrb[35].mxu1 }
0x1334   :  { %5688 = vxpose.xlu1.b32.end [2/2] (short) (narrow) %v5614_v26, 8 }
0x1338   :  { %6071 = vxpose.xlu1.b32.start [1/2] (short) (narrow) %v5579_v32, 8 }
0x133c   :  { %6072 = vxpose.xlu1.b32.end [2/2] (short) (narrow) %v5581_v27, 8 }
0x1359   :  { %5570 = vrot.lane.b32.xlu0 %v9530_v18, %s8776_s24 }
0x135a   :  { %5590 = vrot.lane.b32.xlu1 %v9495_v57, %s8778_s26 }
0x135d   :  { %5574 = vrot.lane.b32.xlu0 %v9530_v18, %s8778_s26 }
0x135e   :  { %5592 = vrot.lane.b32.xlu1 %v9484_v19, %s8778_s26 }
0x1376   :  { %v5233_v45 = vpop.trf.xlu1 }
0x13a8   :  { %v5265_v49 = vpop.trf.xlu0 }
0x13ac   :  { %v5297_v56 = vpop.trf.xlu1 }
0x13ad   :  { %v5345_v1 = vcombine.low %v5233_v45, %v5297_v56  ;;  %v5346_v54 = vcombine.high %v5233_v45, %v5297_v56 }
0x13af   :  { %v5353_v13 = vrot.slane %v5345_v1, %v8903_v23  ;;  %v5360_v5 = vrot.slane %v5346_v54, %v8903_v23 }
0x13b0   :  { %v5329_v58 = vpop.trf.xlu0  ;;  %v5703_v45 = vpop.trf.xlu1 }
0x13b1   :  { %v5361_v59 = vcombine.low %v5265_v49, %v5329_v58  ;;  %v5362_v2 = vcombine.high %v5265_v49, %v5329_v58 }
0x13b3   :  { %v5369_v12 = vrot.slane %v5361_v59, %v8903_v23  ;;  %v5376_v42 = vrot.slane %v5362_v2, %v8903_v23 }
0x13b5   :  { %v5377_v8 = vcombine.low %v5353_v13, %v5369_v12  ;;  %v5378_v44 = vcombine.high %v5353_v13, %v5369_v12  ;;  %v5393_v7 = vcombine.low %v5360_v5, %v5376_v42  ;;  %v5394_v0 = vcombine.high %v5360_v5, %v5376_v42 }
0x13b7   :  { %v5385_v51 = vrot.slane %v5377_v8, %v8920_v29  ;;  %v5392_v10 = vrot.slane %v5378_v44, %v8920_v29  ;;  %v5401_v20 = vrot.slane %v5393_v7, %v8920_v29  ;;  %v5408_v6 = vrot.slane %v5394_v0, %v8920_v29 }
0x13b8   :  { %v6087_v49 = vpop.trf.xlu1 }
0x13b9   :  { %v5413_v55 = vcombine.low %v5385_v51, %v5392_v10  ;;  %v7805_v14 = vcombine.high %v5385_v51, %v5392_v10  ;;  %v5429_v16 = vcombine.low %v5401_v20, %v5408_v6  ;;  %v7806_v17 = vcombine.high %v5401_v20, %v5408_v6 }
0x13bb   :  { %v5420_v52 = vrot.slane %v5413_v55, %v8903_v23  ;;  %v5428_v22 = vrot.slane %v7805_v14, %v8903_v23  ;;  %v5436_v26 = vrot.slane %v5429_v16, %v8903_v23  ;;  %v5444_v27 = vrot.slane %v7806_v17, %v8903_v23 }
0x13bd   :  { %v5446_v28 = vcombine.high %v5420_v52, %v5428_v22  ;;  %v5462_v31 = vcombine.high %v5436_v26, %v5444_v27  ;;  %v5445_v32 = vcombine.low %v5420_v52, %v5428_v22  ;;  %v5461_v35 = vcombine.low %v5436_v26, %v5444_v27 }
0x13bf   :  { %v5460_v39 = vrot.slane %v5446_v28, %v8920_v29  ;;  %v5476_v4 = vrot.slane %v5462_v31, %v8920_v29  ;;  %v5453_v40 = vrot.slane %v5445_v32, %v8920_v29  ;;  %v5469_v9 = vrot.slane %v5461_v35, %v8920_v29 }
0x13c1   :  { %v5479_v53 = vcombine.low %v5460_v39, %v5476_v4  ;;  %v5478_v43 = vcombine.high %v5453_v40, %v5469_v9  ;;  %v5477_v15 = vcombine.low %v5453_v40, %v5469_v9  ;;  %v5480_v46 = vcombine.high %v5460_v39, %v5476_v4 }
0x13c3   :  { %5486 = vrot.lane.b32.xlu0 %v5479_v53, %s8783_s28  ;;  %5482 = vrot.lane.b32.xlu1 %v5478_v43, %s8784_s5 }
0x13c7   :  { %5599 = vrot.lane.b32.xlu1 %v9505_v3, %s8775_s3 }
0x13cb   :  { %5572 = vrot.lane.b32.xlu1 %v9530_v18, %s8775_s3  ;;  %v5571_v3 = vpop.permute.xlu0 %5570 }
0x13cc   :  { %v5591_v56 = vpop.permute.xlu1 %5590 }
0x13cf   :  { %5490 = vrot.lane.b32.xlu1 %v5480_v46, %s8785_s16  ;;  %v5575_v59 = vpop.permute.xlu0 %5574 }
0x13d0   :  { %v5593_v1 = vpop.permute.xlu1 %5592 }
0x13e1   :  { %6039 = vxpose.xlu0.b32.start [1/2] (short) (narrow) %v9495_v57, 8 }
0x13e5   :  { %6040 = vxpose.xlu0.b32.end [2/2] (short) (narrow) %v9484_v19, 8 }
0x13e9   :  { %6103 = vxpose.xlu0.b32.start [1/2] (short) (narrow) %v9548_v33, 8 }
0x13ed   :  { %6104 = vxpose.xlu0.b32.end [2/2] (short) (narrow) %v9550_v34, 8 }
0x13f8   :  { %6135 = vxpose.xlu1.b32.start [1/2] (short) (narrow) %v5591_v56, 8 }
0x13fc   :  { %6136 = vxpose.xlu1.b32.end [2/2] (short) (narrow) %v5593_v1, 8 }
0x1435   :  { %v5483_v54 = vpop.permute.xlu1 %5482  ;;  %v5487_v12 = vpop.permute.xlu0 %5486 }
0x1436   :  { %v5493_v57 = vsel %vm858_vm2, %v5477_v15, %v5483_v54 }
0x1437   :  { %v5494_v19 = vsel %vm1928_vm3, %v5493_v57, %v5487_v12 }
0x1439   :  { %v5600_v58 = vpop.permute.xlu1 %5599 }
0x143d   :  { %v5573_v2 = vpop.permute.xlu1 %5572 }
0x1441   :  { %v5491_v42 = vpop.permute.xlu1 %5490 }
0x1442   :  { %v5495_v33 = vsel %vm1930_vm4, %v5494_v19, %v5491_v42 }
0x1443   :  { %8237 = vmatmul.mubr.msk.f32.vlgmr.msra.gmra.mrb[32].mxu0 %vm489_vm0, %v5495_v33 }
0x1444   :  { %8250 = vmatpush3.msra.mxu0 %v5703_v45  ;;  %8251 = vmatprep.mubr.msk.f32.mxu0 %vm8780_vm1, %v8779_v25 }
0x1445   :  { %8269 = vmatprep.subr.mxu0 %v8779_v25 }
0x1447   :  { %8252 = vmatmul.mubr.msk.f32.vlgmr.msra.gmra.mrb[34].mxu0 %vm858_vm2, %v5600_v58 }
0x1448   :  { %8271 = vmatprep.mubr.msk.f32.mxu0 %vm8780_vm1, %v8779_v25 }
0x1461   :  { %v6055_v34 = vpop.trf.xlu0 }
0x1462   :  { %8260 = vmatpush3.msra.mxu1 %v6055_v34 }
0x1463   :  { %8262 = vmatmul.mubr.msk.f32.vlgmr.msra.gmra.mrb[36].mxu1 %vm858_vm2, %v9530_v18  ;;  %8264 = vmatprep.subr.mxu1 %v8779_v25 }
0x1464   :  { %8265 = vmatpush3.msra.mxu1 %v6087_v49  ;;  %8266 = vmatprep.mubr.msk.f32.mxu1 %vm8780_vm1, %v8779_v25 }
0x1465   :  { %8274 = vmatprep.subr.mxu1 %v8779_v25 }
0x1467   :  { %8267 = vmatmul.mubr.msk.f32.vlgmr.msra.gmra.mrb[38].mxu1 %vm858_vm2, %v5571_v3 }
0x1468   :  { %8276 = vmatprep.mubr.msk.f32.mxu1 %vm8780_vm1, %v8779_v25 }
0x1469   :  { %v6119_v13 = vpop.trf.xlu0 }
0x146a   :  { %8270 = vmatpush3.msra.mxu0 %v6119_v13 }
0x146b   :  { %8272 = vmatmul.mubr.msk.f32.vlgmr.msra.gmra.mrb[34].mxu0 %vm858_vm2, %v5573_v2  ;;  %8279 = vmatprep.subr.mxu0 %v8779_v25 }
0x146c   :  { %8281 = vmatprep.mubr.msk.f32.mxu0 %vm8780_vm1, %v8779_v25 }
0x1478   :  { %v6151_v18 = vpop.trf.xlu1 }
0x1479   :  { %8275 = vmatpush3.msra.mxu1 %v6151_v18 }
0x147a   :  { %8277 = vmatmul.mubr.msk.f32.vlgmr.msra.gmra.mrb[40].mxu1 %vm858_vm2, %v5575_v59  ;;  %8294 = vmatprep.subr.mxu1 %v8779_v25 }
0x147b   :  { %8296 = vmatprep.mubr.msk.f32.mxu1 %vm8780_vm1, %v8779_v25 }
0x1516   :  { %v9642_v5 = vpop.f32.mrb[32].mxu0 }
0x1517   :  { %v8238_v8 = vpop.f32.mrb[33].mxu0 }
0x1536   :  { %v6235_v44 = vpop.f32.mrb[36].mxu1 }
0x1537   :  { %v8263_v7 = vpop.f32.mrb[37].mxu1  ;;  %v6455_v0 = vsel %vm1928_vm3, %v6235_v44, -inf }
0x1538   :  { %6456 = vmax.xlane.f32.xlu0 %v6455_v0 }
0x153a   :  { %v6307_v51 = vpop.f32.mrb[38].mxu1 }
0x153b   :  { %v8268_v10 = vpop.f32.mrb[39].mxu1  ;;  %v6458_v20 = vsel %vm1928_vm3, %v6307_v51, -inf }
0x153c   :  { %6459 = vmax.xlane.f32.xlu1 %v6458_v20 }
0x153e   :  { %v6379_v6 = vpop.f32.mrb[34].mxu0 }
0x153f   :  { %v8273_v55 = vpop.f32.mrb[35].mxu0  ;;  %v6461_v52 = vsel %vm1928_vm3, %v6379_v6, -inf }
0x154d   :  { %v6451_v14 = vpop.f32.mrb[40].mxu1 }
0x154e   :  { %6509 = vrot.lane.b32.xlu0 %v9491_v47, %s8776_s24  ;;  %v8278_v16 = vpop.f32.mrb[41].mxu1  ;;  %v6464_v17 = vsel %vm1928_vm3, %v6451_v14, -inf }
0x154f   :  { %6465 = vmax.xlane.f32.xlu1 %v6464_v17 }
0x1552   :  { %6517 = vrot.lane.b32.xlu0 %v9491_v47, %s8778_s26 }
0x1560   :  { %6511 = vrot.lane.b32.xlu1 %v9480_v50, %s8776_s24 }
0x1564   :  { %6513 = vrot.lane.b32.xlu1 %v9491_v47, %s8775_s3 }
0x1568   :  { %6515 = vrot.lane.b32.xlu1 %v9480_v50, %s8775_s3 }
0x156c   :  { %6521 = vrot.lane.b32.xlu1 %v9491_v47, %s8777_s25 }
0x1571   :  { %6462 = vmax.xlane.f32.xlu0 %v6461_v52 }
0x1587   :  { %6519 = vrot.lane.b32.xlu0 %v9480_v50, %s8778_s26 }
0x158b   :  { %6523 = vrot.lane.b32.xlu0 %v9480_v50, %s8777_s25 }
0x15c5   :  { %v6457_v22 = vpop.xlane.xlu0 %6456 }
0x15c6   :  { %v6467_v26 = vsub.f32 %v6235_v44, %v6457_v22 }
0x15c8   :  { %v6471_v56 = vmul.f32 1.442695, %v6467_v26 }
0x15c9   :  { %v6460_v27 = vpop.xlane.xlu1 %6459  ;;  %v6510_v35 = vpop.permute.xlu0 %6509 }
0x15ca   :  { %v6468_v15 = vsub.f32 %v6307_v51, %v6460_v27 }
0x15cc   :  { %v6473_v46 = vmul.f32 1.442695, %v6468_v15 }
0x15cd   :  { %v6518_v47 = vpop.permute.xlu0 %6517 }
0x15ce   :  { %8622 = vpow2.f32 %v6473_v46 }
0x15cf   :  { %8624 = vpow2.f32 %v6471_v56 }
0x15d8   :  { %v8623_v45 = vpop.eup %8622 }
0x15d9   :  { %v6482_v49 = vsel %vm1928_vm3, %v8623_v45, 0.0  ;;  %v8625_v54 = vpop.eup %8624 }
0x15da   :  { %v6479_v58 = vsel %vm1928_vm3, %v8625_v54, 0.0 }
0x15dc   :  { %v6466_v28 = vpop.xlane.xlu1 %6465 }
0x15dd   :  { %v6470_v31 = vsub.f32 %v6451_v14, %v6466_v28 }
0x15df   :  { %v6477_v1 = vmul.f32 1.442695, %v6470_v31 }
0x15e0   :  { %v6512_v32 = vpop.permute.xlu1 %6511 }
0x15e1   :  { %6527 = vrot.lane.b32.xlu0 %v6512_v32, %s8777_s25  ;;  %8626 = vpow2.f32 %v6477_v1 }
0x15e4   :  { %v6514_v39 = vpop.permute.xlu1 %6513 }
0x15e5   :  { %6529 = vrot.lane.b32.xlu0 %v6514_v39, %s8777_s25 }
0x15e8   :  { %v6516_v4 = vpop.permute.xlu1 %6515 }
0x15e9   :  { %6533 = vrot.lane.b32.xlu0 %v6518_v47, %s8777_s25 }
0x15eb   :  { %v8627_v59 = vpop.eup %8626 }
0x15ec   :  { %v6522_v40 = vpop.permute.xlu1 %6521  ;;  %v6488_v2 = vsel %vm1928_vm3, %v8627_v59, 0.0 }
0x15ed   :  { %6531 = vrot.lane.b32.xlu0 %v6516_v4, %s8777_s25  ;;  %6545 = vxpose.xlu1.b32.start [1/2] (short) (narrow) %v6522_v40, 8 }
0x15fe   :  { %v6463_v50 = vpop.xlane.xlu0 %6462 }
0x15ff   :  { %v6469_v9 = vsub.f32 %v6379_v6, %v6463_v50 }
0x1601   :  { %v6475_v3 = vmul.f32 1.442695, %v6469_v9 }
0x1602   :  { %v6520_v53 = vpop.permute.xlu0 %6519 }
0x1603   :  { %6535 = vrot.lane.b32.xlu0 %v6520_v53, %s8777_s25  ;;  %8628 = vpow2.f32 %v6475_v3 }
0x1606   :  { %v6524_v43 = vpop.permute.xlu0 %6523 }
0x1607   :  { %6546 = vxpose.xlu1.b32.end [2/2] (short) (narrow) %v6524_v43, 8 }
0x160d   :  { %v8629_v12 = vpop.eup %8628 }
0x160e   :  { %v6485_v57 = vsel %vm1928_vm3, %v8629_v12, 0.0 }
0x1622   :  { %6483 = vadd.xlane.f32.xlu0 %v6482_v49 }
0x1625   :  { %6525 = vrot.lane.b32.xlu1 %v6510_v35, %s8777_s25 }
0x1649   :  { %6480 = vadd.xlane.f32.xlu1 %v6479_v58 }
0x164d   :  { %6489 = vadd.xlane.f32.xlu1 %v6488_v2 }
0x1651   :  { %6486 = vadd.xlane.f32.xlu1 %v6485_v57 }
0x1653   :  { %v6528_v19 = vpop.permute.xlu0 %6527 }
0x1657   :  { %v6530_v42 = vpop.permute.xlu0 %6529 }
0x165b   :  { %v6534_v33 = vpop.permute.xlu0 %6533 }
0x165f   :  { %v6532_v34 = vpop.permute.xlu0 %6531 }
0x1675   :  { %v6536_v8 = vpop.permute.xlu0 %6535 }
0x1683   :  { %v6561_v13 = vpop.trf.xlu1 }
0x1684   :  { %6609 = vxpose.xlu1.b32.start [1/2] (short) (narrow) %v6530_v42, 8 }
0x1688   :  { %6610 = vxpose.xlu1.b32.end [2/2] (short) (narrow) %v6532_v34, 8 }
0x1697   :  { %v6526_v18 = vpop.permute.xlu1 %6525 }
0x1698   :  { %6577 = vxpose.xlu0.b32.start [1/2] (short) (narrow) %v6526_v18, 8 }
0x169c   :  { %6578 = vxpose.xlu0.b32.end [2/2] (short) (narrow) %v6528_v19, 8 }
0x16a0   :  { %6641 = vxpose.xlu0.b32.start [1/2] (short) (narrow) %v6534_v33, 8 }
0x16a4   :  { %6642 = vxpose.xlu0.b32.end [2/2] (short) (narrow) %v6536_v8, 8 }
0x16af   :  { %v6484_v44 = vpop.xlane.xlu0 %6483 }
0x16b0   :  { %8630 = vrcp.f32 %v6484_v44 }
0x16ba   :  { %v8631_v51 = vpop.eup %8630 }
0x16bb   :  { %v6494_v20 = vmul.f32 %v8631_v51, %v8623_v45 }
0x16bd   :  { %v6500_v16 = vsel %vm1928_vm3, %v6494_v20, 0.0 }
0x16d6   :  { %v6481_v7 = vpop.xlane.xlu1 %6480 }
0x16d7   :  { %8632 = vrcp.f32 %v6481_v7 }
0x16da   :  { %v6490_v0 = vpop.xlane.xlu1 %6489 }
0x16db   :  { %8634 = vrcp.f32 %v6490_v0 }
0x16de   :  { %v6487_v10 = vpop.xlane.xlu1 %6486 }
0x16df   :  { %8636 = vrcp.f32 %v6487_v10 }
0x16e1   :  { %v8633_v6 = vpop.eup %8632 }
0x16e2   :  { %v6492_v55 = vmul.f32 %v8633_v6, %v8625_v54 }
0x16e4   :  { %8280 = vmatpush3.xpose.msk.msra.mxu0 %vm1928_vm3, %v6492_v55  ;;  %v6499_v14 = vsel %vm1928_vm3, %v6492_v55, 0.0 }
0x16e5   :  { %v8635_v17 = vpop.eup %8634  ;;  %8284 = vmatprep.subr.mxu0 %v8779_v25  ;;  %v6501_v52 = vadd.f32 %v6500_v16, %v6499_v14 }
0x16e6   :  { %v6498_v22 = vmul.f32 %v8635_v17, %v8627_v59 }
0x16e7   :  { %8282 = vmatmul.mubr.msk.f32.vlgmr.msra.gmra.mrb[36].mxu0 %vm1928_vm3, %v6561_v13 }
0x16e8   :  { %8285 = vmatpush3.xpose.msk.msra.mxu0 %vm1928_vm3, %v6494_v20  ;;  %8295 = vmatpush3.xpose.msk.msra.mxu1 %vm1928_vm3, %v6498_v22  ;;  %v6504_v32 = vsel %vm1928_vm3, %v6498_v22, 0.0 }
0x16e9   :  { %v8637_v26 = vpop.eup %8636  ;;  %8286 = vmatprep.mubr.msk.f32.mxu0 %vm8780_vm1, %v8779_v25  ;;  %8289 = vmatprep.subr.mxu0 %v8779_v25 }
0x16ea   :  { %v6496_v27 = vmul.f32 %v8637_v26, %v8629_v12 }
0x16ec   :  { %v6502_v28 = vsel %vm1928_vm3, %v6496_v27, 0.0 }
0x16ed   :  { %v6503_v31 = vadd.f32 %v6502_v28, %v6501_v52 }
0x16ef   :  { %v9686_v35 = vadd.f32 %v6504_v32, %v6503_v31 }
0x1704   :  { %v6625_v47 = vpop.trf.xlu1 }
0x1718   :  { %v6593_v39 = vpop.trf.xlu0 }
0x1719   :  { %8287 = vmatmul.mubr.msk.f32.vlgmr.msra.gmra.mrb[38].mxu0 %vm1928_vm3, %v6593_v39 }
0x171a   :  { %8290 = vmatpush3.xpose.msk.msra.mxu0 %vm1928_vm3, %v6496_v27  ;;  %8291 = vmatprep.mubr.msk.f32.mxu0 %vm8780_vm1, %v8779_v25 }
0x171b   :  { %8406 = vmatprep.subr.bf16.mxu0 %v8782_v63 }
0x171d   :  { %8292 = vmatmul.mubr.msk.f32.vlgmr.msra.gmra.mrb[40].mxu0 %vm1928_vm3, %v6625_v47 }
0x171e   :  { %8408 = vmatpush3.bf16.msra.mxu0 %v9582_v61  ;;  %8307 = vmatprep.mubr.msk.f32.mxu0 %vm8780_vm1, %v8779_v25 }
0x171f   :  { %8409 = vmatprep.subr.bf16.mxu0 %v8782_v63 }
0x1720   :  { %v6657_v4 = vpop.trf.xlu0 }
0x1721   :  { %8297 = vmatmul.mubr.msk.f32.vlgmr.msra.gmra.mrb[42].mxu1 %vm1928_vm3, %v6657_v4  ;;  %v7827_v4 = vld [vmem:[#allocation5 + $0x3] ss:$0 sm:$0xff] }
0x1722   :  { %8411 = vmatpush3.bf16.msra.mxu0 %v9596_v38 }
0x17ba   :  { %v6745_v40 = vpop.f32.mrb[36].mxu0 }
0x17bb   :  { %6977 = vxpose.xlu1.b32.start.end [1/1] (short) (narrow) %v6745_v40, 8  ;;  %v8283_v50 = vpop.f32.mrb[37].mxu0  ;;  %v7335_v40 = vadd.f32 %v7827_v4, %v9642_v5 }
0x17bd   :  { %v7337_v50 = vadd.f32 %v7335_v40, %v9287_v62 }
0x17ec   :  { %v6821_v9 = vpop.f32.mrb[38].mxu0 }
0x17ed   :  { %7009 = vxpose.xlu0.b32.start.end [1/1] (short) (narrow) %v6821_v9, 8  ;;  %v8288_v53 = vpop.f32.mrb[39].mxu0  ;;  %v7339_v9 = vsel %vm489_vm0, %v7337_v50, 0.0 }
0x17f0   :  { %v6897_v43 = vpop.f32.mrb[40].mxu0 }
0x17f1   :  { %7041 = vxpose.xlu1.b32.start.end [1/1] (short) (narrow) %v6897_v43, 8  ;;  %v8293_v15 = vpop.f32.mrb[41].mxu0 }
0x17f4   :  { %v6973_v61 = vpop.f32.mrb[42].mxu1 }
0x17f5   :  { %7073 = vxpose.xlu0.b32.start.end [1/1] (short) (narrow) %v6973_v61, 8  ;;  %v8298_v46 = vpop.f32.mrb[43].mxu1 }
0x183b   :  { %v6993_v45 = vpop.trf.xlu1 }
0x186d   :  { %v7025_v49 = vpop.trf.xlu0 }
0x1871   :  { %v7057_v63 = vpop.trf.xlu1 }
0x1872   :  { %v7105_v56 = vcombine.low %v6993_v45, %v7057_v63  ;;  %v7106_v1 = vcombine.high %v6993_v45, %v7057_v63 }
0x1874   :  { %v7113_v2 = vrot.slane %v7105_v56, %v8903_v23  ;;  %v7120_v12 = vrot.slane %v7106_v1, %v8903_v23 }
0x1875   :  { %v7089_v3 = vpop.trf.xlu0 }
0x1876   :  { %v7121_v54 = vcombine.low %v7025_v49, %v7089_v3  ;;  %v7122_v38 = vcombine.high %v7025_v49, %v7089_v3 }
0x1878   :  { %v7129_v58 = vrot.slane %v7121_v54, %v8903_v23  ;;  %v7136_v59 = vrot.slane %v7122_v38, %v8903_v23 }
0x187a   :  { %v7137_v57 = vcombine.low %v7113_v2, %v7129_v58  ;;  %v7138_v19 = vcombine.high %v7113_v2, %v7129_v58  ;;  %v7153_v42 = vcombine.low %v7120_v12, %v7136_v59  ;;  %v7154_v33 = vcombine.high %v7120_v12, %v7136_v59 }
0x187c   :  { %v7145_v34 = vrot.slane %v7137_v57, %v8920_v29  ;;  %v7152_v13 = vrot.slane %v7138_v19, %v8920_v29  ;;  %v7161_v18 = vrot.slane %v7153_v42, %v8920_v29  ;;  %v7168_v8 = vrot.slane %v7154_v33, %v8920_v29  ;;  %v7828_v19 = vld [vmem:[#allocation7 + $0x2] ss:$0 sm:$0xff]  ;;  %v7829_v33 = vld [vmem:[#allocation7 + $0x3] ss:$0 sm:$0xff] }
0x187e   :  { %v7173_v44 = vcombine.low %v7145_v34, %v7152_v13  ;;  %v7824_v7 = vcombine.high %v7145_v34, %v7152_v13  ;;  %v7189_v0 = vcombine.low %v7161_v18, %v7168_v8  ;;  %v7825_v51 = vcombine.high %v7161_v18, %v7168_v8 }
0x187f   :  { %v8532_v18 = vpack.i.bf16 %v9578_v60, %v9576_v24  ;;  %v7491_v60 = vld [vmem:[%s9832_s7] sm:$0xff] }
0x1880   :  { %v7180_v10 = vrot.slane %v7173_v44, %v8903_v23  ;;  %v7188_v20 = vrot.slane %v7824_v7, %v8903_v23  ;;  %v7196_v6 = vrot.slane %v7189_v0, %v8903_v23  ;;  %v7204_v55 = vrot.slane %v7825_v51, %v8903_v23 }
0x1881   :  { %v8537_v51 = vpack.i.bf16 %v9592_v37, %v9590_v36  ;;  %v7493_v36 = vld [vmem:[%s9832_s7 + $0x10] sm:$0xff] }
0x1882   :  { %v7205_v14 = vcombine.low %v7180_v10, %v7188_v20  ;;  %v7221_v16 = vcombine.low %v7196_v6, %v7204_v55  ;;  %v7206_v17 = vcombine.high %v7180_v10, %v7188_v20  ;;  %v7222_v52 = vcombine.high %v7196_v6, %v7204_v55  ;;  %v7492_v55 = vld [vmem:[%s9832_s7 + $0x8] sm:$0xff] }
0x1883   :  { %v8420_v37 = vpack.c.bf16 %v7492_v55, %v7491_v60 }
0x1884   :  { %v7213_v22 = vrot.slane %v7205_v14, %v8920_v29  ;;  %v7229_v26 = vrot.slane %v7221_v16, %v8920_v29  ;;  %v7220_v27 = vrot.slane %v7206_v17, %v8920_v29  ;;  %v7236_v28 = vrot.slane %v7222_v52, %v8920_v29  ;;  %v7494_v14 = vld [vmem:[%s9832_s7 + $0x18] sm:$0xff]  ;;  %v7495_v17 = vld [vmem:[%s9832_s7 + $0x20] sm:$0xff]  ;;  %v7496_v52 = vld [vmem:[%s9832_s7 + $0x28] sm:$0xff] }
0x1885   :  { %v8424_v16 = vpack.c.bf16 %v7494_v14, %v7493_v36  ;;  %8421 = vmatprep.subr.bf16.mxu0 %v8420_v37  ;;  %v2503_v36 = vmul.f32 0.25, %v9169_v21  ;;  %v7836_v21 = vld [vmem:[#allocation7 + $0x4] ss:$0 sm:$0xff] }
0x1886   :  { %v7238_v31 = vcombine.high %v7213_v22, %v7229_v26  ;;  %v7239_v32 = vcombine.low %v7220_v27, %v7236_v28  ;;  %v7237_v39 = vcombine.low %v7213_v22, %v7229_v26  ;;  %v7240_v47 = vcombine.high %v7220_v27, %v7236_v28 }
0x1887   :  { %v8428_v22 = vpack.c.bf16 %v7496_v52, %v7495_v17 }
0x1888   :  { %7242 = vrot.lane.b32.xlu1 %v7238_v31, %s8784_s5  ;;  %7246 = vrot.lane.b32.xlu0 %v7239_v32, %s8783_s28 }
0x188c   :  { %7250 = vrot.lane.b32.xlu1 %v7240_v47, %s8785_s16 }
0x18b0   :  { %7340 = vadd.xlane.f32.xlu1 %v7339_v9 }
0x18fa   :  { %v7243_v53 = vpop.permute.xlu1 %7242  ;;  %v7247_v15 = vpop.permute.xlu0 %7246 }
0x18fb   :  { %v7253_v43 = vsel %vm858_vm2, %v7237_v39, %v7243_v53  ;;  %v7497_v53 = vld [vmem:[%s9832_s7 + $0x30] sm:$0xff] }
0x18fc   :  { %v7254_v61 = vsel %vm1928_vm3, %v7253_v43, %v7247_v15  ;;  %v7498_v43 = vld [vmem:[%s9832_s7 + $0x38] sm:$0xff] }
0x18fd   :  { %v8432_v15 = vpack.c.bf16 %v7498_v43, %v7497_v53 }
0x18fe   :  { %v7251_v46 = vpop.permute.xlu1 %7250 }
0x18ff   :  { %v7255_v45 = vsel %vm1930_vm4, %v7254_v61, %v7251_v46 }
0x1900   :  { %8308 = vmatmul.mubr.msk.f32.vlgmr.msra.gmra.mrb[42].mxu0 %vm489_vm0, %v7255_v45 }
0x1901   :  { %8423 = vmatpush3.bf16.msra.mxu0 %v8420_v37 }
0x1902   :  { %8425 = vmatprep.subr.bf16.mxu0 %v8424_v16 }
0x1905   :  { %8427 = vmatpush3.bf16.msra.mxu0 %v8424_v16 }
0x1906   :  { %8429 = vmatprep.subr.bf16.mxu0 %v8428_v22 }
0x1909   :  { %8431 = vmatpush3.bf16.msra.mxu0 %v8428_v22  ;;  %v7837_v22 = vld [vmem:[#allocation7 + $0x5] ss:$0 sm:$0xff] }
0x190a   :  { %8433 = vmatprep.subr.bf16.mxu0 %v8432_v15 }
0x190d   :  { %8435 = vmatpush3.bf16.msra.mxu0 %v8432_v15 }
0x193d   :  { %v7341_v49 = vpop.xlane.xlu1 %7340 }
0x193e   :  { %v7345_v63 = vmul.f32 0.03125, %v7341_v49 }
0x1940   :  { %v7347_v56 = vsub.f32 %v7337_v50, %v7345_v63 }
0x1942   :  { %v7349_v5 = vmul.f32 %v7347_v56, %v7347_v56 }
0x1944   :  { %v7351_v62 = vsel %vm489_vm0, %v7349_v5, 0.0 }
0x1945   :  { %7352 = vadd.xlane.f32.xlu1 %v7351_v62  ;;  %v7833_v62 = vld [vmem:[#allocation7 + $0x6] ss:$0 sm:$0xff] }
0x1956   :  { %8533 = vrot.lane.b32.xlu1 %v8532_v18, %s8777_s25 }
0x195a   :  { %7405 = vrot.lane.b32.xlu1 %v7827_v4, %s8777_s25 }
0x19d2   :  { %v7353_v1 = vpop.xlane.xlu1 %7352 }
0x19d3   :  { %v7357_v3 = vmul.f32 0.03125, %v7353_v1  ;;  %v7325_v54 = vpop.f32.mrb[42].mxu0 }
0x19d4   :  { %v7336_v38 = vadd.f32 %v7827_v4, %v7325_v54  ;;  %v8309_v58 = vpop.f32.mrb[43].mxu0 }
0x19d5   :  { %v7359_v59 = vadd.f32 1e-05, %v7357_v3 }
0x19d6   :  { %v7338_v2 = vadd.f32 %v7336_v38, %v9330_v30  ;;  %v8534_v10 = vpop.permute.xlu1 %8533 }
0x19d7   :  { %8638 = vrsqrt.f32 %v7359_v59  ;;  %v8536_v20 = vunpack.i.h.bf16 %v8534_v10  ;;  %v8535_v6 = vunpack.i.l.bf16 %v8534_v10 }
0x19d8   :  { %v7342_v12 = vsel %vm489_vm0, %v7338_v2, 0.0 }
0x19d9   :  { %7343 = vadd.xlane.f32.xlu0 %v7342_v12  ;;  %v8412_v24 = vpack.c.bf16 %v8536_v20, %v8535_v6 }
0x19da   :  { %v7406_v61 = vpop.permute.xlu1 %7405 }
0x19db   :  { %8413 = vmatprep.subr.bf16.mxu1 %v8412_v24 }
0x19dc   :  { %8415 = vmatpush3.bf16.msra.mxu1 %v8412_v24 }
0x19e1   :  { %v8639_v57 = vpop.eup %8638 }
0x19e2   :  { %v7363_v42 = vmul.f32 %v8639_v57, %v7347_v56 }
0x19e4   :  { %v7370_v34 = vmul.f32 %v7828_v19, %v7363_v42 }
0x19e6   :  { %v9729_v13 = vadd.f32 %v7829_v33, %v7370_v34 }
0x19e8   :  { %8318 = vmatprep.mubr.msk.f32.mxu1 %vm489_vm0, %v9729_v13 }
0x1a66   :  { %v7344_v30 = vpop.xlane.xlu0 %7343 }
0x1a67   :  { %v7346_v8 = vmul.f32 0.03125, %v7344_v30 }
0x1a69   :  { %v7348_v44 = vsub.f32 %v7338_v2, %v7346_v8 }
0x1a6b   :  { %v7350_v7 = vmul.f32 %v7348_v44, %v7348_v44 }
0x1a6d   :  { %v7354_v0 = vsel %vm489_vm0, %v7350_v7, 0.0 }
0x1a6e   :  { %7355 = vadd.xlane.f32.xlu0 %v7354_v0  ;;  %v4746_v0 = vmul.f32 0.25, %v9526_v11 }
0x1a84   :  { %8538 = vrot.lane.b32.xlu0 %v8537_v51, %s8777_s25  ;;  %v1196_v51 = vsel %vm858_vm2, %v9039_v48, 0.0 }
0x1a85   :  { %v1197_v20 = vadd.f32 %v1196_v51, %v9033_v41 }
0x1a87   :  { %v1199_v14 = vmul.f32 0.25, %v1197_v20 }
0x1afb   :  { %v7356_v26 = vpop.xlane.xlu0 %7355 }
0x1afc   :  { %v7358_v27 = vmul.f32 0.03125, %v7356_v26 }
0x1afe   :  { %v7360_v28 = vadd.f32 1e-05, %v7358_v27 }
0x1aff   :  { %v8539_v31 = vpop.permute.xlu0 %8538 }
0x1b00   :  { %8640 = vrsqrt.f32 %v7360_v28  ;;  %v8541_v32 = vunpack.i.h.bf16 %v8539_v31  ;;  %v8540_v39 = vunpack.i.l.bf16 %v8539_v31 }
0x1b02   :  { %v8416_v47 = vpack.c.bf16 %v8541_v32, %v8540_v39 }
0x1b04   :  { %8417 = vmatprep.subr.bf16.mxu1 %v8416_v47 }
0x1b05   :  { %8419 = vmatpush3.bf16.msra.mxu1 %v8416_v47 }
0x1b0a   :  { %v8641_v4 = vpop.eup %8640 }
0x1b0b   :  { %v7364_v40 = vmul.f32 %v8641_v4, %v7348_v44 }
0x1b0d   :  { %v7371_v50 = vmul.f32 %v7828_v19, %v7364_v40 }
0x1b0f   :  { %v7378_v9 = vadd.f32 %v7829_v33, %v7371_v50 }
0x1b11   :  { %8319 = vmatmul.mubr.msk.f32.vlgmr.msra.gmra.mrb[44].mxu1 %vm489_vm0, %v7378_v9 }
0x1be4   :  { %v8320_v46 = vpop.f32.mrb[44].mxu1 }
0x1be5   :  { %v7486_v45 = vadd.f32 %v8320_v46, %v7406_v61  ;;  %v7480_v49 = vpop.f32.mrb[45].mxu1 }
0x1be6   :  { %v7481_v63 = vadd.f32 %v7480_v49, %v7406_v61 }
0x1be7   :  { %v7490_v5 = vmax.f32 %v7486_v45, 0.0 }
0x1be8   :  { %v7489_v56 = vmax.f32 %v7481_v63, 0.0 }
0x1bea   :  { %8337 = vmatprep.mubr.msk.f32.mxu0 %vm7504_vm5, %v7489_v56 }
0x1beb   :  { %8338 = vmatmul.mubr.msk.f32.vlgmr.msra.gmra.mrb[44].mxu0 %vm7504_vm5, %v7490_v5 }
0x1cbe   :  { %v8339_v1 = vpop.f32.mrb[44].mxu0 }
0x1cbf   :  { %v7583_v3 = vadd.f32 %v8339_v1, %v7833_v62  ;;  %v7577_v54 = vpop.f32.mrb[45].mxu0 }
0x1cc0   :  { %v7578_v38 = vadd.f32 %v7833_v62, %v7577_v54 }
0x1cc1   :  { %v7587_v58 = vadd.f32 %v7583_v3, %v7378_v9 }
0x1cc2   :  { %v7586_v59 = vadd.f32 %v7578_v38, %v9729_v13  ;;  %v6506_v13 = vmul.f32 0.25, %v9686_v35 }
0x1cc3   :  { %v7591_v2 = vsel %vm489_vm0, %v7587_v58, 0.0 }
0x1cc4   :  { %7592 = vadd.xlane.f32.xlu0 %v7591_v2  ;;  %v7588_v12 = vsel %vm489_vm0, %v7586_v59, 0.0 }
0x1cc5   :  { %7589 = vadd.xlane.f32.xlu1 %v7588_v12 }
0x1d51   :  { %v7593_v57 = vpop.xlane.xlu0 %7592 }
0x1d52   :  { %v7595_v19 = vmul.f32 0.03125, %v7593_v57  ;;  %v7590_v42 = vpop.xlane.xlu1 %7589 }
0x1d53   :  { %v7594_v33 = vmul.f32 0.03125, %v7590_v42 }
0x1d54   :  { %v7597_v34 = vsub.f32 %v7587_v58, %v7595_v19 }
0x1d55   :  { %v7596_v18 = vsub.f32 %v7586_v59, %v7594_v33 }
0x1d56   :  { %v7599_v30 = vmul.f32 %v7597_v34, %v7597_v34 }
0x1d57   :  { %v7598_v8 = vmul.f32 %v7596_v18, %v7596_v18 }
0x1d58   :  { %v7603_v44 = vsel %vm489_vm0, %v7599_v30, 0.0 }
0x1d59   :  { %7604 = vadd.xlane.f32.xlu1 %v7603_v44  ;;  %v7600_v7 = vsel %vm489_vm0, %v7598_v8, 0.0 }
0x1d5a   :  { %7601 = vadd.xlane.f32.xlu0 %v7600_v7 }
0x1d6a   :  { %7707 = vrot.lane.b32.xlu1 %v6506_v13, %s8784_s5 }
0x1d70   :  { %7705 = vrot.lane.b32.xlu0 %v4746_v0, %s8784_s5 }
0x1de6   :  { %v7605_v10 = vpop.xlane.xlu1 %7604 }
0x1de7   :  { %v7607_v6 = vmul.f32 0.03125, %v7605_v10  ;;  %v7602_v24 = vpop.xlane.xlu0 %7601 }
0x1de8   :  { %v7606_v60 = vmul.f32 0.03125, %v7602_v24 }
0x1de9   :  { %v7609_v55 = vadd.f32 1e-05, %v7607_v6 }
0x1dea   :  { %v7608_v37 = vadd.f32 1e-05, %v7606_v60  ;;  %v7708_v35 = vpop.permute.xlu1 %7707 }
0x1deb   :  { %8642 = vrsqrt.f32 %v7609_v55  ;;  %v7712_v11 = vsel %vm858_vm2, %v2503_v36, %v7708_v35  ;;  %v7706_v16 = vpop.permute.xlu0 %7705 }
0x1dec   :  { %8644 = vrsqrt.f32 %v7608_v37  ;;  %7714 = vst.msk [vmem:[%s9835_s10 + $0x8] sm:$0xff] %vm1930_vm4, %v7712_v11  ;;  %v7711_v41 = vsel %vm858_vm2, %v1199_v14, %v7706_v16 }
0x1ded   :  { %7713 = vst.msk [vmem:[%s9835_s10] sm:$0xff] %vm1930_vm4, %v7711_v41  ;;  %s8786_s10 = smov [#allocation8]  }
0x1dee   :  { %s7720_s22 = sshll.u32 %s8786_s10, 4  ;;  %s7721_s22 = int_to_ptr.vmem [resolvable:$true] %s7720_s22 }
0x1def   :  { %s8740_s23 = scalar_lea.vmem %s7721_s22, 256  ;;  %p8745_p11 = scmp.lt.s32.totalorder %s7721_s22, %s7721_s22 }
0x1df0   :  { %p8741_p10 = scmp.ne.s32.totalorder %s7721_s22, %s8740_s23  ;;  %p8746_p12 = scmp.lt.s32.totalorder %s8740_s23, %s8740_s23 }
0x1df2   :  { %p8747_p13 = por %p8746_p12, %p8745_p11 }
0x1df4   :  { %p8748_p0 = pnand %p8747_p13, %p8741_p10 }
0x1df5   :  { %v8643_v48 = vpop.eup %8642 }
0x1df6   :  { %v8645_v17 = vpop.eup %8644  ;;  %v7613_v52 = vmul.f32 %v8643_v48, %v7597_v34 }
0x1df7   :  { %v7612_v26 = vmul.f32 %v8645_v17, %v7596_v18 }
0x1df8   :  { %v7620_v27 = vmul.f32 %v7836_v21, %v7613_v52 }
0x1df9   :  { %v7619_v28 = vmul.f32 %v7836_v21, %v7612_v26 }
0x1dfa   :  { %v7627_v31 = vadd.f32 %v7837_v22, %v7620_v27 }
0x1dfb   :  { %v7626_v32 = vadd.f32 %v7837_v22, %v7619_v28 }
0x1dfc   :  { %v7643_v39 = vcombine.high %v7627_v31, %v8779_v25  ;;  %v7650_v47 = vrot.slane %v7627_v31, %v8903_v23 }
0x1dfd   :  { %v7628_v4 = vcombine.high %v7626_v32, %v8779_v25  ;;  %v7635_v40 = vrot.slane %v7626_v32, %v8903_v23 }
0x1dfe   :  { %v7657_v50 = vrot.slane %v7643_v39, %v8903_v23 }
0x1dff   :  { %v7642_v9 = vrot.slane %v7628_v4, %v8903_v23  ;;  %v7658_v53 = vcombine.low %v7635_v40, %v7650_v47  ;;  %v7659_v43 = vcombine.high %v7635_v40, %v7650_v47 }
0x1e01   :  { %v7666_v15 = vrot.slane %v7658_v53, %v8920_v29  ;;  %v7673_v61 = vrot.slane %v7659_v43, %v8920_v29  ;;  %v7674_v46 = vcombine.low %v7642_v9, %v7657_v50  ;;  %v7675_v45 = vcombine.high %v7642_v9, %v7657_v50 }
0x1e03   :  { %v7682_v49 = vrot.slane %v7674_v46, %v8920_v29  ;;  %v7689_v63 = vrot.slane %v7675_v45, %v8920_v29  ;;  %v7690_v56 = vcombine.high %v7666_v15, %v8779_v25  ;;  %v7691_v5 = vcombine.high %v7673_v61, %v8779_v25  ;;  %7695 = vst.msk [vmem:[#allocation8] sm:$0x3] %vm7694_vm6, %v7666_v15 }
0x1e04   :  { %7697 = vst.msk [vmem:[#allocation8 + $0x4] sm:$0x3] %vm7694_vm6, %v7673_v61 }
0x1e05   :  { %v7692_v23 = vcombine.high %v7682_v49, %v8779_v25  ;;  %v7693_v62 = vcombine.high %v7689_v63, %v8779_v25  ;;  %7696 = vst.msk [vmem:[#allocation8 + $0x2] sm:$0x3] %vm7694_vm6, %v7690_v56  ;;  %7698 = vst.msk [vmem:[#allocation8 + $0x6] sm:$0x3] %vm7694_vm6, %v7691_v5 }
0x1e06   :  { %7699 = vst.msk [vmem:[#allocation8 + $0x8] sm:$0x3] %vm7694_vm6, %v7682_v49  ;;  %7701 = vst.msk [vmem:[#allocation8 + $0xc] sm:$0x3] %vm7694_vm6, %v7689_v63 }
0x1e07   :  { %7700 = vst.msk [vmem:[#allocation8 + $0xa] sm:$0x3] %vm7694_vm6, %v7692_v23  ;;  %7702 = vst.msk [vmem:[#allocation8 + $0xe] sm:$0x3] %vm7694_vm6, %v7693_v62 }
0x1e08   :  { %8751 = shalt.err (!%p8748_p0)
}
0x1e09   :  { %s8752_s29 = scalar_lea.hbm %s9834_s9, 256 }
0x1e0a   :  { %p8753_p1 = scmp.ne.s32.totalorder %s9834_s9, %s8752_s29  ;;  %p8756_p2 = scmp.lt.u32.totalorder %s8752_s29, %s9834_s9 }
0x1e0c   :  { %p8758_p3 = pnand %p8756_p2, %p8753_p1 }
0x1e0e   :  { %8761 = shalt.err (!%p8758_p3)
}
0x1e0f   :  { %s8787_s3 = smov 2  }
0x1e10   :  { %7726 = dma.vmem_to_hbm [thread:$0]  %s7721_s22, 256, %s9834_s9, [#allocation4], %s8771_s14, %s8771_s14, %s8787_s3  }
0x1e11   :  { %8766 = dma.done.wait [#allocation4], 256  }
0x1e12   :  { %8767 = vsyncadd [#allocation4], 4294967040 }
0x1e13   :  { %7734 = vsyncpa [#allocation3], 1 }
0x1e14   :  { %7735 = vsyncpa [#allocation6], 1 }
0x1e15   :  { %7736 = vsyncpa [#allocation4], 1 }

</bundles_post_ra>
